<compile_context>
chip_gen: v7x
topology: tpu7x:2x2x1
jax: 0.10.0
libtpu: 0.0.40
codegen_flags: <defaults>
</compile_context>

<pallas_src>
import numpy as np
import jax
import jax.numpy as jnp
from jax.experimental import pallas as pl
from jax.experimental.pallas import tpu as pltpu

LATENT_DIM = 10     # latent_dim
CAPACITY = 16       # capacity (small for the example; module default is 64)
BATCH = 2
K = 4               # ConvTranspose2d kernel size
STRIDE = 2
PAD = 1


# --------------------------- fused Pallas kernel ----------------------------
def _decoder_kernel(fcw_ref, fcb_ref, a_ref, b2_ref, c_ref, b1_ref, x_ref,
                    out_ref, x2p_ref, e2s_ref, o2s_ref):
    f32 = jnp.float32
    bf16 = jnp.bfloat16
    B = x_ref.shape[0]

    # Zero the padded-row scratches; the pad rows that are never overwritten
    # represent out-of-range feature-map rows (= 0) for the shifted matmuls.
    x2p_ref[...] = jnp.zeros_like(x2p_ref)
    e2s_ref[...] = jnp.zeros_like(e2s_ref)
    o2s_ref[...] = jnp.zeros_like(o2s_ref)

    # ---- fc_: produce the 7x7 NHWC feature map row by row ------------------
    # x2p row i+1 holds NHWC row i of the (7, 7, 2c) map, flattened as (w, c).
    xb = x_ref[...].astype(bf16)                                  # (B, latent)
    for i in range(7):
        row = jnp.dot(xb, fcw_ref[i], preferred_element_type=f32)  # (B, 7*2c)
        row = row + fcb_ref[i]
        x2p_ref[:, i + 1, :] = row                                  # rows 1..7

    for b in range(B):
        # ---- relu(conv2_): ConvT(2c->c, k4, s2, p1), row-phase form --------
        xm   = x2p_ref[b, 1:8, :].astype(bf16)   # X2[m]      (7, 7*2c)
        xmm1 = x2p_ref[b, 0:7, :].astype(bf16)   # X2[m-1]
        xmp1 = x2p_ref[b, 2:9, :].astype(bf16)   # X2[m+1]
        # even output rows 2m:  X2[m] @ A1 + X2[m-1] @ A3
        e2 = (jnp.dot(xm, a_ref[1], preferred_element_type=f32)
              + jnp.dot(xmm1, a_ref[3], preferred_element_type=f32)
              + b2_ref[...])                      # (7, 14*c)
        # odd output rows 2m+1: X2[m] @ A2 + X2[m+1] @ A0
        o2 = (jnp.dot(xm, a_ref[2], preferred_element_type=f32)
              + jnp.dot(xmp1, a_ref[0], preferred_element_type=f32)
              + b2_ref[...])
        e2s_ref[b, 0:7, :] = jnp.maximum(e2, 0.0)   # E2[m] in rows 0..6, row 7 = 0
        o2s_ref[b, 1:8, :] = jnp.maximum(o2, 0.0)   # O2[m] in rows 1..7, row 0 = 0

        # ---- tanh(conv1_): ConvT(c->1, k4, s2, p1), row-phase form ---------
        em   = e2s_ref[b, 0:7, :].astype(bf16)    # X1[2m]     (7, 14*c)
        ep1  = e2s_ref[b, 1:8, :].astype(bf16)    # X1[2m+2]
        om   = o2s_ref[b, 1:8, :].astype(bf16)    # X1[2m+1]
        omm1 = o2s_ref[b, 0:7, :].astype(bf16)    # X1[2m-1]
        bias1 = b1_ref[0, 0]
        # output rows 4m + r, each block (7, 28)
        r0 = (jnp.dot(em, c_ref[1], preferred_element_type=f32)
              + jnp.dot(omm1, c_ref[3], preferred_element_type=f32))
        r1 = (jnp.dot(em, c_ref[2], preferred_element_type=f32)
              + jnp.dot(om, c_ref[0], preferred_element_type=f32))
        r2 = (jnp.dot(om, c_ref[1], preferred_element_type=f32)
              + jnp.dot(em, c_ref[3], preferred_element_type=f32))
        r3 = (jnp.dot(om, c_ref[2], preferred_element_type=f32)
              + jnp.dot(ep1, c_ref[0], preferred_element_type=f32))
        out_ref[b, :, 0, :] = jnp.tanh(r0 + bias1)
        out_ref[b, :, 1, :] = jnp.tanh(r1 + bias1)
        out_ref[b, :, 2, :] = jnp.tanh(r2 + bias1)
        out_ref[b, :, 3, :] = jnp.tanh(r3 + bias1)


# ---------------- host-side, once-per-model parameter preparation -----------
def prepare_params(params):
    c = CAPACITY
    cin2, cout2 = 2 * c, c
    fc_w = np.asarray(params["fc_w"], np.float32)   # (2c*49, latent)
    fc_b = np.asarray(params["fc_b"], np.float32)
    w2 = np.asarray(params["w2"], np.float32)       # (2c, c, 4, 4)  (Cin,Cout,K,K)
    b2 = np.asarray(params["b2"], np.float32)
    w1 = np.asarray(params["w1"], np.float32)       # (c, 1, 4, 4)
    b1 = np.asarray(params["b1"], np.float32)
    latent = fc_w.shape[1]

    # fc weight/bias: PyTorch output index (ci, i, j) -> row i, col j*2c + ci
    w4 = fc_w.reshape(cin2, 7, 7, latent)                       # [ci, i, j, k]
    fcw_r = w4.transpose(1, 3, 2, 0).reshape(7, latent, 7 * cin2)
    fcb_r = fc_b.reshape(cin2, 7, 7).transpose(1, 2, 0).reshape(7, 7 * cin2)

    # conv2 row matrices A[kh]: (7*2c, 14*c); ow = 2*iw - 1 + kw
    A = np.zeros((4, 7 * cin2, 14 * cout2), np.float32)
    for kh in range(4):
        for iw in range(7):
            for kw in range(4):
                ow = 2 * iw - 1 + kw
                if 0 <= ow < 14:
                    A[kh, iw * cin2:(iw + 1) * cin2,
                          ow * cout2:(ow + 1) * cout2] += w2[:, :, kh, kw]
    b2row = np.tile(b2, 14)[None, :]                            # (1, 14*c)

    # conv1 row matrices C[kh]: (14*c, 28)
    C = np.zeros((4, 14 * cout2, 28), np.float32)
    for kh in range(4):
        for iw in range(14):
            for kw in range(4):
                ow = 2 * iw - 1 + kw
                if 0 <= ow < 28:
                    C[kh, iw * cout2:(iw + 1) * cout2, ow] += w1[:, 0, kh, kw]

    return {
        "fcw": jnp.asarray(fcw_r, jnp.bfloat16),
        "fcb": jnp.asarray(fcb_r, jnp.float32),
        "A": jnp.asarray(A, jnp.bfloat16),
        "b2row": jnp.asarray(b2row, jnp.float32),
        "C": jnp.asarray(C, jnp.bfloat16),
        "b1": jnp.asarray(b1.reshape(1, 1), jnp.float32),
    }


# ---------------------------- forward wrapper --------------------------------
def decoder_forward(x, pp):
    B = x.shape[0]
    c = CAPACITY
    out = pl.pallas_call(
        _decoder_kernel,
        out_shape=jax.ShapeDtypeStruct((B, 7, 4, 28), jnp.float32),
        in_specs=[
            pl.BlockSpec(memory_space=pltpu.MemorySpace.VMEM),   # fcw
            pl.BlockSpec(memory_space=pltpu.MemorySpace.VMEM),   # fcb
            pl.BlockSpec(memory_space=pltpu.MemorySpace.VMEM),   # A (conv2)
            pl.BlockSpec(memory_space=pltpu.MemorySpace.VMEM),   # b2 row
            pl.BlockSpec(memory_space=pltpu.MemorySpace.VMEM),   # C (conv1)
            pl.BlockSpec(memory_space=pltpu.MemorySpace.SMEM),   # b1 scalar
            pl.BlockSpec(memory_space=pltpu.MemorySpace.VMEM),   # x
        ],
        out_specs=pl.BlockSpec(memory_space=pltpu.MemorySpace.VMEM),
        scratch_shapes=[
            pltpu.VMEM((B, 9, 7 * 2 * c), jnp.float32),   # fc output rows, zero-padded
            pltpu.VMEM((B, 8, 14 * c), jnp.float32),      # conv2 even rows (+ zero row 7)
            pltpu.VMEM((B, 8, 14 * c), jnp.float32),      # conv2 odd rows  (+ zero row 0)
        ],
    )(pp["fcw"], pp["fcb"], pp["A"], pp["b2row"], pp["C"], pp["b1"], x)
    # (B, 7, 4, 28): row-major (m, r, ow) == (oh=4m+r, ow) -> free reshape.
    return out.reshape(B, 1, 28, 28)


# ---------------- numpy reference (direct ConvTranspose2d definition) -------
def ref_decoder(x, params):
    x = np.asarray(x, np.float32)
    fc_w, fc_b = np.asarray(params["fc_w"]), np.asarray(params["fc_b"])
    w2, b2 = np.asarray(params["w2"]), np.asarray(params["b2"])
    w1, b1 = np.asarray(params["w1"]), np.asarray(params["b1"])
    B = x.shape[0]
    h = (x @ fc_w.T + fc_b).reshape(B, 2 * CAPACITY, 7, 7)

    def convT(xin, W, b):
        Bn, Cin, H, Wd = xin.shape
        Cout, k = W.shape[1], W.shape[2]
        Hout = (H - 1) * STRIDE - 2 * PAD + k
        Wout = (Wd - 1) * STRIDE - 2 * PAD + k
        y = np.zeros((Bn, Cout, Hout, Wout), np.float32) + b.reshape(1, Cout, 1, 1)
        for ih in range(H):
            for iw in range(Wd):
                for kh in range(k):
                    for kw in range(k):
                        oh = ih * STRIDE - PAD + kh
                        ow = iw * STRIDE - PAD + kw
                        if 0 <= oh < Hout and 0 <= ow < Wout:
                            y[:, :, oh, ow] += xin[:, :, ih, iw] @ W[:, :, kh, kw]
        return y

    h = np.maximum(convT(h, w2, b2), 0.0)
    h = np.tanh(convT(h, w1, b1))
    return h


if __name__ == "__main__":
    key = jax.random.PRNGKey(0)
    k_x, k_fcw, k_fcb, k_w2, k_b2, k_w1, k_b1 = jax.random.split(key, 7)
    c = CAPACITY
    params = {
        # nn.Linear(latent_dim, 2c*7*7): weight (out, in), bias (out,)
        "fc_w": 0.10 * jax.random.normal(k_fcw, (2 * c * 7 * 7, LATENT_DIM), jnp.float32),
        "fc_b": 0.10 * jax.random.normal(k_fcb, (2 * c * 7 * 7,), jnp.float32),
        # nn.ConvTranspose2d(2c, c, 4, 2, 1): weight (Cin, Cout, K, K)
        "w2": 0.05 * jax.random.normal(k_w2, (2 * c, c, K, K), jnp.float32),
        "b2": 0.05 * jax.random.normal(k_b2, (c,), jnp.float32),
        # nn.ConvTranspose2d(c, 1, 4, 2, 1)
        "w1": 0.05 * jax.random.normal(k_w1, (c, 1, K, K), jnp.float32),
        "b1": 0.05 * jax.random.normal(k_b1, (1,), jnp.float32),
    }
    x = jax.random.normal(k_x, (BATCH, LATENT_DIM), jnp.float32)

    pp = prepare_params(params)             # once, host-side
    fwd = jax.jit(decoder_forward)
    out = jax.block_until_ready(fwd(x, pp))
    assert out.shape == (BATCH, 1, 28, 28), out.shape

    ref = ref_decoder(x, params)
    err = float(np.max(np.abs(np.asarray(out) - ref)))
    assert np.allclose(np.asarray(out), ref, atol=3e-2, rtol=3e-2), err
    print("KERNEL_OK")
</pallas_src>

<mosaic_0001>
module attributes {stable_mosaic.version = 11 : i64} {
  func.func @_decoder_kernel(%arg0: memref<7x10x224xbf16, #tpu.memory_space<vmem>>, %arg1: memref<7x224xf32, #tpu.memory_space<vmem>>, %arg2: memref<4x224x224xbf16, #tpu.memory_space<vmem>>, %arg3: memref<1x224xf32, #tpu.memory_space<vmem>>, %arg4: memref<4x224x28xbf16, #tpu.memory_space<vmem>>, %arg5: memref<1x1xf32, #tpu.memory_space<smem>>, %arg6: memref<2x10xf32, #tpu.memory_space<vmem>>, %arg7: memref<2x7x4x28xf32, #tpu.memory_space<vmem>>, %arg8: memref<2x9x224xf32, #tpu.memory_space<vmem>>, %arg9: memref<2x8x224xf32, #tpu.memory_space<vmem>>, %arg10: memref<2x8x224xf32, #tpu.memory_space<vmem>>) attributes {dimension_semantics = [], scalar_prefetch = 0 : i64, scratch_operands = 3 : i64, tpu.core_type = #tpu.core_type<tc>} {
    %cst = arith.constant 0.000000e+00 : f32
    %0 = vector.broadcast %cst : f32 to vector<2x9x224xf32>
    %c0 = arith.constant 0 : index
    %c0_0 = arith.constant 0 : index
    %c0_1 = arith.constant 0 : index
    %1 = vector.load %arg8[%c0, %c0_0, %c0_1] : memref<2x9x224xf32, #tpu.memory_space<vmem>>, vector<2x9x224xf32>
    tpu.vector_store %arg8[%c0, %c0_0, %c0_1], %0 {strides = array<i32>} : memref<2x9x224xf32, #tpu.memory_space<vmem>>, vector<2x9x224xf32>,
    %cst_2 = arith.constant 0.000000e+00 : f32
    %2 = vector.broadcast %cst_2 : f32 to vector<2x8x224xf32>
    %c0_3 = arith.constant 0 : index
    %c0_4 = arith.constant 0 : index
    %c0_5 = arith.constant 0 : index
    %3 = vector.load %arg9[%c0_3, %c0_4, %c0_5] : memref<2x8x224xf32, #tpu.memory_space<vmem>>, vector<2x8x224xf32>
    tpu.vector_store %arg9[%c0_3, %c0_4, %c0_5], %2 {strides = array<i32>} : memref<2x8x224xf32, #tpu.memory_space<vmem>>, vector<2x8x224xf32>,
    %cst_6 = arith.constant 0.000000e+00 : f32
    %4 = vector.broadcast %cst_6 : f32 to vector<2x8x224xf32>
    %c0_7 = arith.constant 0 : index
    %c0_8 = arith.constant 0 : index
    %c0_9 = arith.constant 0 : index
    %5 = vector.load %arg10[%c0_7, %c0_8, %c0_9] : memref<2x8x224xf32, #tpu.memory_space<vmem>>, vector<2x8x224xf32>
    tpu.vector_store %arg10[%c0_7, %c0_8, %c0_9], %4 {strides = array<i32>} : memref<2x8x224xf32, #tpu.memory_space<vmem>>, vector<2x8x224xf32>,
    %c0_10 = arith.constant 0 : index
    %c0_11 = arith.constant 0 : index
    %6 = vector.load %arg6[%c0_10, %c0_11] : memref<2x10xf32, #tpu.memory_space<vmem>>, vector<2x10xf32>
    %7 = arith.truncf %6 : vector<2x10xf32> to vector<2x10xbf16>
    %c0_12 = arith.constant 0 : index
    %c0_13 = arith.constant 0 : index
    %c0_14 = arith.constant 0 : index
    %8 = vector.load %arg0[%c0_12, %c0_13, %c0_14] : memref<7x10x224xbf16, #tpu.memory_space<vmem>>, vector<1x10x224xbf16>
    %9 = vector.shape_cast %8 : vector<1x10x224xbf16> to vector<10x224xbf16>
    %cst_15 = arith.constant dense<0.000000e+00> : vector<2x224xf32>
    %10 = tpu.matmul %7, %9, %cst_15 {dimension_numbers = #tpu.dot_dimension_numbers<[1], [0], [0], [1], [0, 0, 1, 1], [], []>} : vector<2x10xbf16>, vector<10x224xbf16>, vector<2x224xf32> -> vector<2x224xf32>
    %c0_16 = arith.constant 0 : index
    %c0_17 = arith.constant 0 : index
    %11 = vector.load %arg1[%c0_16, %c0_17] : memref<7x224xf32, #tpu.memory_space<vmem>>, vector<1x224xf32>
    %12 = vector.shape_cast %11 : vector<1x224xf32> to vector<224xf32>
    %13 = vector.shape_cast %12 : vector<224xf32> to vector<1x224xf32>
    %14 = vector.broadcast %13 : vector<1x224xf32> to vector<2x224xf32>
    %15 = arith.addf %10, %14 : vector<2x224xf32>
    %c0_18 = arith.constant 0 : index
    %c1 = arith.constant 1 : index
    %c0_19 = arith.constant 0 : index
    %16 = vector.load %arg8[%c0_18, %c1, %c0_19] : memref<2x9x224xf32, #tpu.memory_space<vmem>>, vector<2x1x224xf32>
    %17 = vector.shape_cast %16 : vector<2x1x224xf32> to vector<2x224xf32>
    %18 = vector.shape_cast %15 : vector<2x224xf32> to vector<2x1x224xf32>
    tpu.vector_store %arg8[%c0_18, %c1, %c0_19], %18 {strides = array<i32>} : memref<2x9x224xf32, #tpu.memory_space<vmem>>, vector<2x1x224xf32>,
    %c1_20 = arith.constant 1 : index
    %c0_21 = arith.constant 0 : index
    %c0_22 = arith.constant 0 : index
    %19 = vector.load %arg0[%c1_20, %c0_21, %c0_22] : memref<7x10x224xbf16, #tpu.memory_space<vmem>>, vector<1x10x224xbf16>
    %20 = vector.shape_cast %19 : vector<1x10x224xbf16> to vector<10x224xbf16>
    %cst_23 = arith.constant dense<0.000000e+00> : vector<2x224xf32>
    %21 = tpu.matmul %7, %20, %cst_23 {dimension_numbers = #tpu.dot_dimension_numbers<[1], [0], [0], [1], [0, 0, 1, 1], [], []>} : vector<2x10xbf16>, vector<10x224xbf16>, vector<2x224xf32> -> vector<2x224xf32>
    %c1_24 = arith.constant 1 : index
    %c0_25 = arith.constant 0 : index
    %22 = vector.load %arg1[%c1_24, %c0_25] : memref<7x224xf32, #tpu.memory_space<vmem>>, vector<1x224xf32>
    %23 = vector.shape_cast %22 : vector<1x224xf32> to vector<224xf32>
    %24 = vector.shape_cast %23 : vector<224xf32> to vector<1x224xf32>
    %25 = vector.broadcast %24 : vector<1x224xf32> to vector<2x224xf32>
    %26 = arith.addf %21, %25 : vector<2x224xf32>
    %c0_26 = arith.constant 0 : index
    %c2 = arith.constant 2 : index
    %c0_27 = arith.constant 0 : index
    %27 = vector.load %arg8[%c0_26, %c2, %c0_27] : memref<2x9x224xf32, #tpu.memory_space<vmem>>, vector<2x1x224xf32>
    %28 = vector.shape_cast %27 : vector<2x1x224xf32> to vector<2x224xf32>
    %29 = vector.shape_cast %26 : vector<2x224xf32> to vector<2x1x224xf32>
    tpu.vector_store %arg8[%c0_26, %c2, %c0_27], %29 {strides = array<i32>} : memref<2x9x224xf32, #tpu.memory_space<vmem>>, vector<2x1x224xf32>,
    %c2_28 = arith.constant 2 : index
    %c0_29 = arith.constant 0 : index
    %c0_30 = arith.constant 0 : index
    %30 = vector.load %arg0[%c2_28, %c0_29, %c0_30] : memref<7x10x224xbf16, #tpu.memory_space<vmem>>, vector<1x10x224xbf16>
    %31 = vector.shape_cast %30 : vector<1x10x224xbf16> to vector<10x224xbf16>
    %cst_31 = arith.constant dense<0.000000e+00> : vector<2x224xf32>
    %32 = tpu.matmul %7, %31, %cst_31 {dimension_numbers = #tpu.dot_dimension_numbers<[1], [0], [0], [1], [0, 0, 1, 1], [], []>} : vector<2x10xbf16>, vector<10x224xbf16>, vector<2x224xf32> -> vector<2x224xf32>
    %c2_32 = arith.constant 2 : index
    %c0_33 = arith.constant 0 : index
    %33 = vector.load %arg1[%c2_32, %c0_33] : memref<7x224xf32, #tpu.memory_space<vmem>>, vector<1x224xf32>
    %34 = vector.shape_cast %33 : vector<1x224xf32> to vector<224xf32>
    %35 = vector.shape_cast %34 : vector<224xf32> to vector<1x224xf32>
    %36 = vector.broadcast %35 : vector<1x224xf32> to vector<2x224xf32>
    %37 = arith.addf %32, %36 : vector<2x224xf32>
    %c0_34 = arith.constant 0 : index
    %c3 = arith.constant 3 : index
    %c0_35 = arith.constant 0 : index
    %38 = vector.load %arg8[%c0_34, %c3, %c0_35] : memref<2x9x224xf32, #tpu.memory_space<vmem>>, vector<2x1x224xf32>
    %39 = vector.shape_cast %38 : vector<2x1x224xf32> to vector<2x224xf32>
    %40 = vector.shape_cast %37 : vector<2x224xf32> to vector<2x1x224xf32>
    tpu.vector_store %arg8[%c0_34, %c3, %c0_35], %40 {strides = array<i32>} : memref<2x9x224xf32, #tpu.memory_space<vmem>>, vector<2x1x224xf32>,
    %c3_36 = arith.constant 3 : index
    %c0_37 = arith.constant 0 : index
    %c0_38 = arith.constant 0 : index
    %41 = vector.load %arg0[%c3_36, %c0_37, %c0_38] : memref<7x10x224xbf16, #tpu.memory_space<vmem>>, vector<1x10x224xbf16>
    %42 = vector.shape_cast %41 : vector<1x10x224xbf16> to vector<10x224xbf16>
    %cst_39 = arith.constant dense<0.000000e+00> : vector<2x224xf32>
    %43 = tpu.matmul %7, %42, %cst_39 {dimension_numbers = #tpu.dot_dimension_numbers<[1], [0], [0], [1], [0, 0, 1, 1], [], []>} : vector<2x10xbf16>, vector<10x224xbf16>, vector<2x224xf32> -> vector<2x224xf32>
    %c3_40 = arith.constant 3 : index
    %c0_41 = arith.constant 0 : index
    %44 = vector.load %arg1[%c3_40, %c0_41] : memref<7x224xf32, #tpu.memory_space<vmem>>, vector<1x224xf32>
    %45 = vector.shape_cast %44 : vector<1x224xf32> to vector<224xf32>
    %46 = vector.shape_cast %45 : vector<224xf32> to vector<1x224xf32>
    %47 = vector.broadcast %46 : vector<1x224xf32> to vector<2x224xf32>
    %48 = arith.addf %43, %47 : vector<2x224xf32>
    %c0_42 = arith.constant 0 : index
    %c4 = arith.constant 4 : index
    %c0_43 = arith.constant 0 : index
    %49 = vector.load %arg8[%c0_42, %c4, %c0_43] : memref<2x9x224xf32, #tpu.memory_space<vmem>>, vector<2x1x224xf32>
    %50 = vector.shape_cast %49 : vector<2x1x224xf32> to vector<2x224xf32>
    %51 = vector.shape_cast %48 : vector<2x224xf32> to vector<2x1x224xf32>
    tpu.vector_store %arg8[%c0_42, %c4, %c0_43], %51 {strides = array<i32>} : memref<2x9x224xf32, #tpu.memory_space<vmem>>, vector<2x1x224xf32>,
    %c4_44 = arith.constant 4 : index
    %c0_45 = arith.constant 0 : index
    %c0_46 = arith.constant 0 : index
    %52 = vector.load %arg0[%c4_44, %c0_45, %c0_46] : memref<7x10x224xbf16, #tpu.memory_space<vmem>>, vector<1x10x224xbf16>
    %53 = vector.shape_cast %52 : vector<1x10x224xbf16> to vector<10x224xbf16>
    %cst_47 = arith.constant dense<0.000000e+00> : vector<2x224xf32>
    %54 = tpu.matmul %7, %53, %cst_47 {dimension_numbers = #tpu.dot_dimension_numbers<[1], [0], [0], [1], [0, 0, 1, 1], [], []>} : vector<2x10xbf16>, vector<10x224xbf16>, vector<2x224xf32> -> vector<2x224xf32>
    %c4_48 = arith.constant 4 : index
    %c0_49 = arith.constant 0 : index
    %55 = vector.load %arg1[%c4_48, %c0_49] : memref<7x224xf32, #tpu.memory_space<vmem>>, vector<1x224xf32>
    %56 = vector.shape_cast %55 : vector<1x224xf32> to vector<224xf32>
    %57 = vector.shape_cast %56 : vector<224xf32> to vector<1x224xf32>
    %58 = vector.broadcast %57 : vector<1x224xf32> to vector<2x224xf32>
    %59 = arith.addf %54, %58 : vector<2x224xf32>
    %c0_50 = arith.constant 0 : index
    %c5 = arith.constant 5 : index
    %c0_51 = arith.constant 0 : index
    %60 = vector.load %arg8[%c0_50, %c5, %c0_51] : memref<2x9x224xf32, #tpu.memory_space<vmem>>, vector<2x1x224xf32>
    %61 = vector.shape_cast %60 : vector<2x1x224xf32> to vector<2x224xf32>
    %62 = vector.shape_cast %59 : vector<2x224xf32> to vector<2x1x224xf32>
    tpu.vector_store %arg8[%c0_50, %c5, %c0_51], %62 {strides = array<i32>} : memref<2x9x224xf32, #tpu.memory_space<vmem>>, vector<2x1x224xf32>,
    %c5_52 = arith.constant 5 : index
    %c0_53 = arith.constant 0 : index
    %c0_54 = arith.constant 0 : index
    %63 = vector.load %arg0[%c5_52, %c0_53, %c0_54] : memref<7x10x224xbf16, #tpu.memory_space<vmem>>, vector<1x10x224xbf16>
    %64 = vector.shape_cast %63 : vector<1x10x224xbf16> to vector<10x224xbf16>
    %cst_55 = arith.constant dense<0.000000e+00> : vector<2x224xf32>
    %65 = tpu.matmul %7, %64, %cst_55 {dimension_numbers = #tpu.dot_dimension_numbers<[1], [0], [0], [1], [0, 0, 1, 1], [], []>} : vector<2x10xbf16>, vector<10x224xbf16>, vector<2x224xf32> -> vector<2x224xf32>
    %c5_56 = arith.constant 5 : index
    %c0_57 = arith.constant 0 : index
    %66 = vector.load %arg1[%c5_56, %c0_57] : memref<7x224xf32, #tpu.memory_space<vmem>>, vector<1x224xf32>
    %67 = vector.shape_cast %66 : vector<1x224xf32> to vector<224xf32>
    %68 = vector.shape_cast %67 : vector<224xf32> to vector<1x224xf32>
    %69 = vector.broadcast %68 : vector<1x224xf32> to vector<2x224xf32>
    %70 = arith.addf %65, %69 : vector<2x224xf32>
    %c0_58 = arith.constant 0 : index
    %c6 = arith.constant 6 : index
    %c0_59 = arith.constant 0 : index
    %71 = vector.load %arg8[%c0_58, %c6, %c0_59] : memref<2x9x224xf32, #tpu.memory_space<vmem>>, vector<2x1x224xf32>
    %72 = vector.shape_cast %71 : vector<2x1x224xf32> to vector<2x224xf32>
    %73 = vector.shape_cast %70 : vector<2x224xf32> to vector<2x1x224xf32>
    tpu.vector_store %arg8[%c0_58, %c6, %c0_59], %73 {strides = array<i32>} : memref<2x9x224xf32, #tpu.memory_space<vmem>>, vector<2x1x224xf32>,
    %c6_60 = arith.constant 6 : index
    %c0_61 = arith.constant 0 : index
    %c0_62 = arith.constant 0 : index
    %74 = vector.load %arg0[%c6_60, %c0_61, %c0_62] : memref<7x10x224xbf16, #tpu.memory_space<vmem>>, vector<1x10x224xbf16>
    %75 = vector.shape_cast %74 : vector<1x10x224xbf16> to vector<10x224xbf16>
    %cst_63 = arith.constant dense<0.000000e+00> : vector<2x224xf32>
    %76 = tpu.matmul %7, %75, %cst_63 {dimension_numbers = #tpu.dot_dimension_numbers<[1], [0], [0], [1], [0, 0, 1, 1], [], []>} : vector<2x10xbf16>, vector<10x224xbf16>, vector<2x224xf32> -> vector<2x224xf32>
    %c6_64 = arith.constant 6 : index
    %c0_65 = arith.constant 0 : index
    %77 = vector.load %arg1[%c6_64, %c0_65] : memref<7x224xf32, #tpu.memory_space<vmem>>, vector<1x224xf32>
    %78 = vector.shape_cast %77 : vector<1x224xf32> to vector<224xf32>
    %79 = vector.shape_cast %78 : vector<224xf32> to vector<1x224xf32>
    %80 = vector.broadcast %79 : vector<1x224xf32> to vector<2x224xf32>
    %81 = arith.addf %76, %80 : vector<2x224xf32>
    %c0_66 = arith.constant 0 : index
    %c7 = arith.constant 7 : index
    %c0_67 = arith.constant 0 : index
    %82 = vector.load %arg8[%c0_66, %c7, %c0_67] : memref<2x9x224xf32, #tpu.memory_space<vmem>>, vector<2x1x224xf32>
    %83 = vector.shape_cast %82 : vector<2x1x224xf32> to vector<2x224xf32>
    %84 = vector.shape_cast %81 : vector<2x224xf32> to vector<2x1x224xf32>
    tpu.vector_store %arg8[%c0_66, %c7, %c0_67], %84 {strides = array<i32>} : memref<2x9x224xf32, #tpu.memory_space<vmem>>, vector<2x1x224xf32>,
    %c0_68 = arith.constant 0 : index
    %c1_69 = arith.constant 1 : index
    %c0_70 = arith.constant 0 : index
    %85 = vector.load %arg8[%c0_68, %c1_69, %c0_70] : memref<2x9x224xf32, #tpu.memory_space<vmem>>, vector<1x7x224xf32>
    %86 = vector.shape_cast %85 : vector<1x7x224xf32> to vector<7x224xf32>
    %87 = arith.truncf %86 : vector<7x224xf32> to vector<7x224xbf16>
    %c0_71 = arith.constant 0 : index
    %c0_72 = arith.constant 0 : index
    %c0_73 = arith.constant 0 : index
    %88 = vector.load %arg8[%c0_71, %c0_72, %c0_73] : memref<2x9x224xf32, #tpu.memory_space<vmem>>, vector<1x7x224xf32>
    %89 = vector.shape_cast %88 : vector<1x7x224xf32> to vector<7x224xf32>
    %90 = arith.truncf %89 : vector<7x224xf32> to vector<7x224xbf16>
    %c0_74 = arith.constant 0 : index
    %c2_75 = arith.constant 2 : index
    %c0_76 = arith.constant 0 : index
    %91 = vector.load %arg8[%c0_74, %c2_75, %c0_76] : memref<2x9x224xf32, #tpu.memory_space<vmem>>, vector<1x7x224xf32>
    %92 = vector.shape_cast %91 : vector<1x7x224xf32> to vector<7x224xf32>
    %93 = arith.truncf %92 : vector<7x224xf32> to vector<7x224xbf16>
    %c1_77 = arith.constant 1 : index
    %c0_78 = arith.constant 0 : index
    %c0_79 = arith.constant 0 : index
    %94 = vector.load %arg2[%c1_77, %c0_78, %c0_79] : memref<4x224x224xbf16, #tpu.memory_space<vmem>>, vector<1x224x224xbf16>
    %95 = vector.shape_cast %94 : vector<1x224x224xbf16> to vector<224x224xbf16>
    %cst_80 = arith.constant dense<0.000000e+00> : vector<7x224xf32>
    %96 = tpu.matmul %87, %95, %cst_80 {dimension_numbers = #tpu.dot_dimension_numbers<[1], [0], [0], [1], [0, 0, 1, 1], [], []>} : vector<7x224xbf16>, vector<224x224xbf16>, vector<7x224xf32> -> vector<7x224xf32>
    %c3_81 = arith.constant 3 : index
    %c0_82 = arith.constant 0 : index
    %c0_83 = arith.constant 0 : index
    %97 = vector.load %arg2[%c3_81, %c0_82, %c0_83] : memref<4x224x224xbf16, #tpu.memory_space<vmem>>, vector<1x224x224xbf16>
    %98 = vector.shape_cast %97 : vector<1x224x224xbf16> to vector<224x224xbf16>
    %cst_84 = arith.constant dense<0.000000e+00> : vector<7x224xf32>
    %99 = tpu.matmul %90, %98, %cst_84 {dimension_numbers = #tpu.dot_dimension_numbers<[1], [0], [0], [1], [0, 0, 1, 1], [], []>} : vector<7x224xbf16>, vector<224x224xbf16>, vector<7x224xf32> -> vector<7x224xf32>
    %100 = arith.addf %96, %99 : vector<7x224xf32>
    %c0_85 = arith.constant 0 : index
    %c0_86 = arith.constant 0 : index
    %101 = vector.load %arg3[%c0_85, %c0_86] : memref<1x224xf32, #tpu.memory_space<vmem>>, vector<1x224xf32>
    %102 = vector.broadcast %101 : vector<1x224xf32> to vector<7x224xf32>
    %103 = arith.addf %100, %102 : vector<7x224xf32>
    %c2_87 = arith.constant 2 : index
    %c0_88 = arith.constant 0 : index
    %c0_89 = arith.constant 0 : index
    %104 = vector.load %arg2[%c2_87, %c0_88, %c0_89] : memref<4x224x224xbf16, #tpu.memory_space<vmem>>, vector<1x224x224xbf16>
    %105 = vector.shape_cast %104 : vector<1x224x224xbf16> to vector<224x224xbf16>
    %cst_90 = arith.constant dense<0.000000e+00> : vector<7x224xf32>
    %106 = tpu.matmul %87, %105, %cst_90 {dimension_numbers = #tpu.dot_dimension_numbers<[1], [0], [0], [1], [0, 0, 1, 1], [], []>} : vector<7x224xbf16>, vector<224x224xbf16>, vector<7x224xf32> -> vector<7x224xf32>
    %c0_91 = arith.constant 0 : index
    %c0_92 = arith.constant 0 : index
    %c0_93 = arith.constant 0 : index
    %107 = vector.load %arg2[%c0_91, %c0_92, %c0_93] : memref<4x224x224xbf16, #tpu.memory_space<vmem>>, vector<1x224x224xbf16>
    %108 = vector.shape_cast %107 : vector<1x224x224xbf16> to vector<224x224xbf16>
    %cst_94 = arith.constant dense<0.000000e+00> : vector<7x224xf32>
    %109 = tpu.matmul %93, %108, %cst_94 {dimension_numbers = #tpu.dot_dimension_numbers<[1], [0], [0], [1], [0, 0, 1, 1], [], []>} : vector<7x224xbf16>, vector<224x224xbf16>, vector<7x224xf32> -> vector<7x224xf32>
    %110 = arith.addf %106, %109 : vector<7x224xf32>
    %c0_95 = arith.constant 0 : index
    %c0_96 = arith.constant 0 : index
    %111 = vector.load %arg3[%c0_95, %c0_96] : memref<1x224xf32, #tpu.memory_space<vmem>>, vector<1x224xf32>
    %112 = vector.broadcast %111 : vector<1x224xf32> to vector<7x224xf32>
    %113 = arith.addf %110, %112 : vector<7x224xf32>
    %cst_97 = arith.constant 0.000000e+00 : f32
    %114 = vector.broadcast %cst_97 : f32 to vector<7x224xf32>
    %115 = arith.maximumf %103, %114 : vector<7x224xf32>
    %c0_98 = arith.constant 0 : index
    %c0_99 = arith.constant 0 : index
    %c0_100 = arith.constant 0 : index
    %116 = vector.load %arg9[%c0_98, %c0_99, %c0_100] : memref<2x8x224xf32, #tpu.memory_space<vmem>>, vector<1x7x224xf32>
    %117 = vector.shape_cast %116 : vector<1x7x224xf32> to vector<7x224xf32>
    %118 = vector.shape_cast %115 : vector<7x224xf32> to vector<1x7x224xf32>
    tpu.vector_store %arg9[%c0_98, %c0_99, %c0_100], %118 {strides = array<i32>} : memref<2x8x224xf32, #tpu.memory_space<vmem>>, vector<1x7x224xf32>,
    %cst_101 = arith.constant 0.000000e+00 : f32
    %119 = vector.broadcast %cst_101 : f32 to vector<7x224xf32>
    %120 = arith.maximumf %113, %119 : vector<7x224xf32>
    %c0_102 = arith.constant 0 : index
    %c1_103 = arith.constant 1 : index
    %c0_104 = arith.constant 0 : index
    %121 = vector.load %arg10[%c0_102, %c1_103, %c0_104] : memref<2x8x224xf32, #tpu.memory_space<vmem>>, vector<1x7x224xf32>
    %122 = vector.shape_cast %121 : vector<1x7x224xf32> to vector<7x224xf32>
    %123 = vector.shape_cast %120 : vector<7x224xf32> to vector<1x7x224xf32>
    tpu.vector_store %arg10[%c0_102, %c1_103, %c0_104], %123 {strides = array<i32>} : memref<2x8x224xf32, #tpu.memory_space<vmem>>, vector<1x7x224xf32>,
    %c0_105 = arith.constant 0 : index
    %c0_106 = arith.constant 0 : index
    %c0_107 = arith.constant 0 : index
    %124 = vector.load %arg9[%c0_105, %c0_106, %c0_107] : memref<2x8x224xf32, #tpu.memory_space<vmem>>, vector<1x7x224xf32>
    %125 = vector.shape_cast %124 : vector<1x7x224xf32> to vector<7x224xf32>
    %126 = arith.truncf %125 : vector<7x224xf32> to vector<7x224xbf16>
    %c0_108 = arith.constant 0 : index
    %c1_109 = arith.constant 1 : index
    %c0_110 = arith.constant 0 : index
    %127 = vector.load %arg9[%c0_108, %c1_109, %c0_110] : memref<2x8x224xf32, #tpu.memory_space<vmem>>, vector<1x7x224xf32>
    %128 = vector.shape_cast %127 : vector<1x7x224xf32> to vector<7x224xf32>
    %129 = arith.truncf %128 : vector<7x224xf32> to vector<7x224xbf16>
    %c0_111 = arith.constant 0 : index
    %c1_112 = arith.constant 1 : index
    %c0_113 = arith.constant 0 : index
    %130 = vector.load %arg10[%c0_111, %c1_112, %c0_113] : memref<2x8x224xf32, #tpu.memory_space<vmem>>, vector<1x7x224xf32>
    %131 = vector.shape_cast %130 : vector<1x7x224xf32> to vector<7x224xf32>
    %132 = arith.truncf %131 : vector<7x224xf32> to vector<7x224xbf16>
    %c0_114 = arith.constant 0 : index
    %c0_115 = arith.constant 0 : index
    %c0_116 = arith.constant 0 : index
    %133 = vector.load %arg10[%c0_114, %c0_115, %c0_116] : memref<2x8x224xf32, #tpu.memory_space<vmem>>, vector<1x7x224xf32>
    %134 = vector.shape_cast %133 : vector<1x7x224xf32> to vector<7x224xf32>
    %135 = arith.truncf %134 : vector<7x224xf32> to vector<7x224xbf16>
    %c0_117 = arith.constant 0 : index
    %c0_118 = arith.constant 0 : index
    %136 = memref.load %arg5[%c0_117, %c0_118] : memref<1x1xf32, #tpu.memory_space<smem>>
    %c1_119 = arith.constant 1 : index
    %c0_120 = arith.constant 0 : index
    %c0_121 = arith.constant 0 : index
    %137 = vector.load %arg4[%c1_119, %c0_120, %c0_121] : memref<4x224x28xbf16, #tpu.memory_space<vmem>>, vector<1x224x28xbf16>
    %138 = vector.shape_cast %137 : vector<1x224x28xbf16> to vector<224x28xbf16>
    %cst_122 = arith.constant dense<0.000000e+00> : vector<7x28xf32>
    %139 = tpu.matmul %126, %138, %cst_122 {dimension_numbers = #tpu.dot_dimension_numbers<[1], [0], [0], [1], [0, 0, 1, 1], [], []>} : vector<7x224xbf16>, vector<224x28xbf16>, vector<7x28xf32> -> vector<7x28xf32>
    %c3_123 = arith.constant 3 : index
    %c0_124 = arith.constant 0 : index
    %c0_125 = arith.constant 0 : index
    %140 = vector.load %arg4[%c3_123, %c0_124, %c0_125] : memref<4x224x28xbf16, #tpu.memory_space<vmem>>, vector<1x224x28xbf16>
    %141 = vector.shape_cast %140 : vector<1x224x28xbf16> to vector<224x28xbf16>
    %cst_126 = arith.constant dense<0.000000e+00> : vector<7x28xf32>
    %142 = tpu.matmul %135, %141, %cst_126 {dimension_numbers = #tpu.dot_dimension_numbers<[1], [0], [0], [1], [0, 0, 1, 1], [], []>} : vector<7x224xbf16>, vector<224x28xbf16>, vector<7x28xf32> -> vector<7x28xf32>
    %143 = arith.addf %139, %142 : vector<7x28xf32>
    %c2_127 = arith.constant 2 : index
    %c0_128 = arith.constant 0 : index
    %c0_129 = arith.constant 0 : index
    %144 = vector.load %arg4[%c2_127, %c0_128, %c0_129] : memref<4x224x28xbf16, #tpu.memory_space<vmem>>, vector<1x224x28xbf16>
    %145 = vector.shape_cast %144 : vector<1x224x28xbf16> to vector<224x28xbf16>
    %cst_130 = arith.constant dense<0.000000e+00> : vector<7x28xf32>
    %146 = tpu.matmul %126, %145, %cst_130 {dimension_numbers = #tpu.dot_dimension_numbers<[1], [0], [0], [1], [0, 0, 1, 1], [], []>} : vector<7x224xbf16>, vector<224x28xbf16>, vector<7x28xf32> -> vector<7x28xf32>
    %c0_131 = arith.constant 0 : index
    %c0_132 = arith.constant 0 : index
    %c0_133 = arith.constant 0 : index
    %147 = vector.load %arg4[%c0_131, %c0_132, %c0_133] : memref<4x224x28xbf16, #tpu.memory_space<vmem>>, vector<1x224x28xbf16>
    %148 = vector.shape_cast %147 : vector<1x224x28xbf16> to vector<224x28xbf16>
    %cst_134 = arith.constant dense<0.000000e+00> : vector<7x28xf32>
    %149 = tpu.matmul %132, %148, %cst_134 {dimension_numbers = #tpu.dot_dimension_numbers<[1], [0], [0], [1], [0, 0, 1, 1], [], []>} : vector<7x224xbf16>, vector<224x28xbf16>, vector<7x28xf32> -> vector<7x28xf32>
    %150 = arith.addf %146, %149 : vector<7x28xf32>
    %c1_135 = arith.constant 1 : index
    %c0_136 = arith.constant 0 : index
    %c0_137 = arith.constant 0 : index
    %151 = vector.load %arg4[%c1_135, %c0_136, %c0_137] : memref<4x224x28xbf16, #tpu.memory_space<vmem>>, vector<1x224x28xbf16>
    %152 = vector.shape_cast %151 : vector<1x224x28xbf16> to vector<224x28xbf16>
    %cst_138 = arith.constant dense<0.000000e+00> : vector<7x28xf32>
    %153 = tpu.matmul %132, %152, %cst_138 {dimension_numbers = #tpu.dot_dimension_numbers<[1], [0], [0], [1], [0, 0, 1, 1], [], []>} : vector<7x224xbf16>, vector<224x28xbf16>, vector<7x28xf32> -> vector<7x28xf32>
    %c3_139 = arith.constant 3 : index
    %c0_140 = arith.constant 0 : index
    %c0_141 = arith.constant 0 : index
    %154 = vector.load %arg4[%c3_139, %c0_140, %c0_141] : memref<4x224x28xbf16, #tpu.memory_space<vmem>>, vector<1x224x28xbf16>
    %155 = vector.shape_cast %154 : vector<1x224x28xbf16> to vector<224x28xbf16>
    %cst_142 = arith.constant dense<0.000000e+00> : vector<7x28xf32>
    %156 = tpu.matmul %126, %155, %cst_142 {dimension_numbers = #tpu.dot_dimension_numbers<[1], [0], [0], [1], [0, 0, 1, 1], [], []>} : vector<7x224xbf16>, vector<224x28xbf16>, vector<7x28xf32> -> vector<7x28xf32>
    %157 = arith.addf %153, %156 : vector<7x28xf32>
    %c2_143 = arith.constant 2 : index
    %c0_144 = arith.constant 0 : index
    %c0_145 = arith.constant 0 : index
    %158 = vector.load %arg4[%c2_143, %c0_144, %c0_145] : memref<4x224x28xbf16, #tpu.memory_space<vmem>>, vector<1x224x28xbf16>
    %159 = vector.shape_cast %158 : vector<1x224x28xbf16> to vector<224x28xbf16>
    %cst_146 = arith.constant dense<0.000000e+00> : vector<7x28xf32>
    %160 = tpu.matmul %132, %159, %cst_146 {dimension_numbers = #tpu.dot_dimension_numbers<[1], [0], [0], [1], [0, 0, 1, 1], [], []>} : vector<7x224xbf16>, vector<224x28xbf16>, vector<7x28xf32> -> vector<7x28xf32>
    %c0_147 = arith.constant 0 : index
    %c0_148 = arith.constant 0 : index
    %c0_149 = arith.constant 0 : index
    %161 = vector.load %arg4[%c0_147, %c0_148, %c0_149] : memref<4x224x28xbf16, #tpu.memory_space<vmem>>, vector<1x224x28xbf16>
    %162 = vector.shape_cast %161 : vector<1x224x28xbf16> to vector<224x28xbf16>
    %cst_150 = arith.constant dense<0.000000e+00> : vector<7x28xf32>
    %163 = tpu.matmul %129, %162, %cst_150 {dimension_numbers = #tpu.dot_dimension_numbers<[1], [0], [0], [1], [0, 0, 1, 1], [], []>} : vector<7x224xbf16>, vector<224x28xbf16>, vector<7x28xf32> -> vector<7x28xf32>
    %164 = arith.addf %160, %163 : vector<7x28xf32>
    %165 = vector.broadcast %136 : f32 to vector<7x28xf32>
    %166 = arith.addf %143, %165 : vector<7x28xf32>
    %167 = math.tanh %166 : vector<7x28xf32>
    %c0_151 = arith.constant 0 : index
    %c0_152 = arith.constant 0 : index
    %c0_153 = arith.constant 0 : index
    %c0_154 = arith.constant 0 : index
    %168 = vector.load %arg7[%c0_151, %c0_152, %c0_153, %c0_154] : memref<2x7x4x28xf32, #tpu.memory_space<vmem>>, vector<1x7x1x28xf32>
    %169 = vector.shape_cast %168 : vector<1x7x1x28xf32> to vector<7x28xf32>
    %170 = vector.shape_cast %167 : vector<7x28xf32> to vector<1x7x1x28xf32>
    tpu.vector_store %arg7[%c0_151, %c0_152, %c0_153, %c0_154], %170 {strides = array<i32>} : memref<2x7x4x28xf32, #tpu.memory_space<vmem>>, vector<1x7x1x28xf32>,
    %171 = vector.broadcast %136 : f32 to vector<7x28xf32>
    %172 = arith.addf %150, %171 : vector<7x28xf32>
    %173 = math.tanh %172 : vector<7x28xf32>
    %c0_155 = arith.constant 0 : index
    %c0_156 = arith.constant 0 : index
    %c1_157 = arith.constant 1 : index
    %c0_158 = arith.constant 0 : index
    %174 = vector.load %arg7[%c0_155, %c0_156, %c1_157, %c0_158] : memref<2x7x4x28xf32, #tpu.memory_space<vmem>>, vector<1x7x1x28xf32>
    %175 = vector.shape_cast %174 : vector<1x7x1x28xf32> to vector<7x28xf32>
    %176 = vector.shape_cast %173 : vector<7x28xf32> to vector<1x7x1x28xf32>
    tpu.vector_store %arg7[%c0_155, %c0_156, %c1_157, %c0_158], %176 {strides = array<i32>} : memref<2x7x4x28xf32, #tpu.memory_space<vmem>>, vector<1x7x1x28xf32>,
    %177 = vector.broadcast %136 : f32 to vector<7x28xf32>
    %178 = arith.addf %157, %177 : vector<7x28xf32>
    %179 = math.tanh %178 : vector<7x28xf32>
    %c0_159 = arith.constant 0 : index
    %c0_160 = arith.constant 0 : index
    %c2_161 = arith.constant 2 : index
    %c0_162 = arith.constant 0 : index
    %180 = vector.load %arg7[%c0_159, %c0_160, %c2_161, %c0_162] : memref<2x7x4x28xf32, #tpu.memory_space<vmem>>, vector<1x7x1x28xf32>
    %181 = vector.shape_cast %180 : vector<1x7x1x28xf32> to vector<7x28xf32>
    %182 = vector.shape_cast %179 : vector<7x28xf32> to vector<1x7x1x28xf32>
    tpu.vector_store %arg7[%c0_159, %c0_160, %c2_161, %c0_162], %182 {strides = array<i32>} : memref<2x7x4x28xf32, #tpu.memory_space<vmem>>, vector<1x7x1x28xf32>,
    %183 = vector.broadcast %136 : f32 to vector<7x28xf32>
    %184 = arith.addf %164, %183 : vector<7x28xf32>
    %185 = math.tanh %184 : vector<7x28xf32>
    %c0_163 = arith.constant 0 : index
    %c0_164 = arith.constant 0 : index
    %c3_165 = arith.constant 3 : index
    %c0_166 = arith.constant 0 : index
    %186 = vector.load %arg7[%c0_163, %c0_164, %c3_165, %c0_166] : memref<2x7x4x28xf32, #tpu.memory_space<vmem>>, vector<1x7x1x28xf32>
    %187 = vector.shape_cast %186 : vector<1x7x1x28xf32> to vector<7x28xf32>
    %188 = vector.shape_cast %185 : vector<7x28xf32> to vector<1x7x1x28xf32>
    tpu.vector_store %arg7[%c0_163, %c0_164, %c3_165, %c0_166], %188 {strides = array<i32>} : memref<2x7x4x28xf32, #tpu.memory_space<vmem>>, vector<1x7x1x28xf32>,
    %c1_167 = arith.constant 1 : index
    %c1_168 = arith.constant 1 : index
    %c0_169 = arith.constant 0 : index
    %189 = vector.load %arg8[%c1_167, %c1_168, %c0_169] : memref<2x9x224xf32, #tpu.memory_space<vmem>>, vector<1x7x224xf32>
    %190 = vector.shape_cast %189 : vector<1x7x224xf32> to vector<7x224xf32>
    %191 = arith.truncf %190 : vector<7x224xf32> to vector<7x224xbf16>
    %c1_170 = arith.constant 1 : index
    %c0_171 = arith.constant 0 : index
    %c0_172 = arith.constant 0 : index
    %192 = vector.load %arg8[%c1_170, %c0_171, %c0_172] : memref<2x9x224xf32, #tpu.memory_space<vmem>>, vector<1x7x224xf32>
    %193 = vector.shape_cast %192 : vector<1x7x224xf32> to vector<7x224xf32>
    %194 = arith.truncf %193 : vector<7x224xf32> to vector<7x224xbf16>
    %c1_173 = arith.constant 1 : index
    %c2_174 = arith.constant 2 : index
    %c0_175 = arith.constant 0 : index
    %195 = vector.load %arg8[%c1_173, %c2_174, %c0_175] : memref<2x9x224xf32, #tpu.memory_space<vmem>>, vector<1x7x224xf32>
    %196 = vector.shape_cast %195 : vector<1x7x224xf32> to vector<7x224xf32>
    %197 = arith.truncf %196 : vector<7x224xf32> to vector<7x224xbf16>
    %c1_176 = arith.constant 1 : index
    %c0_177 = arith.constant 0 : index
    %c0_178 = arith.constant 0 : index
    %198 = vector.load %arg2[%c1_176, %c0_177, %c0_178] : memref<4x224x224xbf16, #tpu.memory_space<vmem>>, vector<1x224x224xbf16>
    %199 = vector.shape_cast %198 : vector<1x224x224xbf16> to vector<224x224xbf16>
    %cst_179 = arith.constant dense<0.000000e+00> : vector<7x224xf32>
    %200 = tpu.matmul %191, %199, %cst_179 {dimension_numbers = #tpu.dot_dimension_numbers<[1], [0], [0], [1], [0, 0, 1, 1], [], []>} : vector<7x224xbf16>, vector<224x224xbf16>, vector<7x224xf32> -> vector<7x224xf32>
    %c3_180 = arith.constant 3 : index
    %c0_181 = arith.constant 0 : index
    %c0_182 = arith.constant 0 : index
    %201 = vector.load %arg2[%c3_180, %c0_181, %c0_182] : memref<4x224x224xbf16, #tpu.memory_space<vmem>>, vector<1x224x224xbf16>
    %202 = vector.shape_cast %201 : vector<1x224x224xbf16> to vector<224x224xbf16>
    %cst_183 = arith.constant dense<0.000000e+00> : vector<7x224xf32>
    %203 = tpu.matmul %194, %202, %cst_183 {dimension_numbers = #tpu.dot_dimension_numbers<[1], [0], [0], [1], [0, 0, 1, 1], [], []>} : vector<7x224xbf16>, vector<224x224xbf16>, vector<7x224xf32> -> vector<7x224xf32>
    %204 = arith.addf %200, %203 : vector<7x224xf32>
    %c0_184 = arith.constant 0 : index
    %c0_185 = arith.constant 0 : index
    %205 = vector.load %arg3[%c0_184, %c0_185] : memref<1x224xf32, #tpu.memory_space<vmem>>, vector<1x224xf32>
    %206 = vector.broadcast %205 : vector<1x224xf32> to vector<7x224xf32>
    %207 = arith.addf %204, %206 : vector<7x224xf32>
    %c2_186 = arith.constant 2 : index
    %c0_187 = arith.constant 0 : index
    %c0_188 = arith.constant 0 : index
    %208 = vector.load %arg2[%c2_186, %c0_187, %c0_188] : memref<4x224x224xbf16, #tpu.memory_space<vmem>>, vector<1x224x224xbf16>
    %209 = vector.shape_cast %208 : vector<1x224x224xbf16> to vector<224x224xbf16>
    %cst_189 = arith.constant dense<0.000000e+00> : vector<7x224xf32>
    %210 = tpu.matmul %191, %209, %cst_189 {dimension_numbers = #tpu.dot_dimension_numbers<[1], [0], [0], [1], [0, 0, 1, 1], [], []>} : vector<7x224xbf16>, vector<224x224xbf16>, vector<7x224xf32> -> vector<7x224xf32>
    %c0_190 = arith.constant 0 : index
    %c0_191 = arith.constant 0 : index
    %c0_192 = arith.constant 0 : index
    %211 = vector.load %arg2[%c0_190, %c0_191, %c0_192] : memref<4x224x224xbf16, #tpu.memory_space<vmem>>, vector<1x224x224xbf16>
    %212 = vector.shape_cast %211 : vector<1x224x224xbf16> to vector<224x224xbf16>
    %cst_193 = arith.constant dense<0.000000e+00> : vector<7x224xf32>
    %213 = tpu.matmul %197, %212, %cst_193 {dimension_numbers = #tpu.dot_dimension_numbers<[1], [0], [0], [1], [0, 0, 1, 1], [], []>} : vector<7x224xbf16>, vector<224x224xbf16>, vector<7x224xf32> -> vector<7x224xf32>
    %214 = arith.addf %210, %213 : vector<7x224xf32>
    %c0_194 = arith.constant 0 : index
    %c0_195 = arith.constant 0 : index
    %215 = vector.load %arg3[%c0_194, %c0_195] : memref<1x224xf32, #tpu.memory_space<vmem>>, vector<1x224xf32>
    %216 = vector.broadcast %215 : vector<1x224xf32> to vector<7x224xf32>
    %217 = arith.addf %214, %216 : vector<7x224xf32>
    %cst_196 = arith.constant 0.000000e+00 : f32
    %218 = vector.broadcast %cst_196 : f32 to vector<7x224xf32>
    %219 = arith.maximumf %207, %218 : vector<7x224xf32>
    %c1_197 = arith.constant 1 : index
    %c0_198 = arith.constant 0 : index
    %c0_199 = arith.constant 0 : index
    %220 = vector.load %arg9[%c1_197, %c0_198, %c0_199] : memref<2x8x224xf32, #tpu.memory_space<vmem>>, vector<1x7x224xf32>
    %221 = vector.shape_cast %220 : vector<1x7x224xf32> to vector<7x224xf32>
    %222 = vector.shape_cast %219 : vector<7x224xf32> to vector<1x7x224xf32>
    tpu.vector_store %arg9[%c1_197, %c0_198, %c0_199], %222 {strides = array<i32>} : memref<2x8x224xf32, #tpu.memory_space<vmem>>, vector<1x7x224xf32>,
    %cst_200 = arith.constant 0.000000e+00 : f32
    %223 = vector.broadcast %cst_200 : f32 to vector<7x224xf32>
    %224 = arith.maximumf %217, %223 : vector<7x224xf32>
    %c1_201 = arith.constant 1 : index
    %c1_202 = arith.constant 1 : index
    %c0_203 = arith.constant 0 : index
    %225 = vector.load %arg10[%c1_201, %c1_202, %c0_203] : memref<2x8x224xf32, #tpu.memory_space<vmem>>, vector<1x7x224xf32>
    %226 = vector.shape_cast %225 : vector<1x7x224xf32> to vector<7x224xf32>
    %227 = vector.shape_cast %224 : vector<7x224xf32> to vector<1x7x224xf32>
    tpu.vector_store %arg10[%c1_201, %c1_202, %c0_203], %227 {strides = array<i32>} : memref<2x8x224xf32, #tpu.memory_space<vmem>>, vector<1x7x224xf32>,
    %c1_204 = arith.constant 1 : index
    %c0_205 = arith.constant 0 : index
    %c0_206 = arith.constant 0 : index
    %228 = vector.load %arg9[%c1_204, %c0_205, %c0_206] : memref<2x8x224xf32, #tpu.memory_space<vmem>>, vector<1x7x224xf32>
    %229 = vector.shape_cast %228 : vector<1x7x224xf32> to vector<7x224xf32>
    %230 = arith.truncf %229 : vector<7x224xf32> to vector<7x224xbf16>
    %c1_207 = arith.constant 1 : index
    %c1_208 = arith.constant 1 : index
    %c0_209 = arith.constant 0 : index
    %231 = vector.load %arg9[%c1_207, %c1_208, %c0_209] : memref<2x8x224xf32, #tpu.memory_space<vmem>>, vector<1x7x224xf32>
    %232 = vector.shape_cast %231 : vector<1x7x224xf32> to vector<7x224xf32>
    %233 = arith.truncf %232 : vector<7x224xf32> to vector<7x224xbf16>
    %c1_210 = arith.constant 1 : index
    %c1_211 = arith.constant 1 : index
    %c0_212 = arith.constant 0 : index
    %234 = vector.load %arg10[%c1_210, %c1_211, %c0_212] : memref<2x8x224xf32, #tpu.memory_space<vmem>>, vector<1x7x224xf32>
    %235 = vector.shape_cast %234 : vector<1x7x224xf32> to vector<7x224xf32>
    %236 = arith.truncf %235 : vector<7x224xf32> to vector<7x224xbf16>
    %c1_213 = arith.constant 1 : index
    %c0_214 = arith.constant 0 : index
    %c0_215 = arith.constant 0 : index
    %237 = vector.load %arg10[%c1_213, %c0_214, %c0_215] : memref<2x8x224xf32, #tpu.memory_space<vmem>>, vector<1x7x224xf32>
    %238 = vector.shape_cast %237 : vector<1x7x224xf32> to vector<7x224xf32>
    %239 = arith.truncf %238 : vector<7x224xf32> to vector<7x224xbf16>
    %c0_216 = arith.constant 0 : index
    %c0_217 = arith.constant 0 : index
    %240 = memref.load %arg5[%c0_216, %c0_217] : memref<1x1xf32, #tpu.memory_space<smem>>
    %c1_218 = arith.constant 1 : index
    %c0_219 = arith.constant 0 : index
    %c0_220 = arith.constant 0 : index
    %241 = vector.load %arg4[%c1_218, %c0_219, %c0_220] : memref<4x224x28xbf16, #tpu.memory_space<vmem>>, vector<1x224x28xbf16>
    %242 = vector.shape_cast %241 : vector<1x224x28xbf16> to vector<224x28xbf16>
    %cst_221 = arith.constant dense<0.000000e+00> : vector<7x28xf32>
    %243 = tpu.matmul %230, %242, %cst_221 {dimension_numbers = #tpu.dot_dimension_numbers<[1], [0], [0], [1], [0, 0, 1, 1], [], []>} : vector<7x224xbf16>, vector<224x28xbf16>, vector<7x28xf32> -> vector<7x28xf32>
    %c3_222 = arith.constant 3 : index
    %c0_223 = arith.constant 0 : index
    %c0_224 = arith.constant 0 : index
    %244 = vector.load %arg4[%c3_222, %c0_223, %c0_224] : memref<4x224x28xbf16, #tpu.memory_space<vmem>>, vector<1x224x28xbf16>
    %245 = vector.shape_cast %244 : vector<1x224x28xbf16> to vector<224x28xbf16>
    %cst_225 = arith.constant dense<0.000000e+00> : vector<7x28xf32>
    %246 = tpu.matmul %239, %245, %cst_225 {dimension_numbers = #tpu.dot_dimension_numbers<[1], [0], [0], [1], [0, 0, 1, 1], [], []>} : vector<7x224xbf16>, vector<224x28xbf16>, vector<7x28xf32> -> vector<7x28xf32>
    %247 = arith.addf %243, %246 : vector<7x28xf32>
    %c2_226 = arith.constant 2 : index
    %c0_227 = arith.constant 0 : index
    %c0_228 = arith.constant 0 : index
    %248 = vector.load %arg4[%c2_226, %c0_227, %c0_228] : memref<4x224x28xbf16, #tpu.memory_space<vmem>>, vector<1x224x28xbf16>
    %249 = vector.shape_cast %248 : vector<1x224x28xbf16> to vector<224x28xbf16>
    %cst_229 = arith.constant dense<0.000000e+00> : vector<7x28xf32>
    %250 = tpu.matmul %230, %249, %cst_229 {dimension_numbers = #tpu.dot_dimension_numbers<[1], [0], [0], [1], [0, 0, 1, 1], [], []>} : vector<7x224xbf16>, vector<224x28xbf16>, vector<7x28xf32> -> vector<7x28xf32>
    %c0_230 = arith.constant 0 : index
    %c0_231 = arith.constant 0 : index
    %c0_232 = arith.constant 0 : index
    %251 = vector.load %arg4[%c0_230, %c0_231, %c0_232] : memref<4x224x28xbf16, #tpu.memory_space<vmem>>, vector<1x224x28xbf16>
    %252 = vector.shape_cast %251 : vector<1x224x28xbf16> to vector<224x28xbf16>
    %cst_233 = arith.constant dense<0.000000e+00> : vector<7x28xf32>
    %253 = tpu.matmul %236, %252, %cst_233 {dimension_numbers = #tpu.dot_dimension_numbers<[1], [0], [0], [1], [0, 0, 1, 1], [], []>} : vector<7x224xbf16>, vector<224x28xbf16>, vector<7x28xf32> -> vector<7x28xf32>
    %254 = arith.addf %250, %253 : vector<7x28xf32>
    %c1_234 = arith.constant 1 : index
    %c0_235 = arith.constant 0 : index
    %c0_236 = arith.constant 0 : index
    %255 = vector.load %arg4[%c1_234, %c0_235, %c0_236] : memref<4x224x28xbf16, #tpu.memory_space<vmem>>, vector<1x224x28xbf16>
    %256 = vector.shape_cast %255 : vector<1x224x28xbf16> to vector<224x28xbf16>
    %cst_237 = arith.constant dense<0.000000e+00> : vector<7x28xf32>
    %257 = tpu.matmul %236, %256, %cst_237 {dimension_numbers = #tpu.dot_dimension_numbers<[1], [0], [0], [1], [0, 0, 1, 1], [], []>} : vector<7x224xbf16>, vector<224x28xbf16>, vector<7x28xf32> -> vector<7x28xf32>
    %c3_238 = arith.constant 3 : index
    %c0_239 = arith.constant 0 : index
    %c0_240 = arith.constant 0 : index
    %258 = vector.load %arg4[%c3_238, %c0_239, %c0_240] : memref<4x224x28xbf16, #tpu.memory_space<vmem>>, vector<1x224x28xbf16>
    %259 = vector.shape_cast %258 : vector<1x224x28xbf16> to vector<224x28xbf16>
    %cst_241 = arith.constant dense<0.000000e+00> : vector<7x28xf32>
    %260 = tpu.matmul %230, %259, %cst_241 {dimension_numbers = #tpu.dot_dimension_numbers<[1], [0], [0], [1], [0, 0, 1, 1], [], []>} : vector<7x224xbf16>, vector<224x28xbf16>, vector<7x28xf32> -> vector<7x28xf32>
    %261 = arith.addf %257, %260 : vector<7x28xf32>
    %c2_242 = arith.constant 2 : index
    %c0_243 = arith.constant 0 : index
    %c0_244 = arith.constant 0 : index
    %262 = vector.load %arg4[%c2_242, %c0_243, %c0_244] : memref<4x224x28xbf16, #tpu.memory_space<vmem>>, vector<1x224x28xbf16>
    %263 = vector.shape_cast %262 : vector<1x224x28xbf16> to vector<224x28xbf16>
    %cst_245 = arith.constant dense<0.000000e+00> : vector<7x28xf32>
    %264 = tpu.matmul %236, %263, %cst_245 {dimension_numbers = #tpu.dot_dimension_numbers<[1], [0], [0], [1], [0, 0, 1, 1], [], []>} : vector<7x224xbf16>, vector<224x28xbf16>, vector<7x28xf32> -> vector<7x28xf32>
    %c0_246 = arith.constant 0 : index
    %c0_247 = arith.constant 0 : index
    %c0_248 = arith.constant 0 : index
    %265 = vector.load %arg4[%c0_246, %c0_247, %c0_248] : memref<4x224x28xbf16, #tpu.memory_space<vmem>>, vector<1x224x28xbf16>
    %266 = vector.shape_cast %265 : vector<1x224x28xbf16> to vector<224x28xbf16>
    %cst_249 = arith.constant dense<0.000000e+00> : vector<7x28xf32>
    %267 = tpu.matmul %233, %266, %cst_249 {dimension_numbers = #tpu.dot_dimension_numbers<[1], [0], [0], [1], [0, 0, 1, 1], [], []>} : vector<7x224xbf16>, vector<224x28xbf16>, vector<7x28xf32> -> vector<7x28xf32>
    %268 = arith.addf %264, %267 : vector<7x28xf32>
    %269 = vector.broadcast %240 : f32 to vector<7x28xf32>
    %270 = arith.addf %247, %269 : vector<7x28xf32>
    %271 = math.tanh %270 : vector<7x28xf32>
    %c1_250 = arith.constant 1 : index
    %c0_251 = arith.constant 0 : index
    %c0_252 = arith.constant 0 : index
    %c0_253 = arith.constant 0 : index
    %272 = vector.load %arg7[%c1_250, %c0_251, %c0_252, %c0_253] : memref<2x7x4x28xf32, #tpu.memory_space<vmem>>, vector<1x7x1x28xf32>
    %273 = vector.shape_cast %272 : vector<1x7x1x28xf32> to vector<7x28xf32>
    %274 = vector.shape_cast %271 : vector<7x28xf32> to vector<1x7x1x28xf32>
    tpu.vector_store %arg7[%c1_250, %c0_251, %c0_252, %c0_253], %274 {strides = array<i32>} : memref<2x7x4x28xf32, #tpu.memory_space<vmem>>, vector<1x7x1x28xf32>,
    %275 = vector.broadcast %240 : f32 to vector<7x28xf32>
    %276 = arith.addf %254, %275 : vector<7x28xf32>
    %277 = math.tanh %276 : vector<7x28xf32>
    %c1_254 = arith.constant 1 : index
    %c0_255 = arith.constant 0 : index
    %c1_256 = arith.constant 1 : index
    %c0_257 = arith.constant 0 : index
    %278 = vector.load %arg7[%c1_254, %c0_255, %c1_256, %c0_257] : memref<2x7x4x28xf32, #tpu.memory_space<vmem>>, vector<1x7x1x28xf32>
    %279 = vector.shape_cast %278 : vector<1x7x1x28xf32> to vector<7x28xf32>
    %280 = vector.shape_cast %277 : vector<7x28xf32> to vector<1x7x1x28xf32>
    tpu.vector_store %arg7[%c1_254, %c0_255, %c1_256, %c0_257], %280 {strides = array<i32>} : memref<2x7x4x28xf32, #tpu.memory_space<vmem>>, vector<1x7x1x28xf32>,
    %281 = vector.broadcast %240 : f32 to vector<7x28xf32>
    %282 = arith.addf %261, %281 : vector<7x28xf32>
    %283 = math.tanh %282 : vector<7x28xf32>
    %c1_258 = arith.constant 1 : index
    %c0_259 = arith.constant 0 : index
    %c2_260 = arith.constant 2 : index
    %c0_261 = arith.constant 0 : index
    %284 = vector.load %arg7[%c1_258, %c0_259, %c2_260, %c0_261] : memref<2x7x4x28xf32, #tpu.memory_space<vmem>>, vector<1x7x1x28xf32>
    %285 = vector.shape_cast %284 : vector<1x7x1x28xf32> to vector<7x28xf32>
    %286 = vector.shape_cast %283 : vector<7x28xf32> to vector<1x7x1x28xf32>
    tpu.vector_store %arg7[%c1_258, %c0_259, %c2_260, %c0_261], %286 {strides = array<i32>} : memref<2x7x4x28xf32, #tpu.memory_space<vmem>>, vector<1x7x1x28xf32>,
    %287 = vector.broadcast %240 : f32 to vector<7x28xf32>
    %288 = arith.addf %268, %287 : vector<7x28xf32>
    %289 = math.tanh %288 : vector<7x28xf32>
    %c1_262 = arith.constant 1 : index
    %c0_263 = arith.constant 0 : index
    %c3_264 = arith.constant 3 : index
    %c0_265 = arith.constant 0 : index
    %290 = vector.load %arg7[%c1_262, %c0_263, %c3_264, %c0_265] : memref<2x7x4x28xf32, #tpu.memory_space<vmem>>, vector<1x7x1x28xf32>
    %291 = vector.shape_cast %290 : vector<1x7x1x28xf32> to vector<7x28xf32>
    %292 = vector.shape_cast %289 : vector<7x28xf32> to vector<1x7x1x28xf32>
    tpu.vector_store %arg7[%c1_262, %c0_263, %c3_264, %c0_265], %292 {strides = array<i32>} : memref<2x7x4x28xf32, #tpu.memory_space<vmem>>, vector<1x7x1x28xf32>,
    return
  }
}

</mosaic_0001>

<bundles_post_ra>
// kernel: decoder_forward.1
= control target key start
LH: loop header
LB: loop body
LE: loop exit
PB: predicated region body
PF: predicated region fallthrough
CT: control target
= control target key end

     0   :  { %13 = vsyncpa [#allocation7], 0  ;;  %s5926_s24 = smov [#allocation6]   ;;  %s7568_s0 = inlined_call_operand.vmem [shape: bf16[7,10,224], index: 0, kind: input, shape index: {}]   ;;  %s7569_s1 = inlined_call_operand.vmem [shape: f32[7,224], index: 1, kind: input, shape index: {}]   ;;  %s7570_s2 = inlined_call_operand.hbm [shape: bf16[4,224,224], index: 2, kind: input, shape index: {}]   ;;  %s7571_s3 = inlined_call_operand.vmem [shape: f32[1,224], index: 3, kind: input, shape index: {}]   ;;  %s7572_s4 = inlined_call_operand.vmem [shape: bf16[4,224,28], index: 4, kind: input, shape index: {}]   ;;  %s7573_s5 = inlined_call_operand.<no memory space> [shape: f32[1,1], index: 5, kind: input, shape index: {}]   ;;  %s7574_s6 = inlined_call_operand.vmem [shape: f32[2,10], index: 6, kind: input, shape index: {}]   ;;  %s7575_s7 = inlined_call_operand.vmem [shape: f32[2,7,4,28], index: 7, kind: output, shape index: {}]  }
   0x1   :  { %s23_s25 = sshll.u32 %s5926_s24, 4  ;;  %s5902_s28 = scalar_lea.hbm %s7570_s2, 14336  ;;  %s24_s25 = int_to_ptr.vmem [resolvable:$true] %s23_s25 }
   0x2   :  { %p5903_p0 = scmp.ne.s32.totalorder %s7570_s2, %s5902_s28  ;;  %p5906_p1 = scmp.lt.u32.totalorder %s5902_s28, %s7570_s2 }
   0x4   :  { %p5908_p2 = pnand %p5906_p1, %p5903_p0 }
   0x6   :  { %5911 = shalt.err (!%p5908_p2)
}
   0x7   :  { %s5912_s10 = scalar_lea.vmem %s24_s25, 14336  ;;  %p5917_p4 = scmp.lt.s32.totalorder %s24_s25, %s24_s25 }
   0x8   :  { %p5913_p3 = scmp.ne.s32.totalorder %s24_s25, %s5912_s10  ;;  %p5918_p5 = scmp.lt.s32.totalorder %s5912_s10, %s5912_s10 }
   0xa   :  { %p5919_p6 = por %p5918_p5, %p5917_p4 }
   0xc   :  { %p5920_p7 = pnand %p5919_p6, %p5913_p3 }
   0xe   :  { %5923 = shalt.err (!%p5920_p7)
}
   0xf   :  { %s5927_s11 = smov 128   ;;  %s5928_s12 = smov 8  }
  0x10   :  { %29 = dma.hbm_to_vmem [thread:$0]  %s7570_s2, 14336, %s24_s25, [#allocation7], %s5927_s11, %s5927_s11, %s5928_s12  }
  0x11   :  { %5924 = dma.done.wait [#allocation7], 14336  }
  0x12   :  { %5925 = vsyncadd [#allocation7], 4294952960  ;;  %v5929_v0 = vmov 0   ;;  %vm88_vm0 = vcmask 1044480   ;;  %v60_v5 = vld [vmem:[%s7574_s6] sm:$0x3] }
  0x13   :  { %127 = vmatprep.mubr.bf16.mxu0 %v5929_v0  ;;  %235 = vmatprep.mubr.bf16.mxu1 %v5929_v0  ;;  %v5417_v1 = vld [vmem:[%s7568_s0 + $0x4] ss:$8 sps:$4 sm:$0x1f]   ;;  %v5419_v2 = vld [vmem:[%s7568_s0 + $0x14] ss:$8 sps:$4 sm:$0x1f]   ;;  %v61_v8 = vpack.c.bf16 %v60_v5, %v60_v5 }
  0x14   :  { %4811 = vmatprep.subr.msk.bf16.mxu0 %vm88_vm0, %v5417_v1  ;;  %v5421_v3 = vld [vmem:[%s7568_s0] ss:$8 sps:$4 sm:$0x1f]   ;;  %v5422_v4 = vld [vmem:[%s7568_s0 + $0x10] ss:$8 sps:$4 sm:$0x1f]   ;;  %4818 = vmatprep.subr.msk.bf16.mxu1 %vm88_vm0, %v5419_v2 }
  0x15   :  { %vm84_vm1 = vcmask 80896   ;;  %v90_v6 = vsel %vm88_vm0, %v5421_v3, 0  ;;  %v198_v7 = vsel %vm88_vm0, %v5422_v4, 0  ;;  %v5423_v9 = vld [vmem:[%s7568_s0 + $0x24] ss:$8 sps:$4 sm:$0x1f]  }
  0x16   :  { %96 = vmatpush1.bf16.msra.mxu0 %v90_v6  ;;  %204 = vmatpush1.bf16.msra.mxu1 %v198_v7  ;;  %v5425_v10 = vld [vmem:[%s7568_s0 + $0x20] ss:$8 sps:$4 sm:$0x1f]   ;;  %v5426_v11 = vld [vmem:[%s7568_s0 + $0x34] ss:$8 sps:$4 sm:$0x1f]  }
  0x17   :  { %4825 = vmatprep.subr.msk.bf16.mxu0 %vm88_vm0, %v5423_v9  ;;  %v5428_v12 = vld [vmem:[%s7568_s0 + $0x30] ss:$8 sps:$4 sm:$0x1f]   ;;  %v302_v13 = vsel %vm88_vm0, %v5425_v10, 0  ;;  %4832 = vmatprep.subr.msk.bf16.mxu1 %vm88_vm0, %v5426_v11  ;;  %v5440_v22 = vld [vmem:[#allocation6 + $0x2a4] ss:$8 sps:$4 sm:$0xff]  }
  0x18   :  { %v5429_v14 = vld [vmem:[%s7568_s0 + $0x44] ss:$8 sps:$4 sm:$0x1f]   ;;  %v406_v15 = vsel %vm88_vm0, %v5428_v12, 0  ;;  %v5438_v24 = vld [vmem:[#allocation6 + $0x2a0] ss:$8 sps:$4 sm:$0xff]  }
  0x19   :  { %4812 = vmatmul.mubr.msk.bf16.vlgmr.msra.gmra.mrb[0].mxu0 %vm84_vm1, %v61_v8  ;;  %4819 = vmatmul.mubr.msk.bf16.vlgmr.msra.gmra.mrb[0].mxu1 %vm84_vm1, %v61_v8  ;;  %v5431_v16 = vld [vmem:[%s7568_s0 + $0x40] ss:$8 sps:$4 sm:$0x1f]   ;;  %v5432_v17 = vld [vmem:[%s7568_s0 + $0x54] ss:$8 sps:$4 sm:$0x1f]  }
  0x1a   :  { %308 = vmatpush1.bf16.msra.mxu0 %v302_v13  ;;  %412 = vmatpush1.bf16.msra.mxu1 %v406_v15  ;;  %v5434_v18 = vld [vmem:[%s7568_s0 + $0x50] ss:$8 sps:$4 sm:$0x1f]   ;;  %v510_v19 = vsel %vm88_vm0, %v5431_v16, 0  ;;  %v5443_v25 = vld [vmem:[#allocation6 + $0x2b4] ss:$8 sps:$4 sm:$0xff]  }
  0x1b   :  { %339 = vmatprep.mubr.bf16.mxu0 %v5929_v0  ;;  %443 = vmatprep.mubr.bf16.mxu1 %v5929_v0  ;;  %v614_v20 = vsel %vm88_vm0, %v5434_v18, 0  ;;  %v5435_v21 = vld [vmem:[%s7568_s0 + $0x64] ss:$8 sps:$4 sm:$0x1f]   ;;  %v5441_v28 = vld [vmem:[#allocation6 + $0x2b0] ss:$8 sps:$4 sm:$0xff]  }
  0x1c   :  { %4839 = vmatprep.subr.msk.bf16.mxu0 %vm88_vm0, %v5429_v14  ;;  %4846 = vmatprep.subr.msk.bf16.mxu1 %vm88_vm0, %v5432_v17  ;;  %v5437_v23 = vld [vmem:[%s7568_s0 + $0x60] ss:$8 sps:$4 sm:$0x1f]   ;;  %v5452_v26 = vld [vmem:[#allocation6 + $0xe4] ss:$8 sps:$4 sm:$0xff]   ;;  %vm43_vm2 = vcmask 785408  }
  0x1d   :  { %v718_v27 = vsel %vm88_vm0, %v5437_v23, 0  ;;  %v5446_v29 = vld [vmem:[#allocation6 + $0x2c4] ss:$8 sps:$4 sm:$0xff]   ;;  %v5450_v30 = vld [vmem:[#allocation6 + $0xe0] ss:$8 sps:$4 sm:$0xff]   ;;  %v5930_v42 = vmov 0.0  }
  0x1e   :  { %v5444_v31 = vld [vmem:[#allocation6 + $0x2c0] ss:$8 sps:$4 sm:$0xff]   ;;  %v5458_v32 = vld [vmem:[#allocation6 + $0xf4] ss:$8 sps:$4 sm:$0xff]   ;;  %v5456_v34 = vld [vmem:[#allocation6 + $0xf0] ss:$8 sps:$4 sm:$0xff]  }
  0x1f   :  { %v5449_v33 = vld [vmem:[#allocation6 + $0x2d4] ss:$8 sps:$4 sm:$0xff]   ;;  %v5447_v35 = vld [vmem:[#allocation6 + $0x2d0] ss:$8 sps:$4 sm:$0xff]   ;;  %v5455_v36 = vld [vmem:[#allocation6 + $0x2e4] ss:$8 sps:$4 sm:$0xff]  }
  0x20   :  { %v5453_v37 = vld [vmem:[#allocation6 + $0x2e0] ss:$8 sps:$4 sm:$0xff]   ;;  %v5461_v38 = vld [vmem:[#allocation6 + $0x2f4] ss:$8 sps:$4 sm:$0xff]   ;;  %v5459_v39 = vld [vmem:[#allocation6 + $0x2f0] ss:$8 sps:$4 sm:$0xff]  }
  0x21   :  { %4826 = vmatmul.mubr.msk.bf16.vlgmr.msra.gmra.mrb[4].mxu0 %vm84_vm1, %v61_v8  ;;  %4833 = vmatmul.mubr.msk.bf16.vlgmr.msra.gmra.mrb[4].mxu1 %vm84_vm1, %v61_v8  ;;  %v5464_v40 = vld [vmem:[#allocation6 + $0x104] ss:$8 sps:$4 sm:$0xff]   ;;  %v5462_v41 = vld [vmem:[#allocation6 + $0x100] ss:$8 sps:$4 sm:$0xff]   ;;  %42 = vst [vmem:[#allocation2] sm:$0xff] %v5930_v42  ;;  %44 = vst.msk [vmem:[#allocation2 + $0x8] sm:$0xff] %vm43_vm2, %v5930_v42 }
  0x22   :  { %516 = vmatpush1.bf16.msra.mxu0 %v510_v19  ;;  %620 = vmatpush1.bf16.msra.mxu1 %v614_v20  ;;  %48 = vst [vmem:[#allocation2 + $0x20] sm:$0xff] %v5930_v42  ;;  %49 = vst.msk [vmem:[#allocation2 + $0x28] sm:$0xff] %vm43_vm2, %v5930_v42  ;;  %v5467_v43 = vld [vmem:[#allocation6 + $0x304] ss:$8 sps:$4 sm:$0xff]   ;;  %v5465_v44 = vld [vmem:[#allocation6 + $0x300] ss:$8 sps:$4 sm:$0xff]   ;;  %v66_v20 = vlaneseq }
  0x23   :  { %547 = vmatprep.mubr.bf16.mxu0 %v5929_v0  ;;  %651 = vmatprep.mubr.bf16.mxu1 %v5929_v0  ;;  %45 = vst [vmem:[#allocation2 + $0x10] sm:$0x1] %v5930_v42  ;;  %50 = vst [vmem:[#allocation2 + $0x30] sm:$0x1] %v5930_v42  ;;  %v5470_v45 = vld [vmem:[#allocation6 + $0x114] ss:$8 sps:$4 sm:$0xff]  }
  0x24   :  { %4853 = vmatprep.subr.msk.bf16.mxu0 %vm88_vm0, %v5435_v21  ;;  %1012 = vmatprep.subr.bf16.mxu1 %v5440_v22  ;;  %52 = vst [vmem:[#allocation3] sm:$0xff] %v5930_v42  ;;  %53 = vst.msk [vmem:[#allocation3 + $0x8] sm:$0xff] %vm43_vm2, %v5930_v42  ;;  %v5468_v46 = vld [vmem:[#allocation6 + $0x110] ss:$8 sps:$4 sm:$0xff]   ;;  %v5473_v48 = vld [vmem:[#allocation6 + $0x314] ss:$8 sps:$4 sm:$0xff]  }
  0x25   :  { %54 = vst [vmem:[#allocation3 + $0x10] sm:$0xff] %v5930_v42  ;;  %55 = vst.msk [vmem:[#allocation3 + $0x18] sm:$0xff] %vm43_vm2, %v5930_v42  ;;  %v5471_v47 = vld [vmem:[#allocation6 + $0x310] ss:$8 sps:$4 sm:$0xff]   ;;  %v5476_v49 = vld [vmem:[#allocation6 + $0x124] ss:$8 sps:$4 sm:$0xff]  }
  0x26   :  { %56 = vst [vmem:[#allocation4] sm:$0xff] %v5930_v42  ;;  %57 = vst.msk [vmem:[#allocation4 + $0x8] sm:$0xff] %vm43_vm2, %v5930_v42  ;;  %v5474_v50 = vld [vmem:[#allocation6 + $0x120] ss:$8 sps:$4 sm:$0xff]   ;;  %v5479_v51 = vld [vmem:[#allocation6 + $0x324] ss:$8 sps:$4 sm:$0xff]  }
  0x27   :  { %58 = vst [vmem:[#allocation4 + $0x10] sm:$0xff] %v5930_v42  ;;  %59 = vst.msk [vmem:[#allocation4 + $0x18] sm:$0xff] %vm43_vm2, %v5930_v42  ;;  %v5477_v52 = vld [vmem:[#allocation6 + $0x320] ss:$8 sps:$4 sm:$0xff]   ;;  %v5482_v53 = vld [vmem:[#allocation6 + $0x134] ss:$8 sps:$4 sm:$0xff]  }
  0x28   :  { %v5480_v54 = vld [vmem:[#allocation6 + $0x130] ss:$8 sps:$4 sm:$0xff]   ;;  %v5485_v56 = vld [vmem:[#allocation6 + $0x334] ss:$8 sps:$4 sm:$0xff]   ;;  %v5488_v57 = vld [vmem:[#allocation6 + $0x144] ss:$8 sps:$4 sm:$0xff]  }
  0x29   :  { %4840 = vmatmul.mubr.msk.bf16.vlgmr.msra.gmra.mrb[8].mxu0 %vm84_vm1, %v61_v8  ;;  %4847 = vmatmul.mubr.msk.bf16.vlgmr.msra.gmra.mrb[8].mxu1 %vm84_vm1, %v61_v8  ;;  %v5483_v55 = vld [vmem:[#allocation6 + $0x330] ss:$8 sps:$4 sm:$0xff]   ;;  %v5486_v58 = vld [vmem:[#allocation6 + $0x140] ss:$8 sps:$4 sm:$0xff]   ;;  %v5491_v59 = vld [vmem:[#allocation6 + $0x344] ss:$8 sps:$4 sm:$0xff]  }
  0x2a   :  { %724 = vmatpush1.bf16.msra.mxu0 %v718_v27  ;;  %755 = vmatprep.mubr.bf16.mxu0 %v5929_v0  ;;  %v5489_v60 = vld [vmem:[#allocation6 + $0x340] ss:$8 sps:$4 sm:$0xff]   ;;  %v5494_v61 = vld [vmem:[#allocation6 + $0x154] ss:$8 sps:$4 sm:$0xff]   ;;  %v5492_v62 = vld [vmem:[#allocation6 + $0x150] ss:$8 sps:$4 sm:$0xff]  }
  0x2b   :  { %1013 = vmatpush1.bf16.msra.mxu1 %v5438_v24  ;;  %1211 = vmatprep.subr.bf16.mxu0 %v5452_v26  ;;  %v5497_v63 = vld [vmem:[#allocation6 + $0x354] ss:$8 sps:$4 sm:$0xff]   ;;  %v5495_v1 = vld [vmem:[#allocation6 + $0x350] ss:$8 sps:$4 sm:$0xff]   ;;  %v5500_v2 = vld [vmem:[#allocation6 + $0x164] ss:$8 sps:$4 sm:$0xff]  }
  0x2c   :  { %1014 = vmatprep.subr.bf16.mxu1 %v5443_v25  ;;  %v5498_v3 = vld [vmem:[#allocation6 + $0x160] ss:$8 sps:$4 sm:$0xff]   ;;  %v5503_v4 = vld [vmem:[#allocation6 + $0x364] ss:$8 sps:$4 sm:$0xff]   ;;  %v5506_v6 = vld [vmem:[#allocation6 + $0x174] ss:$8 sps:$4 sm:$0xff]  }
  0x2d   :  { %v5501_v5 = vld [vmem:[#allocation6 + $0x360] ss:$8 sps:$4 sm:$0xff]   ;;  %v5504_v7 = vld [vmem:[#allocation6 + $0x170] ss:$8 sps:$4 sm:$0xff]   ;;  %v5512_v10 = vld [vmem:[#allocation6 + $0x184] ss:$8 sps:$4 sm:$0xff]  }
  0x2e   :  { %v5507_v9 = vld [vmem:[#allocation6 + $0x370] ss:$8 sps:$4 sm:$0xff]   ;;  %v5510_v11 = vld [vmem:[#allocation6 + $0x180] ss:$8 sps:$4 sm:$0xff]   ;;  %v5515_v12 = vld [vmem:[#allocation6 + $0x4] ss:$8 sps:$4 sm:$0xff]  }
  0x2f   :  { %1015 = vmatpush1.bf16.msra.mxu1 %v5441_v28  ;;  %vm46_vm3 = vcmask 778240   ;;  %v5518_v13 = vld [vmem:[#allocation6 + $0x194] ss:$8 sps:$4 sm:$0xff]   ;;  %v5516_v14 = vld [vmem:[#allocation6 + $0x190] ss:$8 sps:$4 sm:$0xff]   ;;  %v67_v21 = vshrl.u32 %v66_v20, 7 }
  0x30   :  { %1016 = vmatprep.subr.bf16.mxu1 %v5446_v29  ;;  %47 = vst.msk [vmem:[#allocation2 + $0x18] sm:$0x1] %vm46_vm3, %v5930_v42  ;;  %51 = vst.msk [vmem:[#allocation2 + $0x38] sm:$0x1] %vm46_vm3, %v5930_v42  ;;  %v5524_v15 = vld [vmem:[#allocation6 + $0x1a4] ss:$8 sps:$4 sm:$0xff]  }
  0x31   :  { %4854 = vmatmul.mubr.msk.bf16.vlgmr.msra.gmra.mrb[12].mxu0 %vm84_vm1, %v61_v8  ;;  %v5509_v8 = vld [vmem:[#allocation6 + $0x374] ss:$8 sps:$4 sm:$0xff]   ;;  %v5522_v16 = vld [vmem:[#allocation6 + $0x1a0] ss:$8 sps:$4 sm:$0xff]   ;;  %v5528_v18 = vld [vmem:[#allocation6 + $0x1b0] ss:$8 sps:$4 sm:$0xff]  }
  0x32   :  { %1212 = vmatpush1.bf16.msra.mxu0 %v5450_v30  ;;  %v5530_v17 = vld [vmem:[#allocation6 + $0x1b4] ss:$8 sps:$4 sm:$0xff]   ;;  %v5536_v19 = vld [vmem:[#allocation6 + $0x1c4] ss:$8 sps:$4 sm:$0xff]   ;;  %v6082_v23 = vsub.s32 0, %v67_v21  ;;  %v6084_v26 = vsub.s32 1, %v67_v21 }
  0x33   :  { %1017 = vmatpush1.bf16.msra.mxu1 %v5444_v31  ;;  %1213 = vmatprep.subr.bf16.mxu0 %v5458_v32  ;;  %v64_v22 = vld [vmem:[%s7569_s1] ss:$8 sm:$0x3]  ;;  %v5931_v24 = vmov 1966171168   ;;  %vm6107_vm4 = vcmp.lt.s32.totalorder %v66_v20, 224 }
  0x34   :  { %1018 = vmatprep.subr.bf16.mxu1 %v5449_v33  ;;  %v140_v25 = vunpack.c.l.s4 %v5931_v24  ;;  %v4815_v27 = vld [vmem:[%s7569_s1 + $0x1] ss:$8 sm:$0x3]  ;;  %v69_v28 = vrot.slane %v64_v22, %v6082_v23  ;;  %v73_v31 = vrot.slane %v64_v22, %v6084_v26  ;;  %vm1698_vm5 = vcmask 784384  }
  0x35   :  { %v182_v29 = vrot.slane %v4815_v27, %v6082_v23  ;;  %v186_v32 = vrot.slane %v4815_v27, %v6084_v26  ;;  %vm1709_vm6 = vcmask 785409   ;;  %vm2600_vm7 = vcmask 221184  }
  0x36   :  { %1214 = vmatpush1.bf16.msra.mxu0 %v5456_v34  ;;  %v141_v30 = vunpack.c.0.s8 %v140_v25 }
  0x37   :  { %1019 = vmatpush1.bf16.msra.mxu1 %v5447_v35  ;;  %1215 = vmatprep.subr.bf16.mxu0 %v5464_v40 }
  0x38   :  { %1020 = vmatprep.subr.bf16.mxu1 %v5455_v36  ;;  %v6096_v40 = vsub.s32 %v141_v30, %v67_v21 }
  0x3a   :  { %1216 = vmatpush1.bf16.msra.mxu0 %v5462_v41 }
  0x3b   :  { %1021 = vmatpush1.bf16.msra.mxu1 %v5453_v37  ;;  %1217 = vmatprep.subr.bf16.mxu0 %v5470_v45  ;;  %v4829_v45 = vld [vmem:[%s7569_s1 + $0x3] ss:$8 sm:$0x3] }
  0x3c   :  { %1022 = vmatprep.subr.bf16.mxu1 %v5461_v38 }
  0x3e   :  { %1218 = vmatpush1.bf16.msra.mxu0 %v5468_v46 }
  0x3f   :  { %1023 = vmatpush1.bf16.msra.mxu1 %v5459_v39  ;;  %1219 = vmatprep.subr.bf16.mxu0 %v5476_v49  ;;  %v4822_v39 = vld [vmem:[%s7569_s1 + $0x2] ss:$8 sm:$0x3] }
  0x40   :  { %1024 = vmatprep.subr.bf16.mxu1 %v5467_v43 }
  0x42   :  { %1220 = vmatpush1.bf16.msra.mxu0 %v5474_v50  ;;  %v286_v50 = vrot.slane %v4822_v39, %v6082_v23 }
  0x43   :  { %1025 = vmatpush1.bf16.msra.mxu1 %v5465_v44  ;;  %1221 = vmatprep.subr.bf16.mxu0 %v5482_v53 }
  0x44   :  { %1026 = vmatprep.subr.bf16.mxu1 %v5473_v48 }
  0x46   :  { %1222 = vmatpush1.bf16.msra.mxu0 %v5480_v54  ;;  %v290_v54 = vrot.slane %v4822_v39, %v6084_v26 }
  0x47   :  { %1027 = vmatpush1.bf16.msra.mxu1 %v5471_v47  ;;  %1223 = vmatprep.subr.bf16.mxu0 %v5488_v57 }
  0x48   :  { %1028 = vmatprep.subr.bf16.mxu1 %v5479_v51  ;;  %v390_v51 = vrot.slane %v4829_v45, %v6082_v23 }
  0x4a   :  { %1224 = vmatpush1.bf16.msra.mxu0 %v5486_v58 }
  0x4b   :  { %1029 = vmatpush1.bf16.msra.mxu1 %v5477_v52  ;;  %1225 = vmatprep.subr.bf16.mxu0 %v5494_v61 }
  0x4c   :  { %1030 = vmatprep.subr.bf16.mxu1 %v5485_v56 }
  0x4e   :  { %1226 = vmatpush1.bf16.msra.mxu0 %v5492_v62 }
  0x4f   :  { %1031 = vmatpush1.bf16.msra.mxu1 %v5483_v55  ;;  %1227 = vmatprep.subr.bf16.mxu0 %v5500_v2  ;;  %v394_v55 = vrot.slane %v4829_v45, %v6084_v26 }
  0x50   :  { %1032 = vmatprep.subr.bf16.mxu1 %v5491_v59 }
  0x52   :  { %1228 = vmatpush1.bf16.msra.mxu0 %v5498_v3 }
  0x53   :  { %1033 = vmatpush1.bf16.msra.mxu1 %v5489_v60  ;;  %1229 = vmatprep.subr.bf16.mxu0 %v5506_v6 }
  0x54   :  { %1034 = vmatprep.subr.bf16.mxu1 %v5497_v63 }
  0x56   :  { %1230 = vmatpush1.bf16.msra.mxu0 %v5504_v7 }
  0x57   :  { %1035 = vmatpush1.bf16.msra.mxu1 %v5495_v1  ;;  %1231 = vmatprep.subr.bf16.mxu0 %v5512_v10 }
  0x58   :  { %1036 = vmatprep.subr.bf16.mxu1 %v5503_v4  ;;  %v4836_v4 = vld [vmem:[%s7569_s1 + $0x4] ss:$8 sm:$0x3] }
  0x59   :  { %v498_v20 = vrot.slane %v4836_v4, %v6084_v26 }
  0x5a   :  { %1232 = vmatpush1.bf16.msra.mxu0 %v5510_v11  ;;  %v4843_v11 = vld [vmem:[%s7569_s1 + $0x5] ss:$8 sm:$0x3] }
  0x5b   :  { %1037 = vmatpush1.bf16.msra.mxu1 %v5501_v5  ;;  %1233 = vmatprep.subr.bf16.mxu0 %v5518_v13  ;;  %v602_v21 = vrot.slane %v4843_v11, %v6084_v26 }
  0x5c   :  { %1038 = vmatprep.subr.bf16.mxu1 %v5509_v8 }
  0x5e   :  { %1234 = vmatpush1.bf16.msra.mxu0 %v5516_v14 }
  0x5f   :  { %1039 = vmatpush1.bf16.msra.mxu1 %v5507_v9  ;;  %1235 = vmatprep.subr.bf16.mxu0 %v5524_v15 }
  0x60   :  { %1471 = vmatprep.subr.bf16.mxu1 %v5515_v12 }
  0x62   :  { %1236 = vmatpush1.bf16.msra.mxu0 %v5522_v16  ;;  %v494_v16 = vrot.slane %v4836_v4, %v6082_v23 }
  0x63   :  { %1237 = vmatprep.subr.bf16.mxu0 %v5530_v17  ;;  %v598_v17 = vrot.slane %v4843_v11, %v6082_v23  ;;  %v5519_v11 = vld [vmem:[#allocation6 + $0x10] ss:$8 sps:$4 sm:$0xff]  }
  0x66   :  { %1238 = vmatpush1.bf16.msra.mxu0 %v5528_v18 }
  0x67   :  { %1652 = vmatprep.subr.bf16.mxu0 %v5536_v19 }
  0xec   :  { %v129_v33 = vpop.f32.mrb[0].mxu0  ;;  %v237_v34 = vpop.f32.mrb[0].mxu1 }
  0xed   :  { %v130_v35 = vadd.f32 %v129_v33, %v69_v28  ;;  %v131_v36 = vpop.f32.mrb[1].mxu0  ;;  %v238_v37 = vadd.f32 %v237_v34, %v182_v29  ;;  %v239_v38 = vpop.f32.mrb[1].mxu1 }
  0xee   :  { %v132_v41 = vadd.f32 %v131_v36, %v73_v31  ;;  %v133_v42 = vpop.f32.mrb[2].mxu0  ;;  %v240_v43 = vadd.f32 %v239_v38, %v186_v32  ;;  %v241_v44 = vpop.f32.mrb[2].mxu1 }
  0xef   :  { %v134_v46 = vpop.f32.mrb[3].mxu0  ;;  %v242_v47 = vpop.f32.mrb[3].mxu1 }
  0xf0   :  { %v138_v48 = vcombine.low %v130_v35, %v132_v41  ;;  %v246_v49 = vcombine.low %v238_v37, %v240_v43  ;;  %v4850_v41 = vld [vmem:[%s7569_s1 + $0x6] ss:$8 sm:$0x3] }
  0xf1   :  { %v702_v46 = vrot.slane %v4850_v41, %v6082_v23 }
  0xf2   :  { %v145_v52 = vrot.slane %v138_v48, %v6096_v40  ;;  %v253_v53 = vrot.slane %v246_v49, %v6096_v40  ;;  %v706_v49 = vrot.slane %v4850_v41, %v6084_v26  ;;  %v5543_v41 = vld [vmem:[#allocation6 + $0x50] ss:$8 sps:$4 sm:$0xff]  }
  0xf4   :  { %v146_v57 = vcombine.high %v145_v52, %v145_v52  ;;  %v153_v58 = vrot.slane %v145_v52, %v6096_v40  ;;  %v254_v59 = vcombine.high %v253_v53, %v253_v53  ;;  %v261_v60 = vrot.slane %v253_v53, %v6096_v40  ;;  %v341_v61 = vpop.f32.mrb[4].mxu0  ;;  %v445_v62 = vpop.f32.mrb[4].mxu1 }
  0xf5   :  { %v342_v63 = vadd.f32 %v341_v61, %v286_v50  ;;  %v343_v1 = vpop.f32.mrb[5].mxu0  ;;  %v446_v2 = vadd.f32 %v445_v62, %v390_v51  ;;  %v447_v3 = vpop.f32.mrb[5].mxu1 }
  0xf6   :  { %v160_v5 = vrot.slane %v146_v57, %v6096_v40  ;;  %168 = vst.msk [vmem:[#allocation2 + $0x1] ss:$8 sm:$0x3] %vm6107_vm4, %v153_v58  ;;  %v268_v6 = vrot.slane %v254_v59, %v6096_v40  ;;  %272 = vst.msk [vmem:[#allocation2 + $0x2] ss:$8 sm:$0x3] %vm6107_vm4, %v261_v60  ;;  %v344_v7 = vadd.f32 %v343_v1, %v290_v54 }
  0xf7   :  { %v345_v8 = vpop.f32.mrb[6].mxu0  ;;  %v448_v9 = vadd.f32 %v447_v3, %v394_v55  ;;  %v449_v10 = vpop.f32.mrb[6].mxu1 }
  0xf8   :  { %v346_v12 = vpop.f32.mrb[7].mxu0  ;;  %v450_v13 = vpop.f32.mrb[7].mxu1  ;;  %171 = vst.msk [vmem:[#allocation2 + $0x21] ss:$8 sm:$0x3] %vm6107_vm4, %v160_v5  ;;  %v350_v14 = vcombine.low %v342_v63, %v344_v7 }
  0xf9   :  { %275 = vst.msk [vmem:[#allocation2 + $0x22] ss:$8 sm:$0x3] %vm6107_vm4, %v268_v6  ;;  %v454_v15 = vcombine.low %v446_v2, %v448_v9  ;;  %v5513_v8 = vld [vmem:[#allocation6] ss:$8 sps:$4 sm:$0xff]  }
  0xfa   :  { %v357_v18 = vrot.slane %v350_v14, %v6096_v40  ;;  %v5521_v10 = vld [vmem:[#allocation6 + $0x14] ss:$8 sps:$4 sm:$0xff]   ;;  %v5527_v12 = vld [vmem:[#allocation6 + $0x24] ss:$8 sps:$4 sm:$0xff]   ;;  %v808_v13 = vld [vmem:[#allocation2 + $0x18] sm:$0x1] }
  0xfb   :  { %v461_v19 = vrot.slane %v454_v15, %v6096_v40 }
  0xfc   :  { %v358_v22 = vcombine.high %v357_v18, %v357_v18  ;;  %v365_v24 = vrot.slane %v357_v18, %v6096_v40  ;;  %v549_v28 = vpop.f32.mrb[8].mxu0  ;;  %v653_v29 = vpop.f32.mrb[8].mxu1 }
  0xfd   :  { %v462_v25 = vcombine.high %v461_v19, %v461_v19  ;;  %v469_v27 = vrot.slane %v461_v19, %v6096_v40  ;;  %v550_v30 = vadd.f32 %v549_v28, %v494_v16  ;;  %v654_v31 = vadd.f32 %v653_v29, %v598_v17  ;;  %v551_v32 = vpop.f32.mrb[9].mxu0  ;;  %v655_v33 = vpop.f32.mrb[9].mxu1  ;;  %v5525_v17 = vld [vmem:[#allocation6 + $0x20] ss:$8 sps:$4 sm:$0xff]  }
  0xfe   :  { %v372_v34 = vrot.slane %v358_v22, %v6096_v40  ;;  %376 = vst.msk [vmem:[#allocation2 + $0x3] ss:$8 sm:$0x3] %vm6107_vm4, %v365_v24  ;;  %v552_v36 = vadd.f32 %v551_v32, %v498_v20  ;;  %v656_v37 = vadd.f32 %v655_v33, %v602_v21  ;;  %v553_v38 = vpop.f32.mrb[10].mxu0  ;;  %v657_v39 = vpop.f32.mrb[10].mxu1 }
  0xff   :  { %v476_v35 = vrot.slane %v462_v25, %v6096_v40  ;;  %480 = vst.msk [vmem:[#allocation2 + $0x4] ss:$8 sm:$0x3] %vm6107_vm4, %v469_v27  ;;  %v554_v42 = vpop.f32.mrb[11].mxu0  ;;  %v658_v43 = vpop.f32.mrb[11].mxu1 }
 0x100   :  { %379 = vst.msk [vmem:[#allocation2 + $0x23] ss:$8 sm:$0x3] %vm6107_vm4, %v372_v34  ;;  %v558_v44 = vcombine.low %v550_v30, %v552_v36  ;;  %v662_v45 = vcombine.low %v654_v31, %v656_v37  ;;  %v5533_v21 = vld [vmem:[#allocation6 + $0x34] ss:$8 sps:$4 sm:$0xff]  }
 0x101   :  { %483 = vst.msk [vmem:[#allocation2 + $0x24] ss:$8 sm:$0x3] %vm6107_vm4, %v476_v35  ;;  %v5531_v25 = vld [vmem:[#allocation6 + $0x30] ss:$8 sps:$4 sm:$0xff]  }
 0x102   :  { %v565_v47 = vrot.slane %v558_v44, %v6096_v40  ;;  %v669_v48 = vrot.slane %v662_v45, %v6096_v40  ;;  %v5539_v31 = vld [vmem:[#allocation6 + $0x44] ss:$8 sps:$4 sm:$0xff]   ;;  %v5534_v33 = vld [vmem:[#allocation6 + $0x1c0] ss:$8 sps:$4 sm:$0xff]   ;;  %v5542_v35 = vld [vmem:[#allocation6 + $0x1d4] ss:$8 sps:$4 sm:$0xff]  }
 0x103   :  { %v5537_v36 = vld [vmem:[#allocation6 + $0x40] ss:$8 sps:$4 sm:$0xff]   ;;  %v5545_v37 = vld [vmem:[#allocation6 + $0x54] ss:$8 sps:$4 sm:$0xff]   ;;  %v5540_v38 = vld [vmem:[#allocation6 + $0x1d0] ss:$8 sps:$4 sm:$0xff]  }
 0x104   :  { %v566_v50 = vcombine.high %v565_v47, %v565_v47  ;;  %v573_v51 = vrot.slane %v565_v47, %v6096_v40  ;;  %v670_v52 = vcombine.high %v669_v48, %v669_v48  ;;  %v677_v53 = vrot.slane %v669_v48, %v6096_v40  ;;  %v757_v54 = vpop.f32.mrb[12].mxu0  ;;  %v5548_v39 = vld [vmem:[#allocation6 + $0x1e4] ss:$8 sps:$4 sm:$0xff]   ;;  %v5546_v43 = vld [vmem:[#allocation6 + $0x1e0] ss:$8 sps:$4 sm:$0xff]  }
 0x105   :  { %v758_v55 = vadd.f32 %v757_v54, %v702_v46  ;;  %v759_v57 = vpop.f32.mrb[13].mxu0  ;;  %v5551_v42 = vld [vmem:[#allocation6 + $0x64] ss:$8 sps:$4 sm:$0xff]   ;;  %v5554_v44 = vld [vmem:[#allocation6 + $0x1f4] ss:$8 sps:$4 sm:$0xff]  }
 0x106   :  { %v580_v58 = vrot.slane %v566_v50, %v6096_v40  ;;  %584 = vst.msk [vmem:[#allocation2 + $0x5] ss:$8 sm:$0x3] %vm6107_vm4, %v573_v51  ;;  %v684_v59 = vrot.slane %v670_v52, %v6096_v40  ;;  %688 = vst.msk [vmem:[#allocation2 + $0x6] ss:$8 sm:$0x3] %vm6107_vm4, %v677_v53  ;;  %v760_v60 = vadd.f32 %v759_v57, %v706_v49 }
 0x107   :  { %v761_v61 = vpop.f32.mrb[14].mxu0  ;;  %v5549_v45 = vld [vmem:[#allocation6 + $0x60] ss:$8 sps:$4 sm:$0xff]   ;;  %v5557_v46 = vld [vmem:[#allocation6 + $0x74] ss:$8 sps:$4 sm:$0xff]  }
 0x108   :  { %v762_v62 = vpop.f32.mrb[15].mxu0  ;;  %587 = vst.msk [vmem:[#allocation2 + $0x25] ss:$8 sm:$0x3] %vm6107_vm4, %v580_v58  ;;  %v766_v63 = vcombine.low %v758_v55, %v760_v60  ;;  %v5552_v47 = vld [vmem:[#allocation6 + $0x1f0] ss:$8 sps:$4 sm:$0xff]  }
 0x109   :  { %691 = vst.msk [vmem:[#allocation2 + $0x26] ss:$8 sm:$0x3] %vm6107_vm4, %v684_v59  ;;  %v5560_v48 = vld [vmem:[#allocation6 + $0x204] ss:$8 sps:$4 sm:$0xff]  }
 0x10a   :  { %v773_v1 = vrot.slane %v766_v63, %v6096_v40  ;;  %v5555_v49 = vld [vmem:[#allocation6 + $0x70] ss:$8 sps:$4 sm:$0xff]   ;;  %v5563_v50 = vld [vmem:[#allocation6 + $0x84] ss:$8 sps:$4 sm:$0xff]   ;;  %v5558_v51 = vld [vmem:[#allocation6 + $0x200] ss:$8 sps:$4 sm:$0xff]  }
 0x10b   :  { %v5566_v52 = vld [vmem:[#allocation6 + $0x214] ss:$8 sps:$4 sm:$0xff]   ;;  %v5561_v53 = vld [vmem:[#allocation6 + $0x80] ss:$8 sps:$4 sm:$0xff]   ;;  %v5564_v55 = vld [vmem:[#allocation6 + $0x210] ss:$8 sps:$4 sm:$0xff]  }
 0x10c   :  { %v774_v2 = vcombine.high %v773_v1, %v773_v1  ;;  %v781_v3 = vrot.slane %v773_v1, %v6096_v40  ;;  %v5569_v54 = vld [vmem:[#allocation6 + $0x94] ss:$8 sps:$4 sm:$0xff]   ;;  %v5572_v57 = vld [vmem:[#allocation6 + $0x224] ss:$8 sps:$4 sm:$0xff]   ;;  %v5567_v58 = vld [vmem:[#allocation6 + $0x90] ss:$8 sps:$4 sm:$0xff]  }
 0x10d   :  { %v802_v4 = vld [vmem:[#allocation2 + $0x8] sm:$0x7f]  ;;  %v801_v5 = vld [vmem:[#allocation2] sm:$0x7f]  ;;  %v5578_v61 = vld [vmem:[#allocation6 + $0x234] ss:$8 sps:$4 sm:$0xff]  }
 0x10e   :  { %v788_v6 = vrot.slane %v774_v2, %v6096_v40  ;;  %792 = vst.msk [vmem:[#allocation2 + $0x7] ss:$8 sm:$0x3] %vm6107_vm4, %v781_v3  ;;  %v804_v7 = vpack.c.bf16 %v802_v4, %v802_v4  ;;  %v803_v9 = vpack.c.bf16 %v801_v5, %v801_v5  ;;  %v5575_v59 = vld [vmem:[#allocation6 + $0xa4] ss:$8 sps:$4 sm:$0xff]  }
 0x10f   :  { %v5570_v60 = vld [vmem:[#allocation6 + $0x220] ss:$8 sps:$4 sm:$0xff]   ;;  %v5581_v63 = vld [vmem:[#allocation6 + $0xb4] ss:$8 sps:$4 sm:$0xff]   ;;  %v5576_v1 = vld [vmem:[#allocation6 + $0x230] ss:$8 sps:$4 sm:$0xff]  }
 0x110   :  { %795 = vst.msk [vmem:[#allocation2 + $0x27] ss:$8 sm:$0x3] %vm6107_vm4, %v788_v6  ;;  %4883 = vmatprep.mubr.msk.bf16.mxu1 %vm43_vm2, %v804_v7  ;;  %v5573_v62 = vld [vmem:[#allocation6 + $0xa0] ss:$8 sps:$4 sm:$0xff]  }
 0x111   :  { %1045 = vmatmul.mubr.bf16.vlgmr.msra.gmra.mrb[12].mxu1 %v803_v9  ;;  %v5584_v2 = vld [vmem:[#allocation6 + $0x244] ss:$8 sps:$4 sm:$0xff]   ;;  %v5579_v3 = vld [vmem:[#allocation6 + $0xb0] ss:$8 sps:$4 sm:$0xff]   ;;  %v5582_v5 = vld [vmem:[#allocation6 + $0x240] ss:$8 sps:$4 sm:$0xff]  }
 0x112   :  { %1472 = vmatpush1.bf16.msra.mxu1 %v5513_v8  ;;  %v5587_v4 = vld [vmem:[#allocation6 + $0xc4] ss:$8 sps:$4 sm:$0xff]   ;;  %v5590_v6 = vld [vmem:[#allocation6 + $0x254] ss:$8 sps:$4 sm:$0xff]   ;;  %v5585_v7 = vld [vmem:[#allocation6 + $0xc0] ss:$8 sps:$4 sm:$0xff]  }
 0x113   :  { %1473 = vmatprep.subr.bf16.mxu1 %v5521_v10  ;;  %v5593_v8 = vld [vmem:[#allocation6 + $0xd4] ss:$8 sps:$4 sm:$0xff]   ;;  %v5588_v9 = vld [vmem:[#allocation6 + $0x250] ss:$8 sps:$4 sm:$0xff]  }
 0x115   :  { %v806_v14 = vld [vmem:[#allocation2 + $0x8] sm:$0xfc]  ;;  %v797_v16 = vld [vmem:[#allocation2] sm:$0xfe] }
 0x116   :  { %v798_v15 = vld [vmem:[#allocation2 + $0x8] sm:$0xfe]  ;;  %1474 = vmatpush1.bf16.msra.mxu1 %v5519_v11  ;;  %v810_v18 = vpack.c.bf16 %v808_v13, %v806_v14  ;;  %v799_v20 = vpack.c.bf16 %v797_v16, %v797_v16  ;;  %v805_v10 = vld [vmem:[#allocation2] sm:$0xfc]  ;;  %v807_v11 = vld [vmem:[#allocation2 + $0x10] sm:$0x1] }
 0x117   :  { %v800_v19 = vpack.c.bf16 %v798_v15, %v798_v15  ;;  %1475 = vmatprep.subr.bf16.mxu1 %v5527_v12  ;;  %v5596_v12 = vld [vmem:[#allocation6 + $0x264] ss:$8 sps:$4 sm:$0xff]   ;;  %v5591_v13 = vld [vmem:[#allocation6 + $0xd0] ss:$8 sps:$4 sm:$0xff]   ;;  %v809_v14 = vpack.c.bf16 %v807_v11, %v805_v10  ;;  %v5594_v15 = vld [vmem:[#allocation6 + $0x260] ss:$8 sps:$4 sm:$0xff]  }
 0x118   :  { %v1326_v56 = vrot.slane %v810_v18, 1  ;;  %v1056_v24 = vshll.u32 %v799_v20, 16  ;;  %v1054_v29 = vshrl.u32 %v799_v20, 16  ;;  %v5599_v16 = vld [vmem:[#allocation6 + $0x274] ss:$8 sps:$4 sm:$0xff]   ;;  %v6390_v11 = vld [vmem:[%s7572_s4 + $0xe0] sm:$0xff]  }
 0x119   :  { %v1063_v22 = vshll.u32 %v800_v19, 16  ;;  %v1061_v27 = vshrl.u32 %v800_v19, 16  ;;  %v5597_v18 = vld [vmem:[#allocation6 + $0x270] ss:$8 sps:$4 sm:$0xff]   ;;  %v5602_v19 = vld [vmem:[#allocation6 + $0x284] ss:$8 sps:$4 sm:$0xff]  }
 0x11a   :  { %1476 = vmatpush1.bf16.msra.mxu1 %v5525_v17  ;;  %4941 = vmatprep.mubr.msk.bf16.mxu1 %vm43_vm2, %v1326_v56  ;;  %v1058_v30 = vrot.slane %v1056_v24, 1  ;;  %v1325_v17 = vrot.slane %v809_v14, 1  ;;  %v5600_v20 = vld [vmem:[#allocation6 + $0x280] ss:$8 sps:$4 sm:$0xff]   ;;  %v5603_v56 = vld [vmem:[#allocation6 + $0x290] ss:$8 sps:$4 sm:$0xff]  }
 0x11b   :  { %v1065_v28 = vrot.slane %v1063_v22, 1  ;;  %1477 = vmatprep.subr.bf16.mxu1 %v5533_v21  ;;  %v5605_v21 = vld [vmem:[#allocation6 + $0x294] ss:$8 sps:$4 sm:$0xff]  }
 0x11c   :  { %v6175_v34 = vor.u32 %v1058_v30, %v1054_v29  ;;  %v6184_v22 = vld [vmem:[%s7572_s4 + $0x70] sm:$0xff]   ;;  %v6192_v24 = vld [vmem:[%s7572_s4 + $0x78] sm:$0xff]   ;;  %v6227_v30 = vld [vmem:[%s7572_s4 + $0xa0] sm:$0xff]  }
 0x11d   :  { %v1066_v32 = vor.u32 %v1065_v28, %v1061_v27  ;;  %v6206_v27 = vld [vmem:[%s7572_s4 + $0x88] sm:$0xff]   ;;  %v6213_v28 = vld [vmem:[%s7572_s4 + $0x90] sm:$0xff]   ;;  %v6220_v29 = vld [vmem:[%s7572_s4 + $0x98] sm:$0xff]  }
 0x11e   :  { %1478 = vmatpush1.bf16.msra.mxu1 %v5531_v25  ;;  %v6199_v25 = vld [vmem:[%s7572_s4 + $0x80] sm:$0xff]   ;;  %v6410_v14 = vld [vmem:[%s7572_s4 + $0xf0] sm:$0xff]  }
 0x11f   :  { %4912 = vmatprep.mubr.msk.bf16.mxu0 %vm43_vm2, %v1066_v32  ;;  %1479 = vmatprep.subr.bf16.mxu1 %v5539_v31  ;;  %v6234_v31 = vld [vmem:[%s7572_s4 + $0xa8] sm:$0xff]  }
 0x120   :  { %1244 = vmatmul.mubr.bf16.vlgmr.msra.gmra.mrb[16].mxu0 %v6175_v34 }
 0x121   :  { %1653 = vmatpush1.bf16.msra.mxu0 %v5534_v33  ;;  %4970 = vmatprep.mubr.msk.bf16.mxu0 %vm43_vm2, %v1066_v32  ;;  %v6241_v32 = vld [vmem:[%s7572_s4 + $0xb0] sm:$0xff]   ;;  %v6248_v33 = vld [vmem:[%s7572_s4 + $0xb8] sm:$0xff]  }
 0x122   :  { %1654 = vmatprep.subr.bf16.mxu0 %v5542_v35  ;;  %1480 = vmatpush1.bf16.msra.mxu1 %v5537_v36  ;;  %v6262_v35 = vld [vmem:[%s7572_s4 + $0xc8] sm:$0xff]   ;;  %v6269_v36 = vld [vmem:[%s7572_s4 + $0xd0] sm:$0xff]  }
 0x123   :  { %1481 = vmatprep.subr.bf16.mxu1 %v5545_v37  ;;  %v6275_v37 = vld [vmem:[%s7572_s4 + $0x150] sm:$0xff]  }
 0x125   :  { %1655 = vmatpush1.bf16.msra.mxu0 %v5540_v38  ;;  %v6282_v38 = vld [vmem:[%s7572_s4 + $0xd8] sm:$0xff]  }
 0x126   :  { %1656 = vmatprep.subr.bf16.mxu0 %v5548_v39  ;;  %1482 = vmatpush1.bf16.msra.mxu1 %v5543_v41  ;;  %v6289_v39 = vld [vmem:[%s7572_s4 + $0x158] sm:$0xff]   ;;  %v6298_v41 = vld [vmem:[%s7572_s4 + $0x160] sm:$0xff]  }
 0x127   :  { %1483 = vmatprep.subr.bf16.mxu1 %v5551_v42  ;;  %v6305_v42 = vld [vmem:[%s7572_s4 + $0x168] sm:$0xff]  }
 0x129   :  { %1657 = vmatpush1.bf16.msra.mxu0 %v5546_v43  ;;  %v6312_v43 = vld [vmem:[%s7572_s4 + $0x170] sm:$0xff]  }
 0x12a   :  { %1658 = vmatprep.subr.bf16.mxu0 %v5554_v44  ;;  %1484 = vmatpush1.bf16.msra.mxu1 %v5549_v45  ;;  %v6319_v44 = vld [vmem:[%s7572_s4 + $0x178] sm:$0xff]   ;;  %v6326_v45 = vld [vmem:[%s7572_s4 + $0x180] sm:$0xff]  }
 0x12b   :  { %1485 = vmatprep.subr.bf16.mxu1 %v5557_v46  ;;  %v6333_v46 = vld [vmem:[%s7572_s4 + $0x188] sm:$0xff]  }
 0x12d   :  { %1659 = vmatpush1.bf16.msra.mxu0 %v5552_v47  ;;  %v6340_v47 = vld [vmem:[%s7572_s4 + $0x190] sm:$0xff]  }
 0x12e   :  { %1660 = vmatprep.subr.bf16.mxu0 %v5560_v48  ;;  %1486 = vmatpush1.bf16.msra.mxu1 %v5555_v49  ;;  %v6347_v48 = vld [vmem:[%s7572_s4 + $0x198] sm:$0xff]   ;;  %v6354_v49 = vld [vmem:[%s7572_s4 + $0x1a0] sm:$0xff]  }
 0x12f   :  { %1487 = vmatprep.subr.bf16.mxu1 %v5563_v50  ;;  %v6361_v50 = vld [vmem:[%s7572_s4 + $0x1a8] sm:$0xff]  }
 0x131   :  { %1661 = vmatpush1.bf16.msra.mxu0 %v5558_v51  ;;  %v6368_v51 = vld [vmem:[%s7572_s4 + $0x1b0] sm:$0xff]  }
 0x132   :  { %1662 = vmatprep.subr.bf16.mxu0 %v5566_v52  ;;  %1488 = vmatpush1.bf16.msra.mxu1 %v5561_v53  ;;  %v6375_v52 = vld [vmem:[%s7572_s4 + $0x1b8] sm:$0xff]  }
 0x133   :  { %1489 = vmatprep.subr.bf16.mxu1 %v5569_v54 }
 0x135   :  { %1663 = vmatpush1.bf16.msra.mxu0 %v5564_v55 }
 0x136   :  { %1664 = vmatprep.subr.bf16.mxu0 %v5572_v57  ;;  %1490 = vmatpush1.bf16.msra.mxu1 %v5567_v58  ;;  %v1252_v58 = vld [vmem:[%s7571_s3] sm:$0x3] }
 0x137   :  { %1491 = vmatprep.subr.bf16.mxu1 %v5575_v59  ;;  %v1257_v59 = vrot.slane %v1252_v58, %v6082_v23 }
 0x139   :  { %1665 = vmatpush1.bf16.msra.mxu0 %v5570_v60 }
 0x13a   :  { %1666 = vmatprep.subr.bf16.mxu0 %v5578_v61  ;;  %1492 = vmatpush1.bf16.msra.mxu1 %v5573_v62  ;;  %v1261_v61 = vrot.slane %v1252_v58, %v6084_v26  ;;  %v6466_v58 = vld [vmem:[%s7572_s4 + $0x130] sm:$0xff]  }
 0x13b   :  { %1493 = vmatprep.subr.bf16.mxu1 %v5581_v63 }
 0x13d   :  { %1667 = vmatpush1.bf16.msra.mxu0 %v5576_v1 }
 0x13e   :  { %1668 = vmatprep.subr.bf16.mxu0 %v5584_v2  ;;  %1494 = vmatpush1.bf16.msra.mxu1 %v5579_v3 }
 0x13f   :  { %1495 = vmatprep.subr.bf16.mxu1 %v5587_v4 }
 0x141   :  { %1669 = vmatpush1.bf16.msra.mxu0 %v5582_v5 }
 0x142   :  { %1670 = vmatprep.subr.bf16.mxu0 %v5590_v6  ;;  %1496 = vmatpush1.bf16.msra.mxu1 %v5585_v7 }
 0x143   :  { %1497 = vmatprep.subr.bf16.mxu1 %v5593_v8 }
 0x145   :  { %1671 = vmatpush1.bf16.msra.mxu0 %v5588_v9 }
 0x146   :  { %1672 = vmatprep.subr.bf16.mxu0 %v5596_v12  ;;  %1498 = vmatpush1.bf16.msra.mxu1 %v5591_v13  ;;  %v6403_v13 = vld [vmem:[%s7572_s4 + $0xe8] sm:$0xff]  }
 0x147   :  { %1873 = vmatprep.subr.bf16.mxu1 %v5929_v0 }
 0x149   :  { %1673 = vmatpush1.bf16.msra.mxu0 %v5594_v15  ;;  %1504 = vmatmul.mubr.bf16.vlgmr.msra.gmra.mrb[16].mxu1 %v1325_v17  ;;  %v6417_v15 = vld [vmem:[%s7572_s4 + $0xf8] sm:$0xff]   ;;  %v6431_v17 = vld [vmem:[%s7572_s4 + $0x108] sm:$0xff]  }
 0x14a   :  { %1674 = vmatprep.subr.bf16.mxu0 %v5599_v16  ;;  %1874 = vmatpush1.bf16.msra.mxu1 %v6275_v37  ;;  %v6424_v16 = vld [vmem:[%s7572_s4 + $0x100] sm:$0xff]  }
 0x14b   :  { %1875 = vmatprep.subr.bf16.mxu1 %v5929_v0 }
 0x14d   :  { %1675 = vmatpush1.bf16.msra.mxu0 %v5597_v18  ;;  %v6438_v18 = vld [vmem:[%s7572_s4 + $0x110] sm:$0xff]  }
 0x14e   :  { %1676 = vmatprep.subr.bf16.mxu0 %v5602_v19  ;;  %1876 = vmatpush1.bf16.msra.mxu1 %v6289_v39 }
 0x14f   :  { %1877 = vmatprep.subr.bf16.mxu1 %v5929_v0 }
 0x151   :  { %1677 = vmatpush1.bf16.msra.mxu0 %v5600_v20 }
 0x152   :  { %1678 = vmatprep.subr.bf16.mxu0 %v5605_v21  ;;  %1878 = vmatpush1.bf16.msra.mxu1 %v6298_v41 }
 0x153   :  { %1879 = vmatprep.subr.bf16.mxu1 %v5929_v0 }
 0x155   :  { %1679 = vmatpush1.bf16.msra.mxu0 %v5603_v56  ;;  %v6445_v56 = vld [vmem:[%s7572_s4 + $0x118] sm:$0xff]  }
 0x156   :  { %2000 = vmatprep.subr.bf16.mxu0 %v5929_v0  ;;  %1880 = vmatpush1.bf16.msra.mxu1 %v6305_v42 }
 0x157   :  { %1881 = vmatprep.subr.bf16.mxu1 %v5929_v0 }
 0x158   :  { %1685 = vmatmul.mubr.bf16.vlgmr.msra.gmra.mrb[20].mxu0 %v6175_v34  ;;  %v6255_v34 = vld [vmem:[%s7572_s4 + $0xc0] sm:$0xff]  }
 0x159   :  { %2001 = vmatpush1.bf16.msra.mxu0 %v6184_v22 }
 0x15a   :  { %2002 = vmatprep.subr.bf16.mxu0 %v5929_v0  ;;  %1882 = vmatpush1.bf16.msra.mxu1 %v6312_v43 }
 0x15b   :  { %1883 = vmatprep.subr.bf16.mxu1 %v5929_v0 }
 0x15d   :  { %2003 = vmatpush1.bf16.msra.mxu0 %v6192_v24 }
 0x15e   :  { %2004 = vmatprep.subr.bf16.mxu0 %v5929_v0  ;;  %1884 = vmatpush1.bf16.msra.mxu1 %v6319_v44 }
 0x15f   :  { %1885 = vmatprep.subr.bf16.mxu1 %v5929_v0 }
 0x161   :  { %2005 = vmatpush1.bf16.msra.mxu0 %v6199_v25 }
 0x162   :  { %2006 = vmatprep.subr.bf16.mxu0 %v5929_v0  ;;  %1886 = vmatpush1.bf16.msra.mxu1 %v6326_v45 }
 0x163   :  { %1887 = vmatprep.subr.bf16.mxu1 %v5929_v0 }
 0x165   :  { %2007 = vmatpush1.bf16.msra.mxu0 %v6206_v27 }
 0x166   :  { %2008 = vmatprep.subr.bf16.mxu0 %v5929_v0  ;;  %1888 = vmatpush1.bf16.msra.mxu1 %v6333_v46 }
 0x167   :  { %1889 = vmatprep.subr.bf16.mxu1 %v5929_v0 }
 0x169   :  { %2009 = vmatpush1.bf16.msra.mxu0 %v6213_v28 }
 0x16a   :  { %2010 = vmatprep.subr.bf16.mxu0 %v5929_v0  ;;  %1890 = vmatpush1.bf16.msra.mxu1 %v6340_v47 }
 0x16b   :  { %1891 = vmatprep.subr.bf16.mxu1 %v5929_v0 }
 0x16d   :  { %2011 = vmatpush1.bf16.msra.mxu0 %v6220_v29 }
 0x16e   :  { %2012 = vmatprep.subr.bf16.mxu0 %v5929_v0  ;;  %1892 = vmatpush1.bf16.msra.mxu1 %v6347_v48 }
 0x16f   :  { %1893 = vmatprep.subr.bf16.mxu1 %v5929_v0 }
 0x171   :  { %2013 = vmatpush1.bf16.msra.mxu0 %v6227_v30 }
 0x172   :  { %2014 = vmatprep.subr.bf16.mxu0 %v5929_v0  ;;  %1894 = vmatpush1.bf16.msra.mxu1 %v6354_v49 }
 0x173   :  { %1895 = vmatprep.subr.bf16.mxu1 %v5929_v0 }
 0x175   :  { %2015 = vmatpush1.bf16.msra.mxu0 %v6234_v31 }
 0x176   :  { %2016 = vmatprep.subr.bf16.mxu0 %v5929_v0  ;;  %1896 = vmatpush1.bf16.msra.mxu1 %v6361_v50 }
 0x177   :  { %1897 = vmatprep.subr.bf16.mxu1 %v5929_v0 }
 0x179   :  { %2017 = vmatpush1.bf16.msra.mxu0 %v6241_v32 }
 0x17a   :  { %2018 = vmatprep.subr.bf16.mxu0 %v5929_v0  ;;  %1898 = vmatpush1.bf16.msra.mxu1 %v6368_v51 }
 0x17b   :  { %1899 = vmatprep.subr.bf16.mxu1 %v5929_v0 }
 0x17d   :  { %2019 = vmatpush1.bf16.msra.mxu0 %v6248_v33 }
 0x17e   :  { %2020 = vmatprep.subr.bf16.mxu0 %v5929_v0  ;;  %1900 = vmatpush1.bf16.msra.mxu1 %v6375_v52 }
 0x17f   :  { %2199 = vmatprep.subr.bf16.mxu1 %v5929_v0 }
 0x181   :  { %2021 = vmatpush1.bf16.msra.mxu0 %v6255_v34 }
 0x182   :  { %2022 = vmatprep.subr.bf16.mxu0 %v5929_v0 }
 0x185   :  { %2023 = vmatpush1.bf16.msra.mxu0 %v6262_v35 }
 0x186   :  { %2024 = vmatprep.subr.bf16.mxu0 %v5929_v0 }
 0x189   :  { %2025 = vmatpush1.bf16.msra.mxu0 %v6269_v36 }
 0x18a   :  { %2026 = vmatprep.subr.bf16.mxu0 %v5929_v0 }
 0x18d   :  { %2027 = vmatpush1.bf16.msra.mxu0 %v6282_v38 }
 0x18e   :  { %2323 = vmatprep.subr.bf16.mxu0 %v5929_v0 }
 0x1e4   :  { %v1046_v53 = vpop.f32.mrb[12].mxu1 }
 0x1e5   :  { %v1048_v54 = vpop.f32.mrb[13].mxu1 }
 0x1e6   :  { %v1050_v55 = vpop.f32.mrb[14].mxu1 }
 0x1e7   :  { %v1051_v57 = vpop.f32.mrb[15].mxu1  ;;  %v6459_v55 = vld [vmem:[%s7572_s4 + $0x128] sm:$0xff]  }
 0x1f3   :  { %v1245_v60 = vpop.f32.mrb[16].mxu0 }
 0x1f4   :  { %v1246_v62 = vadd.f32 %v1245_v60, %v1046_v53  ;;  %v1247_v63 = vpop.f32.mrb[17].mxu0 }
 0x1f5   :  { %v1248_v1 = vadd.f32 %v1247_v63, %v1048_v54  ;;  %v1249_v2 = vpop.f32.mrb[18].mxu0  ;;  %v6452_v54 = vld [vmem:[%s7572_s4 + $0x120] sm:$0xff]  }
 0x1f6   :  { %v1264_v3 = vadd.f32 %v1257_v59, %v1246_v62  ;;  %v1250_v4 = vpop.f32.mrb[19].mxu0 }
 0x1f7   :  { %v1265_v5 = vadd.f32 %v1261_v61, %v1248_v1 }
 0x1f8   :  { %v1695_v6 = vmax.f32 %v1264_v3, 0.0 }
 0x1f9   :  { %v1696_v7 = vmax.f32 %v1265_v5, 0.0  ;;  %v6473_v5 = vld [vmem:[%s7572_s4 + $0x138] sm:$0xff]  }
 0x1fa   :  { %1697 = vst [vmem:[#allocation3] sm:$0x7f] %v1695_v6 }
 0x1fb   :  { %1699 = vst.msk [vmem:[#allocation3 + $0x8] sm:$0x7f] %vm1698_vm5, %v1696_v7 }
 0x201   :  { %v1711_v8 = vld [vmem:[#allocation3] sm:$0x7f] }
 0x202   :  { %v1712_v9 = vld [vmem:[#allocation3 + $0x8] sm:$0x7f]  ;;  %v6392_v12 = vpack.c.bf16 %v1711_v8, %v1711_v8 }
 0x203   :  { %v6385_v10 = vpack.c.bf16 %v1712_v9, %v1712_v9 }
 0x205   :  { %5056 = vmatprep.mubr.msk.bf16.mxu0 %vm43_vm2, %v6385_v10 }
 0x206   :  { %2033 = vmatmul.mubr.bf16.vlgmr.msra.gmra.mrb[24].mxu0 %v6392_v12 }
 0x207   :  { %2324 = vmatpush1.bf16.msra.mxu0 %v6390_v11  ;;  %5114 = vmatprep.mubr.msk.bf16.mxu0 %vm43_vm2, %v6385_v10 }
 0x208   :  { %2325 = vmatprep.subr.bf16.mxu0 %v5929_v0 }
 0x20b   :  { %2326 = vmatpush1.bf16.msra.mxu0 %v6403_v13 }
 0x20c   :  { %2327 = vmatprep.subr.bf16.mxu0 %v5929_v0 }
 0x20f   :  { %2328 = vmatpush1.bf16.msra.mxu0 %v6410_v14 }
 0x210   :  { %2329 = vmatprep.subr.bf16.mxu0 %v5929_v0 }
 0x213   :  { %2330 = vmatpush1.bf16.msra.mxu0 %v6417_v15 }
 0x214   :  { %2331 = vmatprep.subr.bf16.mxu0 %v5929_v0 }
 0x217   :  { %2332 = vmatpush1.bf16.msra.mxu0 %v6424_v16 }
 0x218   :  { %2333 = vmatprep.subr.bf16.mxu0 %v5929_v0 }
 0x21b   :  { %2334 = vmatpush1.bf16.msra.mxu0 %v6431_v17 }
 0x21c   :  { %2335 = vmatprep.subr.bf16.mxu0 %v5929_v0  ;;  %v1505_v19 = vpop.f32.mrb[16].mxu1 }
 0x21d   :  { %v1507_v20 = vpop.f32.mrb[17].mxu1 }
 0x21e   :  { %v1509_v21 = vpop.f32.mrb[18].mxu1 }
 0x21f   :  { %2336 = vmatpush1.bf16.msra.mxu0 %v6438_v18  ;;  %v1510_v53 = vpop.f32.mrb[19].mxu1 }
 0x220   :  { %2337 = vmatprep.subr.bf16.mxu0 %v5929_v0 }
 0x223   :  { %2338 = vmatpush1.bf16.msra.mxu0 %v6445_v56 }
 0x224   :  { %2339 = vmatprep.subr.bf16.mxu0 %v5929_v0 }
 0x227   :  { %2340 = vmatpush1.bf16.msra.mxu0 %v6452_v54 }
 0x228   :  { %2341 = vmatprep.subr.bf16.mxu0 %v5929_v0 }
 0x22b   :  { %v1686_v57 = vpop.f32.mrb[20].mxu0  ;;  %2342 = vmatpush1.bf16.msra.mxu0 %v6459_v55 }
 0x22c   :  { %v1687_v60 = vadd.f32 %v1686_v57, %v1505_v19  ;;  %v1688_v62 = vpop.f32.mrb[21].mxu0  ;;  %2343 = vmatprep.subr.bf16.mxu0 %v5929_v0  ;;  %v6496_v57 = vld [vmem:[%s7572_s4] sm:$0xff]  }
 0x22d   :  { %v1689_v63 = vadd.f32 %v1688_v62, %v1507_v20  ;;  %v1690_v1 = vpop.f32.mrb[22].mxu0 }
 0x22e   :  { %v1693_v2 = vadd.f32 %v1687_v60, %v1257_v59  ;;  %v1691_v3 = vpop.f32.mrb[23].mxu0  ;;  %v6480_v59 = vld [vmem:[%s7572_s4 + $0x140] sm:$0xff]   ;;  %v6506_v1 = vld [vmem:[%s7572_s4 + $0x8] sm:$0xff]  }
 0x22f   :  { %v1694_v4 = vadd.f32 %v1689_v63, %v1261_v61  ;;  %2344 = vmatpush1.bf16.msra.mxu0 %v6466_v58  ;;  %v6488_v61 = vld [vmem:[%s7572_s4 + $0x148] sm:$0xff]  }
 0x230   :  { %v1700_v6 = vmax.f32 %v1693_v2, 0.0  ;;  %2345 = vmatprep.subr.bf16.mxu0 %v5929_v0 }
 0x231   :  { %v1701_v7 = vmax.f32 %v1694_v4, 0.0 }
 0x232   :  { %v1704_v8 = vrot.slane %v1700_v6, 7 }
 0x233   :  { %v1705_v9 = vrot.slane %v1701_v7, 7  ;;  %2346 = vmatpush1.bf16.msra.mxu0 %v6473_v5 }
 0x234   :  { %1708 = vst [vmem:[#allocation4] sm:$0xfe] %v1704_v8  ;;  %2347 = vmatprep.subr.bf16.mxu0 %v5929_v0 }
 0x235   :  { %1710 = vst.msk [vmem:[#allocation4 + $0x8] sm:$0xfe] %vm1709_vm6, %v1705_v9 }
 0x237   :  { %2348 = vmatpush1.bf16.msra.mxu0 %v6480_v59 }
 0x238   :  { %2349 = vmatprep.subr.bf16.mxu0 %v5929_v0 }
 0x23b   :  { %2350 = vmatpush1.bf16.msra.mxu0 %v6488_v61  ;;  %v1723_v19 = vld [vmem:[#allocation4] sm:$0x7f] }
 0x23c   :  { %2403 = vmatprep.subr.bf16.mxu0 %v5929_v0  ;;  %v1724_v20 = vld [vmem:[#allocation4 + $0x8] sm:$0x7f]  ;;  %v1725_v62 = vpack.c.bf16 %v1723_v19, %v1723_v19  ;;  %v1719_v6 = vld [vmem:[#allocation4] sm:$0xfe] }
 0x23d   :  { %v1720_v21 = vld [vmem:[#allocation4 + $0x8] sm:$0xfe]  ;;  %v1726_v53 = vpack.c.bf16 %v1724_v20, %v1724_v20  ;;  %v1721_v7 = vpack.c.bf16 %v1719_v6, %v1719_v6 }
 0x23e   :  { %v1722_v60 = vpack.c.bf16 %v1720_v21, %v1720_v21  ;;  %2356 = vmatmul.mubr.bf16.vlgmr.msra.gmra.mrb[28].mxu0 %v6392_v12  ;;  %v5694_v21 = vld [vmem:[#allocation6 + $0x184] ss:$8 sps:$4 sm:$0xff]  }
 0x23f   :  { %5041 = vmatprep.mubr.msk.bf16.mxu1 %vm43_vm2, %v1726_v53  ;;  %2404 = vmatpush1.bf16.msra.mxu0 %v6184_v22  ;;  %v6519_v22 = vld [vmem:[%s7572_s4 + $0x10] sm:$0xff]   ;;  %v2100_v8 = vshll.u32 %v1721_v7, 16  ;;  %v2098_v19 = vshrl.u32 %v1721_v7, 16  ;;  %v5692_v53 = vld [vmem:[#allocation6 + $0x180] ss:$8 sps:$4 sm:$0xff]  }
 0x240   :  { %v2107_v63 = vshll.u32 %v1722_v60, 16  ;;  %1906 = vmatmul.mubr.bf16.vlgmr.msra.gmra.mrb[20].mxu1 %v1725_v62  ;;  %2405 = vmatprep.subr.bf16.mxu0 %v5929_v0  ;;  %v2105_v2 = vshrl.u32 %v1722_v60, 16  ;;  %v2804_v60 = vld [vmem:[#allocation2 + $0x20] sm:$0xfe]  ;;  %v5695_v62 = vld [vmem:[#allocation6 + $0x190] ss:$8 sps:$4 sm:$0xff]  }
 0x241   :  { %2200 = vmatpush1.bf16.msra.mxu1 %v6496_v57  ;;  %v2102_v9 = vrot.slane %v2100_v8, 1  ;;  %v5706_v6 = vld [vmem:[#allocation6 + $0x1c4] ss:$8 sps:$4 sm:$0xff]  }
 0x242   :  { %v2109_v3 = vrot.slane %v2107_v63, 1  ;;  %2201 = vmatprep.subr.bf16.mxu1 %v5929_v0  ;;  %v1715_v63 = vld [vmem:[#allocation3] sm:$0xfe] }
 0x243   :  { %2406 = vmatpush1.bf16.msra.mxu0 %v6192_v24  ;;  %v6530_v24 = vld [vmem:[%s7572_s4 + $0x18] sm:$0xff]   ;;  %v6624_v20 = vor.u32 %v2102_v9, %v2098_v19  ;;  %v5709_v9 = vld [vmem:[#allocation6 + $0x2a4] ss:$8 sps:$4 sm:$0xff]   ;;  %v5704_v19 = vld [vmem:[#allocation6 + $0x1c0] ss:$8 sps:$4 sm:$0xff]  }
 0x244   :  { %v6510_v4 = vor.u32 %v2109_v3, %v2105_v2  ;;  %2407 = vmatprep.subr.bf16.mxu0 %v5929_v0  ;;  %v2806_v2 = vpack.c.bf16 %v2804_v60, %v2804_v60  ;;  %v5763_v60 = vld [vmem:[#allocation6 + $0x334] ss:$8 sps:$4 sm:$0xff]  }
 0x245   :  { %2202 = vmatpush1.bf16.msra.mxu1 %v6506_v1 }
 0x246   :  { %5099 = vmatprep.mubr.msk.bf16.mxu1 %vm43_vm2, %v6510_v4  ;;  %5116 = vmatprep.mubr.msk.bf16.mxu0 %vm43_vm2, %v6510_v4  ;;  %v3059_v7 = vshrl.u32 %v2806_v2, 16 }
 0x247   :  { %2203 = vmatprep.subr.bf16.mxu1 %v5929_v0  ;;  %2408 = vmatpush1.bf16.msra.mxu0 %v6199_v25  ;;  %v6539_v25 = vld [vmem:[%s7572_s4 + $0x20] sm:$0xff]  }
 0x248   :  { %2409 = vmatprep.subr.bf16.mxu0 %v5929_v0 }
 0x249   :  { %2204 = vmatpush1.bf16.msra.mxu1 %v6519_v22 }
 0x24a   :  { %2205 = vmatprep.subr.bf16.mxu1 %v5929_v0 }
 0x24b   :  { %2410 = vmatpush1.bf16.msra.mxu0 %v6206_v27  ;;  %v6548_v27 = vld [vmem:[%s7572_s4 + $0x28] sm:$0xff]  }
 0x24c   :  { %2411 = vmatprep.subr.bf16.mxu0 %v5929_v0 }
 0x24d   :  { %2206 = vmatpush1.bf16.msra.mxu1 %v6530_v24 }
 0x24e   :  { %2207 = vmatprep.subr.bf16.mxu1 %v5929_v0 }
 0x24f   :  { %2412 = vmatpush1.bf16.msra.mxu0 %v6213_v28  ;;  %v6557_v28 = vld [vmem:[%s7572_s4 + $0x30] sm:$0xff]  }
 0x250   :  { %2413 = vmatprep.subr.bf16.mxu0 %v5929_v0 }
 0x251   :  { %2208 = vmatpush1.bf16.msra.mxu1 %v6539_v25 }
 0x252   :  { %2209 = vmatprep.subr.bf16.mxu1 %v5929_v0 }
 0x253   :  { %2414 = vmatpush1.bf16.msra.mxu0 %v6220_v29  ;;  %v6566_v29 = vld [vmem:[%s7572_s4 + $0x38] sm:$0xff]  }
 0x254   :  { %2415 = vmatprep.subr.bf16.mxu0 %v5929_v0 }
 0x255   :  { %2210 = vmatpush1.bf16.msra.mxu1 %v6548_v27 }
 0x256   :  { %2211 = vmatprep.subr.bf16.mxu1 %v5929_v0 }
 0x257   :  { %2416 = vmatpush1.bf16.msra.mxu0 %v6227_v30  ;;  %v6575_v30 = vld [vmem:[%s7572_s4 + $0x40] sm:$0xff]  }
 0x258   :  { %2417 = vmatprep.subr.bf16.mxu0 %v5929_v0 }
 0x259   :  { %2212 = vmatpush1.bf16.msra.mxu1 %v6557_v28 }
 0x25a   :  { %2213 = vmatprep.subr.bf16.mxu1 %v5929_v0 }
 0x25b   :  { %2418 = vmatpush1.bf16.msra.mxu0 %v6234_v31  ;;  %v6584_v31 = vld [vmem:[%s7572_s4 + $0x48] sm:$0xff]  }
 0x25c   :  { %2419 = vmatprep.subr.bf16.mxu0 %v5929_v0 }
 0x25d   :  { %2214 = vmatpush1.bf16.msra.mxu1 %v6566_v29 }
 0x25e   :  { %2215 = vmatprep.subr.bf16.mxu1 %v5929_v0 }
 0x25f   :  { %2420 = vmatpush1.bf16.msra.mxu0 %v6241_v32  ;;  %v6593_v32 = vld [vmem:[%s7572_s4 + $0x50] sm:$0xff]  }
 0x260   :  { %2421 = vmatprep.subr.bf16.mxu0 %v5929_v0 }
 0x261   :  { %2216 = vmatpush1.bf16.msra.mxu1 %v6575_v30 }
 0x262   :  { %2217 = vmatprep.subr.bf16.mxu1 %v5929_v0 }
 0x263   :  { %2422 = vmatpush1.bf16.msra.mxu0 %v6248_v33  ;;  %v6602_v33 = vld [vmem:[%s7572_s4 + $0x58] sm:$0xff]  }
 0x264   :  { %2423 = vmatprep.subr.bf16.mxu0 %v5929_v0 }
 0x265   :  { %2218 = vmatpush1.bf16.msra.mxu1 %v6584_v31 }
 0x266   :  { %2219 = vmatprep.subr.bf16.mxu1 %v5929_v0 }
 0x267   :  { %2424 = vmatpush1.bf16.msra.mxu0 %v6255_v34  ;;  %v6611_v34 = vld [vmem:[%s7572_s4 + $0x60] sm:$0xff]  }
 0x268   :  { %2425 = vmatprep.subr.bf16.mxu0 %v5929_v0 }
 0x269   :  { %2220 = vmatpush1.bf16.msra.mxu1 %v6593_v32 }
 0x26a   :  { %2221 = vmatprep.subr.bf16.mxu1 %v5929_v0 }
 0x26b   :  { %2426 = vmatpush1.bf16.msra.mxu0 %v6262_v35  ;;  %v6620_v35 = vld [vmem:[%s7572_s4 + $0x68] sm:$0xff]  }
 0x26c   :  { %2427 = vmatprep.subr.bf16.mxu0 %v5929_v0 }
 0x26d   :  { %2222 = vmatpush1.bf16.msra.mxu1 %v6602_v33 }
 0x26e   :  { %2223 = vmatprep.subr.bf16.mxu1 %v5929_v0 }
 0x26f   :  { %2428 = vmatpush1.bf16.msra.mxu0 %v6269_v36  ;;  %v2805_v36 = vld [vmem:[#allocation2 + $0x28] sm:$0xfe] }
 0x270   :  { %2429 = vmatprep.subr.bf16.mxu0 %v5929_v0 }
 0x271   :  { %2224 = vmatpush1.bf16.msra.mxu1 %v6611_v34 }
 0x272   :  { %2225 = vmatprep.subr.bf16.mxu1 %v5929_v0 }
 0x273   :  { %2430 = vmatpush1.bf16.msra.mxu0 %v6282_v38  ;;  %v2807_v38 = vpack.c.bf16 %v2805_v36, %v2805_v36  ;;  %v2809_v36 = vld [vmem:[#allocation2 + $0x28] sm:$0x7f] }
 0x274   :  { %2501 = vmatprep.subr.bf16.mxu0 %v5929_v0 }
 0x275   :  { %2226 = vmatpush1.bf16.msra.mxu1 %v6620_v35 }
 0x276   :  { %2436 = vmatmul.mubr.bf16.vlgmr.msra.gmra.mrb[32].mxu0 %v6624_v20  ;;  %2363 = vmatprep.subr.bf16.mxu1 %v5929_v0 }
 0x277   :  { %2502 = vmatpush1.bf16.msra.mxu0 %v6390_v11  ;;  %5118 = vmatprep.mubr.msk.bf16.mxu0 %vm43_vm2, %v6510_v4  ;;  %v5670_v11 = vld [vmem:[#allocation6 + $0x104] ss:$8 sps:$4 sm:$0xff]  }
 0x278   :  { %2232 = vmatmul.mubr.bf16.vlgmr.msra.gmra.mrb[24].mxu1 %v6624_v20  ;;  %2503 = vmatprep.subr.bf16.mxu0 %v5929_v0 }
 0x279   :  { %2364 = vmatpush1.bf16.msra.mxu1 %v6275_v37  ;;  %5115 = vmatprep.mubr.msk.bf16.mxu1 %vm43_vm2, %v6385_v10  ;;  %v1716_v37 = vld [vmem:[#allocation3 + $0x8] sm:$0xfe]  ;;  %v5665_v10 = vld [vmem:[#allocation6 + $0xf0] ss:$8 sps:$4 sm:$0xff]  }
 0x27a   :  { %2365 = vmatprep.subr.bf16.mxu1 %v5929_v0 }
 0x27b   :  { %2504 = vmatpush1.bf16.msra.mxu0 %v6403_v13  ;;  %v5673_v13 = vld [vmem:[#allocation6 + $0x114] ss:$8 sps:$4 sm:$0xff]  }
 0x27c   :  { %2505 = vmatprep.subr.bf16.mxu0 %v5929_v0 }
 0x27d   :  { %2366 = vmatpush1.bf16.msra.mxu1 %v6289_v39  ;;  %v1718_v39 = vpack.c.bf16 %v1716_v37, %v1716_v37  ;;  %v5712_v37 = vld [vmem:[#allocation6 + $0x1d4] ss:$8 sps:$4 sm:$0xff]  }
 0x27e   :  { %2367 = vmatprep.subr.bf16.mxu1 %v5929_v0 }
 0x27f   :  { %2506 = vmatpush1.bf16.msra.mxu0 %v6410_v14  ;;  %v5671_v14 = vld [vmem:[#allocation6 + $0x110] ss:$8 sps:$4 sm:$0xff]  }
 0x280   :  { %2507 = vmatprep.subr.bf16.mxu0 %v5929_v0 }
 0x281   :  { %2368 = vmatpush1.bf16.msra.mxu1 %v6298_v41  ;;  %v3068_v41 = vshll.u32 %v2807_v38, 16 }
 0x282   :  { %2369 = vmatprep.subr.bf16.mxu1 %v5929_v0 }
 0x283   :  { %2508 = vmatpush1.bf16.msra.mxu0 %v6417_v15  ;;  %v5674_v15 = vld [vmem:[#allocation6 + $0x120] ss:$8 sps:$4 sm:$0xff]  }
 0x284   :  { %2509 = vmatprep.subr.bf16.mxu0 %v5929_v0 }
 0x285   :  { %2370 = vmatpush1.bf16.msra.mxu1 %v6305_v42  ;;  %v2453_v42 = vshll.u32 %v1718_v39, 16 }
 0x286   :  { %2371 = vmatprep.subr.bf16.mxu1 %v5929_v0 }
 0x287   :  { %2510 = vmatpush1.bf16.msra.mxu0 %v6424_v16  ;;  %v5679_v16 = vld [vmem:[#allocation6 + $0x134] ss:$8 sps:$4 sm:$0xff]  }
 0x288   :  { %2511 = vmatprep.subr.bf16.mxu0 %v5929_v0 }
 0x289   :  { %2372 = vmatpush1.bf16.msra.mxu1 %v6312_v43  ;;  %v5664_v43 = vld [vmem:[#allocation6 + $0xe4] ss:$8 sps:$4 sm:$0xff]  }
 0x28a   :  { %2373 = vmatprep.subr.bf16.mxu1 %v5929_v0 }
 0x28b   :  { %2512 = vmatpush1.bf16.msra.mxu0 %v6431_v17  ;;  %v5677_v17 = vld [vmem:[#allocation6 + $0x130] ss:$8 sps:$4 sm:$0xff]  }
 0x28c   :  { %2513 = vmatprep.subr.bf16.mxu0 %v5929_v0 }
 0x28d   :  { %2374 = vmatpush1.bf16.msra.mxu1 %v6319_v44  ;;  %v3070_v44 = vrot.slane %v3068_v41, 1  ;;  %v2811_v41 = vpack.c.bf16 %v2809_v36, %v2809_v36 }
 0x28e   :  { %2375 = vmatprep.subr.bf16.mxu1 %v5929_v0 }
 0x28f   :  { %2514 = vmatpush1.bf16.msra.mxu0 %v6438_v18  ;;  %v5682_v18 = vld [vmem:[#allocation6 + $0x144] ss:$8 sps:$4 sm:$0xff]  }
 0x290   :  { %2515 = vmatprep.subr.bf16.mxu0 %v5929_v0 }
 0x291   :  { %2376 = vmatpush1.bf16.msra.mxu1 %v6326_v45  ;;  %v5662_v45 = vld [vmem:[#allocation6 + $0xe0] ss:$8 sps:$4 sm:$0xff]  }
 0x292   :  { %2377 = vmatprep.subr.bf16.mxu1 %v5929_v0 }
 0x293   :  { %2516 = vmatpush1.bf16.msra.mxu0 %v6445_v56  ;;  %v5680_v56 = vld [vmem:[#allocation6 + $0x140] ss:$8 sps:$4 sm:$0xff]  }
 0x294   :  { %2517 = vmatprep.subr.bf16.mxu0 %v5929_v0 }
 0x295   :  { %2378 = vmatpush1.bf16.msra.mxu1 %v6333_v46  ;;  %v3066_v46 = vshrl.u32 %v2807_v38, 16  ;;  %v5707_v38 = vld [vmem:[#allocation6 + $0x2a0] ss:$8 sps:$4 sm:$0xff]  }
 0x296   :  { %2379 = vmatprep.subr.bf16.mxu1 %v5929_v0 }
 0x297   :  { %2518 = vmatpush1.bf16.msra.mxu0 %v6452_v54  ;;  %v5685_v54 = vld [vmem:[#allocation6 + $0x154] ss:$8 sps:$4 sm:$0xff]  }
 0x298   :  { %2519 = vmatprep.subr.bf16.mxu0 %v5929_v0 }
 0x299   :  { %2380 = vmatpush1.bf16.msra.mxu1 %v6340_v47  ;;  %v2455_v47 = vrot.slane %v2453_v42, 1  ;;  %v5710_v42 = vld [vmem:[#allocation6 + $0x1d0] ss:$8 sps:$4 sm:$0xff]  }
 0x29a   :  { %2381 = vmatprep.subr.bf16.mxu1 %v5929_v0 }
 0x29b   :  { %2520 = vmatpush1.bf16.msra.mxu0 %v6459_v55  ;;  %v5683_v55 = vld [vmem:[#allocation6 + $0x150] ss:$8 sps:$4 sm:$0xff]  }
 0x29c   :  { %2521 = vmatprep.subr.bf16.mxu0 %v5929_v0 }
 0x29d   :  { %2382 = vmatpush1.bf16.msra.mxu1 %v6347_v48  ;;  %v5667_v48 = vld [vmem:[#allocation6 + $0xf4] ss:$8 sps:$4 sm:$0xff]  }
 0x29e   :  { %2383 = vmatprep.subr.bf16.mxu1 %v5929_v0 }
 0x29f   :  { %2522 = vmatpush1.bf16.msra.mxu0 %v6466_v58  ;;  %v5688_v58 = vld [vmem:[#allocation6 + $0x164] ss:$8 sps:$4 sm:$0xff]  }
 0x2a0   :  { %2523 = vmatprep.subr.bf16.mxu0 %v5929_v0 }
 0x2a1   :  { %2384 = vmatpush1.bf16.msra.mxu1 %v6354_v49  ;;  %v6689_v49 = vor.u32 %v3070_v44, %v3066_v46  ;;  %v5713_v44 = vld [vmem:[#allocation6 + $0x2b0] ss:$8 sps:$4 sm:$0xff]   ;;  %v5724_v46 = vld [vmem:[#allocation6 + $0x1f4] ss:$8 sps:$4 sm:$0xff]  }
 0x2a2   :  { %2385 = vmatprep.subr.bf16.mxu1 %v5929_v0 }
 0x2a3   :  { %2524 = vmatpush1.bf16.msra.mxu0 %v6473_v5  ;;  %v5686_v5 = vld [vmem:[#allocation6 + $0x160] ss:$8 sps:$4 sm:$0xff]  }
 0x2a4   :  { %2525 = vmatprep.subr.bf16.mxu0 %v5929_v0 }
 0x2a5   :  { %2386 = vmatpush1.bf16.msra.mxu1 %v6361_v50  ;;  %v2451_v50 = vshrl.u32 %v1718_v39, 16 }
 0x2a6   :  { %2387 = vmatprep.subr.bf16.mxu1 %v5929_v0 }
 0x2a7   :  { %2526 = vmatpush1.bf16.msra.mxu0 %v6480_v59  ;;  %v5691_v59 = vld [vmem:[#allocation6 + $0x174] ss:$8 sps:$4 sm:$0xff]  }
 0x2a8   :  { %2527 = vmatprep.subr.bf16.mxu0 %v5929_v0 }
 0x2a9   :  { %2388 = vmatpush1.bf16.msra.mxu1 %v6368_v51  ;;  %v2456_v51 = vor.u32 %v2455_v47, %v2451_v50  ;;  %v5719_v47 = vld [vmem:[#allocation6 + $0x2c0] ss:$8 sps:$4 sm:$0xff]   ;;  %v5730_v50 = vld [vmem:[#allocation6 + $0x204] ss:$8 sps:$4 sm:$0xff]  }
 0x2aa   :  { %2389 = vmatprep.subr.bf16.mxu1 %v5929_v0 }
 0x2ab   :  { %2528 = vmatpush1.bf16.msra.mxu0 %v6488_v61  ;;  %v5689_v61 = vld [vmem:[#allocation6 + $0x170] ss:$8 sps:$4 sm:$0xff]  }
 0x2ac   :  { %3216 = vmatprep.subr.bf16.mxu0 %v5664_v43  ;;  %v5718_v43 = vld [vmem:[#allocation6 + $0x1e4] ss:$8 sps:$4 sm:$0xff]  }
 0x2ad   :  { %2390 = vmatpush1.bf16.msra.mxu1 %v6375_v52  ;;  %v5668_v52 = vld [vmem:[#allocation6 + $0x100] ss:$8 sps:$4 sm:$0xff]  }
 0x2ae   :  { %2534 = vmatmul.mubr.bf16.vlgmr.msra.gmra.mrb[36].mxu0 %v6624_v20  ;;  %2461 = vmatprep.subr.bf16.mxu1 %v5929_v0 }
 0x2af   :  { %3217 = vmatpush1.bf16.msra.mxu0 %v5662_v45  ;;  %5176 = vmatprep.mubr.msk.bf16.mxu0 %vm43_vm2, %v6689_v49  ;;  %v5716_v45 = vld [vmem:[#allocation6 + $0x1e0] ss:$8 sps:$4 sm:$0xff]  }
 0x2b0   :  { %2396 = vmatmul.mubr.bf16.vlgmr.msra.gmra.mrb[28].mxu1 %v6392_v12  ;;  %3218 = vmatprep.subr.bf16.mxu0 %v5667_v48  ;;  %v5676_v12 = vld [vmem:[#allocation6 + $0x124] ss:$8 sps:$4 sm:$0xff]   ;;  %v5727_v48 = vld [vmem:[#allocation6 + $0x2d4] ss:$8 sps:$4 sm:$0xff]  }
 0x2b1   :  { %2462 = vmatpush1.bf16.msra.mxu1 %v6496_v57  ;;  %5117 = vmatprep.mubr.msk.bf16.mxu1 %vm43_vm2, %v2456_v51  ;;  %v5697_v57 = vld [vmem:[#allocation6 + $0x194] ss:$8 sps:$4 sm:$0xff]   ;;  %v5725_v51 = vld [vmem:[#allocation6 + $0x2d0] ss:$8 sps:$4 sm:$0xff]  }
 0x2b2   :  { %2463 = vmatprep.subr.bf16.mxu1 %v5929_v0 }
 0x2b3   :  { %3219 = vmatpush1.bf16.msra.mxu0 %v5665_v10  ;;  %v5733_v10 = vld [vmem:[#allocation6 + $0x2e4] ss:$8 sps:$4 sm:$0xff]  }
 0x2b4   :  { %3220 = vmatprep.subr.bf16.mxu0 %v5670_v11  ;;  %v5728_v11 = vld [vmem:[#allocation6 + $0x200] ss:$8 sps:$4 sm:$0xff]  }
 0x2b5   :  { %2464 = vmatpush1.bf16.msra.mxu1 %v6506_v1  ;;  %v5700_v1 = vld [vmem:[#allocation6 + $0x1a4] ss:$8 sps:$4 sm:$0xff]  }
 0x2b6   :  { %2465 = vmatprep.subr.bf16.mxu1 %v5929_v0 }
 0x2b7   :  { %3221 = vmatpush1.bf16.msra.mxu0 %v5668_v52  ;;  %v5736_v52 = vld [vmem:[#allocation6 + $0x214] ss:$8 sps:$4 sm:$0xff]  }
 0x2b8   :  { %3222 = vmatprep.subr.bf16.mxu0 %v5673_v13  ;;  %v5731_v13 = vld [vmem:[#allocation6 + $0x2e0] ss:$8 sps:$4 sm:$0xff]  }
 0x2b9   :  { %2466 = vmatpush1.bf16.msra.mxu1 %v6519_v22  ;;  %v1717_v22 = vpack.c.bf16 %v1715_v63, %v1715_v63  ;;  %v5766_v63 = vld [vmem:[#allocation6 + $0x264] ss:$8 sps:$4 sm:$0xff]  }
 0x2ba   :  { %2467 = vmatprep.subr.bf16.mxu1 %v5929_v0 }
 0x2bb   :  { %3223 = vmatpush1.bf16.msra.mxu0 %v5671_v14  ;;  %v5739_v14 = vld [vmem:[#allocation6 + $0x2f4] ss:$8 sps:$4 sm:$0xff]  }
 0x2bc   :  { %3224 = vmatprep.subr.bf16.mxu0 %v5676_v12  ;;  %v5734_v12 = vld [vmem:[#allocation6 + $0x210] ss:$8 sps:$4 sm:$0xff]  }
 0x2bd   :  { %2468 = vmatpush1.bf16.msra.mxu1 %v6530_v24 }
 0x2be   :  { %2469 = vmatprep.subr.bf16.mxu1 %v5929_v0 }
 0x2bf   :  { %3225 = vmatpush1.bf16.msra.mxu0 %v5674_v15  ;;  %v5742_v15 = vld [vmem:[#allocation6 + $0x224] ss:$8 sps:$4 sm:$0xff]  }
 0x2c0   :  { %3226 = vmatprep.subr.bf16.mxu0 %v5679_v16  ;;  %v5737_v16 = vld [vmem:[#allocation6 + $0x2f0] ss:$8 sps:$4 sm:$0xff]  }
 0x2c1   :  { %2470 = vmatpush1.bf16.msra.mxu1 %v6539_v25  ;;  %v5698_v25 = vld [vmem:[#allocation6 + $0x1a0] ss:$8 sps:$4 sm:$0xff]  }
 0x2c2   :  { %2471 = vmatprep.subr.bf16.mxu1 %v5929_v0 }
 0x2c3   :  { %3227 = vmatpush1.bf16.msra.mxu0 %v5677_v17  ;;  %v5745_v17 = vld [vmem:[#allocation6 + $0x304] ss:$8 sps:$4 sm:$0xff]  }
 0x2c4   :  { %3228 = vmatprep.subr.bf16.mxu0 %v5682_v18  ;;  %v5740_v18 = vld [vmem:[#allocation6 + $0x220] ss:$8 sps:$4 sm:$0xff]  }
 0x2c5   :  { %2472 = vmatpush1.bf16.msra.mxu1 %v6548_v27 }
 0x2c6   :  { %2473 = vmatprep.subr.bf16.mxu1 %v5929_v0 }
 0x2c7   :  { %3229 = vmatpush1.bf16.msra.mxu0 %v5680_v56  ;;  %v5748_v56 = vld [vmem:[#allocation6 + $0x234] ss:$8 sps:$4 sm:$0xff]  }
 0x2c8   :  { %3230 = vmatprep.subr.bf16.mxu0 %v5685_v54  ;;  %v5743_v54 = vld [vmem:[#allocation6 + $0x300] ss:$8 sps:$4 sm:$0xff]  }
 0x2c9   :  { %2474 = vmatpush1.bf16.msra.mxu1 %v6557_v28  ;;  %v5703_v28 = vld [vmem:[#allocation6 + $0x1b4] ss:$8 sps:$4 sm:$0xff]  }
 0x2ca   :  { %2475 = vmatprep.subr.bf16.mxu1 %v5929_v0 }
 0x2cb   :  { %3231 = vmatpush1.bf16.msra.mxu0 %v5683_v55  ;;  %v5751_v55 = vld [vmem:[#allocation6 + $0x314] ss:$8 sps:$4 sm:$0xff]  }
 0x2cc   :  { %3232 = vmatprep.subr.bf16.mxu0 %v5688_v58  ;;  %v5746_v58 = vld [vmem:[#allocation6 + $0x230] ss:$8 sps:$4 sm:$0xff]  }
 0x2cd   :  { %2476 = vmatpush1.bf16.msra.mxu1 %v6566_v29  ;;  %v3061_v29 = vshll.u32 %v2806_v2, 16  ;;  %v5769_v2 = vld [vmem:[#allocation6 + $0x344] ss:$8 sps:$4 sm:$0xff]  }
 0x2ce   :  { %2477 = vmatprep.subr.bf16.mxu1 %v5929_v0 }
 0x2cf   :  { %3233 = vmatpush1.bf16.msra.mxu0 %v5686_v5  ;;  %v5754_v5 = vld [vmem:[#allocation6 + $0x244] ss:$8 sps:$4 sm:$0xff]  }
 0x2d0   :  { %3234 = vmatprep.subr.bf16.mxu0 %v5691_v59  ;;  %v5749_v59 = vld [vmem:[#allocation6 + $0x310] ss:$8 sps:$4 sm:$0xff]  }
 0x2d1   :  { %2478 = vmatpush1.bf16.msra.mxu1 %v6575_v30  ;;  %v2446_v30 = vshll.u32 %v1717_v22, 16 }
 0x2d2   :  { %2479 = vmatprep.subr.bf16.mxu1 %v5929_v0 }
 0x2d3   :  { %3235 = vmatpush1.bf16.msra.mxu0 %v5689_v61  ;;  %v2448_v8 = vrot.slane %v2446_v30, 1  ;;  %v5757_v61 = vld [vmem:[#allocation6 + $0x324] ss:$8 sps:$4 sm:$0xff]   ;;  %v5773_v30 = vld [vmem:[#allocation6 + $0x350] ss:$8 sps:$4 sm:$0xff]  }
 0x2d4   :  { %3236 = vmatprep.subr.bf16.mxu0 %v5694_v21  ;;  %v5752_v21 = vld [vmem:[#allocation6 + $0x240] ss:$8 sps:$4 sm:$0xff]  }
 0x2d5   :  { %2480 = vmatpush1.bf16.msra.mxu1 %v6584_v31  ;;  %v5701_v31 = vld [vmem:[#allocation6 + $0x1b0] ss:$8 sps:$4 sm:$0xff]  }
 0x2d6   :  { %2481 = vmatprep.subr.bf16.mxu1 %v5929_v0 }
 0x2d7   :  { %3237 = vmatpush1.bf16.msra.mxu0 %v5692_v53  ;;  %v5760_v53 = vld [vmem:[#allocation6 + $0x254] ss:$8 sps:$4 sm:$0xff]  }
 0x2d8   :  { %3238 = vmatprep.subr.bf16.mxu0 %v5697_v57  ;;  %v5755_v57 = vld [vmem:[#allocation6 + $0x320] ss:$8 sps:$4 sm:$0xff]  }
 0x2d9   :  { %2482 = vmatpush1.bf16.msra.mxu1 %v6593_v32  ;;  %v6718_v3 = vpop.f32.mrb[24].mxu0  ;;  %v3063_v32 = vrot.slane %v3061_v29, 1 }
 0x2da   :  { %v2036_v4 = vpop.f32.mrb[25].mxu0  ;;  %2483 = vmatprep.subr.bf16.mxu1 %v5929_v0 }
 0x2db   :  { %3239 = vmatpush1.bf16.msra.mxu0 %v5695_v62  ;;  %v2037_v24 = vpop.f32.mrb[26].mxu0  ;;  %v6725_v20 = vor.u32 %v3063_v32, %v3059_v7  ;;  %v5758_v62 = vld [vmem:[#allocation6 + $0x250] ss:$8 sps:$4 sm:$0xff]   ;;  %v5764_v4 = vld [vmem:[#allocation6 + $0x260] ss:$8 sps:$4 sm:$0xff]   ;;  %v6737_v7 = vstv %s7573_s5 }
 0x2dc   :  { %v2038_v27 = vpop.f32.mrb[27].mxu0  ;;  %3240 = vmatprep.subr.bf16.mxu0 %v5700_v1  ;;  %v5761_v1 = vld [vmem:[#allocation6 + $0x330] ss:$8 sps:$4 sm:$0xff]   ;;  %v5767_v24 = vld [vmem:[#allocation6 + $0x340] ss:$8 sps:$4 sm:$0xff]  }
 0x2dd   :  { %2484 = vmatpush1.bf16.msra.mxu1 %v6602_v33  ;;  %v2444_v33 = vshrl.u32 %v1717_v22, 16  ;;  %v5772_v22 = vld [vmem:[#allocation6 + $0x274] ss:$8 sps:$4 sm:$0xff]   ;;  %v5770_v27 = vld [vmem:[#allocation6 + $0x270] ss:$8 sps:$4 sm:$0xff]  }
 0x2de   :  { %2485 = vmatprep.subr.bf16.mxu1 %v5929_v0  ;;  %v5781_v32 = vld [vmem:[#allocation6 + $0x364] ss:$8 sps:$4 sm:$0xff]  }
 0x2df   :  { %3241 = vmatpush1.bf16.msra.mxu0 %v5698_v25  ;;  %v2449_v39 = vor.u32 %v2448_v8, %v2444_v33  ;;  %v5775_v25 = vld [vmem:[#allocation6 + $0x354] ss:$8 sps:$4 sm:$0xff]  }
 0x2e0   :  { %3242 = vmatprep.subr.bf16.mxu0 %v5703_v28  ;;  %v5778_v28 = vld [vmem:[#allocation6 + $0x284] ss:$8 sps:$4 sm:$0xff]  }
 0x2e1   :  { %2486 = vmatpush1.bf16.msra.mxu1 %v6611_v34  ;;  %v5715_v34 = vld [vmem:[#allocation6 + $0x2b4] ss:$8 sps:$4 sm:$0xff]  }
 0x2e2   :  { %2487 = vmatprep.subr.bf16.mxu1 %v5929_v0 }
 0x2e3   :  { %3243 = vmatpush1.bf16.msra.mxu0 %v5701_v31 }
 0x2e4   :  { %3656 = vmatprep.subr.bf16.mxu0 %v5706_v6 }
 0x2e5   :  { %2488 = vmatpush1.bf16.msra.mxu1 %v6620_v35  ;;  %v5721_v35 = vld [vmem:[#allocation6 + $0x2c4] ss:$8 sps:$4 sm:$0xff]  }
 0x2e6   :  { %3249 = vmatmul.mubr.bf16.vlgmr.msra.gmra.mrb[40].mxu0 %v6725_v20  ;;  %3017 = vmatprep.subr.bf16.mxu1 %v5709_v9  ;;  %v5776_v9 = vld [vmem:[#allocation6 + $0x280] ss:$8 sps:$4 sm:$0xff]  }
 0x2e7   :  { %3657 = vmatpush1.bf16.msra.mxu0 %v5704_v19  ;;  %5234 = vmatprep.mubr.msk.bf16.mxu0 %vm43_vm2, %v6689_v49  ;;  %v5722_v49 = vld [vmem:[#allocation6 + $0x1f0] ss:$8 sps:$4 sm:$0xff]  }
 0x2e8   :  { %2494 = vmatmul.mubr.bf16.vlgmr.msra.gmra.mrb[32].mxu1 %v2449_v39  ;;  %3658 = vmatprep.subr.bf16.mxu0 %v5712_v37  ;;  %v5784_v37 = vld [vmem:[#allocation6 + $0x294] ss:$8 sps:$4 sm:$0xff]   ;;  %v5779_v39 = vld [vmem:[#allocation6 + $0x360] ss:$8 sps:$4 sm:$0xff]  }
 0x2e9   :  { %3018 = vmatpush1.bf16.msra.mxu1 %v5707_v38  ;;  %5147 = vmatprep.mubr.msk.bf16.mxu1 %vm43_vm2, %v2811_v41 }
 0x2ea   :  { %3019 = vmatprep.subr.bf16.mxu1 %v5715_v34 }
 0x2eb   :  { %3659 = vmatpush1.bf16.msra.mxu0 %v5710_v42  ;;  %v5787_v42 = vld [vmem:[#allocation6 + $0x374] ss:$8 sps:$4 sm:$0xff]  }
 0x2ec   :  { %3660 = vmatprep.subr.bf16.mxu0 %v5718_v43  ;;  %v5782_v43 = vld [vmem:[#allocation6 + $0x290] ss:$8 sps:$4 sm:$0xff]  }
 0x2ed   :  { %3020 = vmatpush1.bf16.msra.mxu1 %v5713_v44  ;;  %v2813_v44 = vld [vmem:[#allocation2 + $0x28] sm:$0xfc] }
 0x2ee   :  { %3021 = vmatprep.subr.bf16.mxu1 %v5721_v35  ;;  %v2815_v35 = vld [vmem:[#allocation2 + $0x38] sm:$0x1] }
 0x2ef   :  { %3661 = vmatpush1.bf16.msra.mxu0 %v5716_v45  ;;  %v5790_v45 = vld [vmem:[#allocation6 + $0x4] ss:$8 sps:$4 sm:$0xff]  }
 0x2f0   :  { %3662 = vmatprep.subr.bf16.mxu0 %v5724_v46  ;;  %v2808_v46 = vld [vmem:[#allocation2 + $0x20] sm:$0x7f] }
 0x2f1   :  { %3022 = vmatpush1.bf16.msra.mxu1 %v5719_v47  ;;  %v2817_v47 = vpack.c.bf16 %v2815_v35, %v2813_v44  ;;  %v2812_v44 = vld [vmem:[#allocation2 + $0x20] sm:$0xfc]  ;;  %v2814_v35 = vld [vmem:[#allocation2 + $0x30] sm:$0x1] }
 0x2f2   :  { %3023 = vmatprep.subr.bf16.mxu1 %v5727_v48  ;;  %v5788_v48 = vld [vmem:[#allocation6] ss:$8 sps:$4 sm:$0xff]  }
 0x2f3   :  { %3663 = vmatpush1.bf16.msra.mxu0 %v5722_v49  ;;  %v2810_v49 = vpack.c.bf16 %v2808_v46, %v2808_v46  ;;  %v6799_v46 = vld [vmem:[%s7572_s4 + $0x80] sm:$0xff]  }
 0x2f4   :  { %3664 = vmatprep.subr.bf16.mxu0 %v5730_v50  ;;  %v5793_v50 = vld [vmem:[#allocation6 + $0x14] ss:$8 sps:$4 sm:$0xff]  }
 0x2f5   :  { %3024 = vmatpush1.bf16.msra.mxu1 %v5725_v51  ;;  %v3330_v51 = vrot.slane %v2817_v47, 1 }
 0x2f6   :  { %3025 = vmatprep.subr.bf16.mxu1 %v5733_v10  ;;  %v5791_v10 = vld [vmem:[#allocation6 + $0x10] ss:$8 sps:$4 sm:$0xff]  }
 0x2f7   :  { %3665 = vmatpush1.bf16.msra.mxu0 %v5728_v11 }
 0x2f8   :  { %3666 = vmatprep.subr.bf16.mxu0 %v5736_v52  ;;  %v5796_v52 = vld [vmem:[#allocation6 + $0x24] ss:$8 sps:$4 sm:$0xff]  }
 0x2f9   :  { %3026 = vmatpush1.bf16.msra.mxu1 %v5731_v13 }
 0x2fa   :  { %3027 = vmatprep.subr.bf16.mxu1 %v5739_v14 }
 0x2fb   :  { %3667 = vmatpush1.bf16.msra.mxu0 %v5734_v12 }
 0x2fc   :  { %3668 = vmatprep.subr.bf16.mxu0 %v5742_v15 }
 0x2fd   :  { %3028 = vmatpush1.bf16.msra.mxu1 %v5737_v16  ;;  %v5794_v16 = vld [vmem:[#allocation6 + $0x20] ss:$8 sps:$4 sm:$0xff]  }
 0x2fe   :  { %3029 = vmatprep.subr.bf16.mxu1 %v5745_v17  ;;  %v5799_v17 = vld [vmem:[#allocation6 + $0x34] ss:$8 sps:$4 sm:$0xff]  }
 0x2ff   :  { %3669 = vmatpush1.bf16.msra.mxu0 %v5740_v18 }
 0x300   :  { %3670 = vmatprep.subr.bf16.mxu0 %v5748_v56 }
 0x301   :  { %3030 = vmatpush1.bf16.msra.mxu1 %v5743_v54 }
 0x302   :  { %3031 = vmatprep.subr.bf16.mxu1 %v5751_v55 }
 0x303   :  { %3671 = vmatpush1.bf16.msra.mxu0 %v5746_v58 }
 0x304   :  { %3672 = vmatprep.subr.bf16.mxu0 %v5754_v5 }
 0x305   :  { %3032 = vmatpush1.bf16.msra.mxu1 %v5749_v59 }
 0x306   :  { %3033 = vmatprep.subr.bf16.mxu1 %v5757_v61  ;;  %v5797_v61 = vld [vmem:[#allocation6 + $0x30] ss:$8 sps:$4 sm:$0xff]  }
 0x307   :  { %3673 = vmatpush1.bf16.msra.mxu0 %v5752_v21  ;;  %v5802_v21 = vld [vmem:[#allocation6 + $0x44] ss:$8 sps:$4 sm:$0xff]  }
 0x308   :  { %3674 = vmatprep.subr.bf16.mxu0 %v5760_v53  ;;  %v5800_v53 = vld [vmem:[#allocation6 + $0x40] ss:$8 sps:$4 sm:$0xff]  }
 0x309   :  { %3034 = vmatpush1.bf16.msra.mxu1 %v5755_v57  ;;  %v5805_v57 = vld [vmem:[#allocation6 + $0x54] ss:$8 sps:$4 sm:$0xff]  }
 0x30a   :  { %3035 = vmatprep.subr.bf16.mxu1 %v5763_v60  ;;  %v5803_v60 = vld [vmem:[#allocation6 + $0x50] ss:$8 sps:$4 sm:$0xff]  }
 0x30b   :  { %3675 = vmatpush1.bf16.msra.mxu0 %v5758_v62  ;;  %v5808_v62 = vld [vmem:[#allocation6 + $0x64] ss:$8 sps:$4 sm:$0xff]  }
 0x30c   :  { %3676 = vmatprep.subr.bf16.mxu0 %v5766_v63  ;;  %v5806_v63 = vld [vmem:[#allocation6 + $0x60] ss:$8 sps:$4 sm:$0xff]  }
 0x30d   :  { %3036 = vmatpush1.bf16.msra.mxu1 %v5761_v1  ;;  %v5811_v1 = vld [vmem:[#allocation6 + $0x74] ss:$8 sps:$4 sm:$0xff]  }
 0x30e   :  { %3037 = vmatprep.subr.bf16.mxu1 %v5769_v2  ;;  %v5809_v2 = vld [vmem:[#allocation6 + $0x70] ss:$8 sps:$4 sm:$0xff]  }
 0x30f   :  { %3677 = vmatpush1.bf16.msra.mxu0 %v5764_v4  ;;  %v5814_v4 = vld [vmem:[#allocation6 + $0x84] ss:$8 sps:$4 sm:$0xff]  }
 0x310   :  { %3678 = vmatprep.subr.bf16.mxu0 %v5772_v22  ;;  %v5812_v22 = vld [vmem:[#allocation6 + $0x80] ss:$8 sps:$4 sm:$0xff]  }
 0x311   :  { %3038 = vmatpush1.bf16.msra.mxu1 %v5767_v24  ;;  %v6732_v29 = vpop.f32.mrb[28].mxu0  ;;  %v5817_v24 = vld [vmem:[#allocation6 + $0x94] ss:$8 sps:$4 sm:$0xff]  }
 0x312   :  { %v2359_v31 = vpop.f32.mrb[29].mxu0  ;;  %3039 = vmatprep.subr.bf16.mxu1 %v5775_v25  ;;  %v5815_v25 = vld [vmem:[#allocation6 + $0x90] ss:$8 sps:$4 sm:$0xff]  }
 0x313   :  { %v1907_v6 = vpop.f32.mrb[20].mxu1  ;;  %v2360_v8 = vpop.f32.mrb[30].mxu0  ;;  %3679 = vmatpush1.bf16.msra.mxu0 %v5770_v27  ;;  %v5820_v27 = vld [vmem:[#allocation6 + $0xa4] ss:$8 sps:$4 sm:$0xff]  }
 0x314   :  { %v2035_v19 = vadd.f32 %v6718_v3, %v1907_v6  ;;  %v1909_v33 = vpop.f32.mrb[21].mxu1  ;;  %v2361_v36 = vpop.f32.mrb[31].mxu0  ;;  %3680 = vmatprep.subr.bf16.mxu0 %v5778_v28  ;;  %v5785_v3 = vld [vmem:[#allocation6 + $0x370] ss:$8 sps:$4 sm:$0xff]   ;;  %v5818_v28 = vld [vmem:[#allocation6 + $0xa0] ss:$8 sps:$4 sm:$0xff]  }
 0x315   :  { %3040 = vmatpush1.bf16.msra.mxu1 %v5773_v30  ;;  %v1910_v38 = vpop.f32.mrb[22].mxu1  ;;  %v5823_v30 = vld [vmem:[#allocation6 + $0xb4] ss:$8 sps:$4 sm:$0xff]   ;;  %v5826_v8 = vld [vmem:[#allocation6 + $0xc4] ss:$8 sps:$4 sm:$0xff]  }
 0x316   :  { %v2542_v34 = vadd.f32 %v6737_v7, %v2035_v19  ;;  %v1911_v41 = vpop.f32.mrb[23].mxu1  ;;  %3041 = vmatprep.subr.bf16.mxu1 %v5781_v32  ;;  %v5821_v32 = vld [vmem:[#allocation6 + $0xb0] ss:$8 sps:$4 sm:$0xff]  }
 0x317   :  { %3681 = vmatpush1.bf16.msra.mxu0 %v5776_v9  ;;  %v6784_v38 = vld [vmem:[%s7572_s4 + $0x70] sm:$0xff]  }
 0x318   :  { %5886 = vtanh.f32 %v2542_v34  ;;  %3682 = vmatprep.subr.bf16.mxu0 %v5784_v37  ;;  %v5824_v34 = vld [vmem:[#allocation6 + $0xc0] ss:$8 sps:$4 sm:$0xff]  }
 0x319   :  { %3042 = vmatpush1.bf16.msra.mxu1 %v5779_v39 }
 0x31a   :  { %3043 = vmatprep.subr.bf16.mxu1 %v5787_v42 }
 0x31b   :  { %3683 = vmatpush1.bf16.msra.mxu0 %v5782_v43  ;;  %v5829_v43 = vld [vmem:[#allocation6 + $0xd4] ss:$8 sps:$4 sm:$0xff]  }
 0x31c   :  { %4002 = vmatprep.subr.bf16.mxu0 %v5929_v0 }
 0x31d   :  { %3044 = vmatpush1.bf16.msra.mxu1 %v5785_v3  ;;  %v5827_v3 = vld [vmem:[#allocation6 + $0xd0] ss:$8 sps:$4 sm:$0xff]  }
 0x31e   :  { %3689 = vmatmul.mubr.bf16.vlgmr.msra.gmra.mrb[44].mxu0 %v6725_v20  ;;  %3475 = vmatprep.subr.bf16.mxu1 %v5790_v45  ;;  %v2816_v45 = vpack.c.bf16 %v2814_v35, %v2812_v44  ;;  %v6991_v35 = vld [vmem:[%s7572_s4 + $0x178] sm:$0xff]  }
 0x31f   :  { %4003 = vmatpush1.bf16.msra.mxu0 %v6784_v38 }
 0x320   :  { %3050 = vmatmul.mubr.bf16.vlgmr.msra.gmra.mrb[36].mxu1 %v2810_v49  ;;  %4004 = vmatprep.subr.bf16.mxu0 %v5929_v0  ;;  %v3329_v47 = vrot.slane %v2816_v45, 1  ;;  %v7005_v45 = vld [vmem:[%s7572_s4 + $0x188] sm:$0xff]  }
 0x321   :  { %3476 = vmatpush1.bf16.msra.mxu1 %v5788_v48  ;;  %5205 = vmatprep.mubr.msk.bf16.mxu1 %vm43_vm2, %v3330_v51  ;;  %v6805_v48 = vld [vmem:[%s7572_s4 + $0x88] sm:$0xff]  }
 0x322   :  { %v5887_v11 = vpop.eup %5886  ;;  %3477 = vmatprep.subr.bf16.mxu1 %v5793_v50  ;;  %v6813_v50 = vld [vmem:[%s7572_s4 + $0x90] sm:$0xff]  }
 0x323   :  { %v2545_v13 = vcombine.high %v5887_v11, %v5887_v11  ;;  %v2552_v14 = vrot.slane %v5887_v11, %v6096_v40 }
 0x325   :  { %v2559_v12 = vrot.slane %v2545_v13, %v6096_v40  ;;  %v2560_v15 = vcombine.high %v2552_v14, %v2552_v14  ;;  %v2568_v20 = vrot.slane %v2552_v14, %v6096_v40  ;;  %3478 = vmatpush1.bf16.msra.mxu1 %v5791_v10  ;;  %v6823_v14 = vld [vmem:[%s7572_s4 + $0x98] sm:$0xff]  }
 0x326   :  { %3479 = vmatprep.subr.bf16.mxu1 %v5796_v52 }
 0x327   :  { %v2561_v18 = vcombine.high %v2559_v12, %v2559_v12  ;;  %v2575_v56 = vrot.slane %v2559_v12, %v6096_v40  ;;  %v2582_v54 = vrot.slane %v2560_v15, %v6096_v40  ;;  %v2590_v55 = vcombine.high %v2568_v20, %v2568_v20  ;;  %2601 = vst.msk [vmem:[%s7575_s7] sm:$0x1] %vm2600_vm7, %v2568_v20 }
 0x329   :  { %v2589_v58 = vrot.slane %v2561_v18, %v6096_v40  ;;  %v2591_v5 = vcombine.high %v2575_v56, %v2575_v56  ;;  %v2592_v59 = vcombine.high %v2582_v54, %v2582_v54  ;;  %2602 = vst.msk [vmem:[%s7575_s7 + $0x4] sm:$0x1] %vm2600_vm7, %v2582_v54  ;;  %2603 = vst.msk [vmem:[%s7575_s7 + $0x8] sm:$0x1] %vm2600_vm7, %v2590_v55  ;;  %3480 = vmatpush1.bf16.msra.mxu1 %v5794_v16  ;;  %v6849_v54 = vld [vmem:[%s7572_s4 + $0xa0] sm:$0xff]   ;;  %v6868_v55 = vld [vmem:[%s7572_s4 + $0xa8] sm:$0xff]  }
 0x32a   :  { %2605 = vst.msk [vmem:[%s7575_s7 + $0x10] sm:$0x1] %vm2600_vm7, %v2575_v56  ;;  %3481 = vmatprep.subr.bf16.mxu1 %v5799_v17 }
 0x32b   :  { %2604 = vst.msk [vmem:[%s7575_s7 + $0xc] sm:$0x1] %vm2600_vm7, %v2592_v59  ;;  %2606 = vst.msk [vmem:[%s7575_s7 + $0x14] sm:$0x1] %vm2600_vm7, %v2589_v58  ;;  %v6875_v58 = vld [vmem:[%s7572_s4 + $0xb0] sm:$0xff]   ;;  %v6890_v59 = vld [vmem:[%s7572_s4 + $0xc0] sm:$0xff]  }
 0x32c   :  { %2607 = vst.msk [vmem:[%s7575_s7 + $0x18] sm:$0x1] %vm2600_vm7, %v2591_v5  ;;  %v6883_v5 = vld [vmem:[%s7572_s4 + $0xb8] sm:$0xff]  }
 0x32d   :  { %3482 = vmatpush1.bf16.msra.mxu1 %v5797_v61  ;;  %v6897_v61 = vld [vmem:[%s7572_s4 + $0xc8] sm:$0xff]  }
 0x32e   :  { %3483 = vmatprep.subr.bf16.mxu1 %v5802_v21  ;;  %v6904_v21 = vld [vmem:[%s7572_s4 + $0xd0] sm:$0xff]  }
 0x331   :  { %3484 = vmatpush1.bf16.msra.mxu1 %v5800_v53  ;;  %v6910_v53 = vld [vmem:[%s7572_s4 + $0xd8] sm:$0xff]  }
 0x332   :  { %3485 = vmatprep.subr.bf16.mxu1 %v5805_v57 }
 0x335   :  { %3486 = vmatpush1.bf16.msra.mxu1 %v5803_v60 }
 0x336   :  { %3487 = vmatprep.subr.bf16.mxu1 %v5808_v62 }
 0x339   :  { %3488 = vmatpush1.bf16.msra.mxu1 %v5806_v63 }
 0x33a   :  { %3489 = vmatprep.subr.bf16.mxu1 %v5811_v1 }
 0x33d   :  { %3490 = vmatpush1.bf16.msra.mxu1 %v5809_v2 }
 0x33e   :  { %3491 = vmatprep.subr.bf16.mxu1 %v5814_v4 }
 0x341   :  { %3492 = vmatpush1.bf16.msra.mxu1 %v5812_v22 }
 0x342   :  { %3493 = vmatprep.subr.bf16.mxu1 %v5817_v24 }
 0x345   :  { %3494 = vmatpush1.bf16.msra.mxu1 %v5815_v25 }
 0x346   :  { %3495 = vmatprep.subr.bf16.mxu1 %v5820_v27  ;;  %v6922_v27 = vld [vmem:[%s7572_s4 + $0x150] sm:$0xff]  }
 0x349   :  { %3496 = vmatpush1.bf16.msra.mxu1 %v5818_v28  ;;  %v6778_v31 = vpop.f32.mrb[32].mxu0  ;;  %v6929_v28 = vld [vmem:[%s7572_s4 + $0x158] sm:$0xff]  }
 0x34a   :  { %v2439_v6 = vpop.f32.mrb[33].mxu0  ;;  %3497 = vmatprep.subr.bf16.mxu1 %v5823_v30  ;;  %v6936_v30 = vld [vmem:[%s7572_s4 + $0x160] sm:$0xff]  }
 0x34b   :  { %v2233_v9 = vpop.f32.mrb[24].mxu1  ;;  %v2440_v19 = vpop.f32.mrb[34].mxu0 }
 0x34c   :  { %v2358_v33 = vadd.f32 %v6732_v29, %v2233_v9  ;;  %v2235_v36 = vpop.f32.mrb[25].mxu1  ;;  %v2441_v37 = vpop.f32.mrb[35].mxu0  ;;  %v6792_v29 = vld [vmem:[%s7572_s4 + $0x78] sm:$0xff]  }
 0x34d   :  { %v2236_v39 = vpop.f32.mrb[26].mxu1  ;;  %3498 = vmatpush1.bf16.msra.mxu1 %v5821_v32  ;;  %4005 = vmatpush1.bf16.msra.mxu0 %v6792_v29 }
 0x34e   :  { %v2608_v41 = vadd.f32 %v6737_v7, %v2358_v33  ;;  %v2237_v42 = vpop.f32.mrb[27].mxu1  ;;  %3499 = vmatprep.subr.bf16.mxu1 %v5826_v8  ;;  %4006 = vmatprep.subr.bf16.mxu0 %v5929_v0  ;;  %v6944_v8 = vld [vmem:[%s7572_s4 + $0x168] sm:$0xff]  }
 0x350   :  { %5888 = vtanh.f32 %v2608_v41  ;;  %v6959_v41 = vld [vmem:[%s7572_s4 + $0x170] sm:$0xff]  }
 0x351   :  { %3500 = vmatpush1.bf16.msra.mxu1 %v5824_v34  ;;  %4007 = vmatpush1.bf16.msra.mxu0 %v6799_v46 }
 0x352   :  { %3501 = vmatprep.subr.bf16.mxu1 %v5829_v43  ;;  %4008 = vmatprep.subr.bf16.mxu0 %v5929_v0 }
 0x355   :  { %3502 = vmatpush1.bf16.msra.mxu1 %v5827_v3  ;;  %4009 = vmatpush1.bf16.msra.mxu0 %v6805_v48  ;;  %v6998_v3 = vld [vmem:[%s7572_s4 + $0x180] sm:$0xff]  }
 0x356   :  { %3875 = vmatprep.subr.bf16.mxu1 %v5929_v0  ;;  %4010 = vmatprep.subr.bf16.mxu0 %v5929_v0 }
 0x358   :  { %3508 = vmatmul.mubr.bf16.vlgmr.msra.gmra.mrb[40].mxu1 %v3329_v47  ;;  %v7012_v47 = vld [vmem:[%s7572_s4 + $0x190] sm:$0xff]  }
 0x359   :  { %4011 = vmatpush1.bf16.msra.mxu0 %v6813_v50  ;;  %3876 = vmatpush1.bf16.msra.mxu1 %v6922_v27 }
 0x35a   :  { %v5889_v49 = vpop.eup %5888  ;;  %4012 = vmatprep.subr.bf16.mxu0 %v5929_v0  ;;  %3877 = vmatprep.subr.bf16.mxu1 %v5929_v0 }
 0x35b   :  { %v2611_v51 = vcombine.high %v5889_v49, %v5889_v49  ;;  %v2618_v10 = vrot.slane %v5889_v49, %v6096_v40  ;;  %v7019_v49 = vld [vmem:[%s7572_s4 + $0x198] sm:$0xff]  }
 0x35d   :  { %v2625_v11 = vrot.slane %v2611_v51, %v6096_v40  ;;  %v2626_v52 = vcombine.high %v2618_v10, %v2618_v10  ;;  %v2634_v13 = vrot.slane %v2618_v10, %v6096_v40  ;;  %4013 = vmatpush1.bf16.msra.mxu0 %v6823_v14  ;;  %3878 = vmatpush1.bf16.msra.mxu1 %v6929_v28  ;;  %v7026_v51 = vld [vmem:[%s7572_s4 + $0x1a0] sm:$0xff]   ;;  %v7033_v10 = vld [vmem:[%s7572_s4 + $0x1a8] sm:$0xff]  }
 0x35e   :  { %4014 = vmatprep.subr.bf16.mxu0 %v5929_v0  ;;  %3879 = vmatprep.subr.bf16.mxu1 %v5929_v0 }
 0x35f   :  { %v2627_v12 = vcombine.high %v2625_v11, %v2625_v11  ;;  %v2641_v15 = vrot.slane %v2625_v11, %v6096_v40  ;;  %v2648_v20 = vrot.slane %v2626_v52, %v6096_v40  ;;  %v2656_v16 = vcombine.high %v2634_v13, %v2634_v13  ;;  %2666 = vst.msk [vmem:[%s7575_s7 + $0x1] sm:$0x1] %vm2600_vm7, %v2634_v13  ;;  %v7040_v11 = vld [vmem:[%s7572_s4 + $0x1b0] sm:$0xff]  }
 0x361   :  { %v2655_v17 = vrot.slane %v2627_v12, %v6096_v40  ;;  %v2657_v18 = vcombine.high %v2641_v15, %v2641_v15  ;;  %v2658_v56 = vcombine.high %v2648_v20, %v2648_v20  ;;  %2667 = vst.msk [vmem:[%s7575_s7 + $0x5] sm:$0x1] %vm2600_vm7, %v2648_v20  ;;  %2668 = vst.msk [vmem:[%s7575_s7 + $0x9] sm:$0x1] %vm2600_vm7, %v2656_v16  ;;  %4015 = vmatpush1.bf16.msra.mxu0 %v6849_v54  ;;  %v7047_v20 = vld [vmem:[%s7572_s4 + $0x1b8] sm:$0xff]  }
 0x362   :  { %2670 = vst.msk [vmem:[%s7575_s7 + $0x11] sm:$0x1] %vm2600_vm7, %v2641_v15  ;;  %4016 = vmatprep.subr.bf16.mxu0 %v5929_v0  ;;  %3880 = vmatpush1.bf16.msra.mxu1 %v6936_v30 }
 0x363   :  { %2669 = vst.msk [vmem:[%s7575_s7 + $0xd] sm:$0x1] %vm2600_vm7, %v2658_v56  ;;  %2671 = vst.msk [vmem:[%s7575_s7 + $0x15] sm:$0x1] %vm2600_vm7, %v2655_v17  ;;  %3881 = vmatprep.subr.bf16.mxu1 %v5929_v0 }
 0x364   :  { %2672 = vst.msk [vmem:[%s7575_s7 + $0x19] sm:$0x1] %vm2600_vm7, %v2657_v18 }
 0x365   :  { %4017 = vmatpush1.bf16.msra.mxu0 %v6868_v55 }
 0x366   :  { %4018 = vmatprep.subr.bf16.mxu0 %v5929_v0  ;;  %3882 = vmatpush1.bf16.msra.mxu1 %v6944_v8 }
 0x367   :  { %3883 = vmatprep.subr.bf16.mxu1 %v5929_v0 }
 0x369   :  { %4019 = vmatpush1.bf16.msra.mxu0 %v6875_v58 }
 0x36a   :  { %4020 = vmatprep.subr.bf16.mxu0 %v5929_v0  ;;  %3884 = vmatpush1.bf16.msra.mxu1 %v6959_v41 }
 0x36b   :  { %3885 = vmatprep.subr.bf16.mxu1 %v5929_v0 }
 0x36d   :  { %4021 = vmatpush1.bf16.msra.mxu0 %v6883_v5 }
 0x36e   :  { %4022 = vmatprep.subr.bf16.mxu0 %v5929_v0  ;;  %3886 = vmatpush1.bf16.msra.mxu1 %v6991_v35 }
 0x36f   :  { %3887 = vmatprep.subr.bf16.mxu1 %v5929_v0 }
 0x371   :  { %4023 = vmatpush1.bf16.msra.mxu0 %v6890_v59 }
 0x372   :  { %4024 = vmatprep.subr.bf16.mxu0 %v5929_v0  ;;  %3888 = vmatpush1.bf16.msra.mxu1 %v6998_v3 }
 0x373   :  { %3889 = vmatprep.subr.bf16.mxu1 %v5929_v0 }
 0x375   :  { %4025 = vmatpush1.bf16.msra.mxu0 %v6897_v61 }
 0x376   :  { %4026 = vmatprep.subr.bf16.mxu0 %v5929_v0  ;;  %3890 = vmatpush1.bf16.msra.mxu1 %v7005_v45 }
 0x377   :  { %3891 = vmatprep.subr.bf16.mxu1 %v5929_v0 }
 0x379   :  { %4027 = vmatpush1.bf16.msra.mxu0 %v6904_v21 }
 0x37a   :  { %4028 = vmatprep.subr.bf16.mxu0 %v5929_v0  ;;  %3892 = vmatpush1.bf16.msra.mxu1 %v7012_v47 }
 0x37b   :  { %3893 = vmatprep.subr.bf16.mxu1 %v5929_v0 }
 0x37d   :  { %4029 = vmatpush1.bf16.msra.mxu0 %v6910_v53 }
 0x37e   :  { %4324 = vmatprep.subr.bf16.mxu0 %v5929_v0  ;;  %3894 = vmatpush1.bf16.msra.mxu1 %v7019_v49 }
 0x37f   :  { %3895 = vmatprep.subr.bf16.mxu1 %v5929_v0 }
 0x381   :  { %v6913_v57 = vpop.f32.mrb[36].mxu0 }
 0x382   :  { %v2537_v60 = vpop.f32.mrb[37].mxu0  ;;  %3896 = vmatpush1.bf16.msra.mxu1 %v7026_v51 }
 0x383   :  { %v2397_v62 = vpop.f32.mrb[28].mxu1  ;;  %v2538_v63 = vpop.f32.mrb[38].mxu0  ;;  %3897 = vmatprep.subr.bf16.mxu1 %v5929_v0 }
 0x384   :  { %v2438_v1 = vadd.f32 %v6778_v31, %v2397_v62  ;;  %v2399_v2 = vpop.f32.mrb[29].mxu1  ;;  %v2539_v4 = vpop.f32.mrb[39].mxu0 }
 0x385   :  { %v2400_v22 = vpop.f32.mrb[30].mxu1 }
 0x386   :  { %v2673_v24 = vadd.f32 %v6737_v7, %v2438_v1  ;;  %v2401_v25 = vpop.f32.mrb[31].mxu1  ;;  %3898 = vmatpush1.bf16.msra.mxu1 %v7033_v10 }
 0x387   :  { %3899 = vmatprep.subr.bf16.mxu1 %v5929_v0 }
 0x388   :  { %5890 = vtanh.f32 %v2673_v24 }
 0x38a   :  { %3900 = vmatpush1.bf16.msra.mxu1 %v7040_v11 }
 0x38b   :  { %3901 = vmatprep.subr.bf16.mxu1 %v5929_v0 }
 0x38e   :  { %3902 = vmatpush1.bf16.msra.mxu1 %v7047_v20 }
 0x38f   :  { %4200 = vmatprep.subr.bf16.mxu1 %v5929_v0 }
 0x392   :  { %v5891_v31 = vpop.eup %5890 }
 0x393   :  { %v2676_v32 = vcombine.high %v5891_v31, %v5891_v31  ;;  %v2683_v6 = vrot.slane %v5891_v31, %v6096_v40 }
 0x395   :  { %v2690_v9 = vrot.slane %v2676_v32, %v6096_v40  ;;  %v2691_v19 = vcombine.high %v2683_v6, %v2683_v6  ;;  %v2699_v33 = vrot.slane %v2683_v6, %v6096_v40 }
 0x397   :  { %v2692_v36 = vcombine.high %v2690_v9, %v2690_v9  ;;  %v2706_v37 = vrot.slane %v2690_v9, %v6096_v40  ;;  %v2713_v39 = vrot.slane %v2691_v19, %v6096_v40  ;;  %v2721_v34 = vcombine.high %v2699_v33, %v2699_v33  ;;  %2731 = vst.msk [vmem:[%s7575_s7 + $0x2] sm:$0x1] %vm2600_vm7, %v2699_v33  ;;  %v3257_v33 = vld [vmem:[%s7571_s3] sm:$0x3] }
 0x399   :  { %v2720_v42 = vrot.slane %v2692_v36, %v6096_v40  ;;  %v2722_v43 = vcombine.high %v2706_v37, %v2706_v37  ;;  %v2723_v44 = vcombine.high %v2713_v39, %v2713_v39  ;;  %2732 = vst.msk [vmem:[%s7575_s7 + $0x6] sm:$0x1] %vm2600_vm7, %v2713_v39  ;;  %2733 = vst.msk [vmem:[%s7575_s7 + $0xa] sm:$0x1] %vm2600_vm7, %v2721_v34 }
 0x39a   :  { %2735 = vst.msk [vmem:[%s7575_s7 + $0x12] sm:$0x1] %vm2600_vm7, %v2706_v37  ;;  %v3262_v37 = vrot.slane %v3257_v33, %v6082_v23 }
 0x39b   :  { %2734 = vst.msk [vmem:[%s7575_s7 + $0xe] sm:$0x1] %vm2600_vm7, %v2723_v44  ;;  %2736 = vst.msk [vmem:[%s7575_s7 + $0x16] sm:$0x1] %vm2600_vm7, %v2720_v42  ;;  %v3266_v42 = vrot.slane %v3257_v33, %v6084_v26  ;;  %v7098_v26 = vld [vmem:[%s7572_s4 + $0xe0] sm:$0xff]  }
 0x39c   :  { %2737 = vst.msk [vmem:[%s7575_s7 + $0x1a] sm:$0x1] %vm2600_vm7, %v2722_v43 }
 0x3b9   :  { %v3250_v52 = vpop.f32.mrb[40].mxu0 }
 0x3ba   :  { %v3252_v13 = vpop.f32.mrb[41].mxu0 }
 0x3bb   :  { %v2495_v12 = vpop.f32.mrb[32].mxu1  ;;  %v3254_v15 = vpop.f32.mrb[42].mxu0 }
 0x3bc   :  { %v2536_v16 = vadd.f32 %v6913_v57, %v2495_v12  ;;  %v2497_v17 = vpop.f32.mrb[33].mxu1  ;;  %v3255_v18 = vpop.f32.mrb[43].mxu0 }
 0x3bd   :  { %v2498_v56 = vpop.f32.mrb[34].mxu1 }
 0x3be   :  { %v2738_v60 = vadd.f32 %v6737_v7, %v2536_v16  ;;  %v2499_v62 = vpop.f32.mrb[35].mxu1 }
 0x3c0   :  { %5892 = vtanh.f32 %v2738_v60 }
 0x3ca   :  { %v5893_v63 = vpop.eup %5892 }
 0x3cb   :  { %v2741_v1 = vcombine.high %v5893_v63, %v5893_v63  ;;  %v2748_v2 = vrot.slane %v5893_v63, %v6096_v40 }
 0x3cd   :  { %v2755_v4 = vrot.slane %v2741_v1, %v6096_v40  ;;  %v2756_v22 = vcombine.high %v2748_v2, %v2748_v2  ;;  %v2764_v57 = vrot.slane %v2748_v2, %v6096_v40 }
 0x3cf   :  { %v2757_v24 = vcombine.high %v2755_v4, %v2755_v4  ;;  %v2771_v25 = vrot.slane %v2755_v4, %v6096_v40  ;;  %v2778_v31 = vrot.slane %v2756_v22, %v6096_v40  ;;  %v2786_v32 = vcombine.high %v2764_v57, %v2764_v57  ;;  %2796 = vst.msk [vmem:[%s7575_s7 + $0x3] sm:$0x1] %vm2600_vm7, %v2764_v57  ;;  %v7118_v4 = vld [vmem:[%s7572_s4 + $0xf0] sm:$0xff]   ;;  %v7125_v22 = vld [vmem:[%s7572_s4 + $0xf8] sm:$0xff]   ;;  %v7132_v57 = vld [vmem:[%s7572_s4 + $0x100] sm:$0xff]  }
 0x3d1   :  { %v2785_v6 = vrot.slane %v2757_v24, %v6096_v40  ;;  %v2787_v9 = vcombine.high %v2771_v25, %v2771_v25  ;;  %v2788_v19 = vcombine.high %v2778_v31, %v2778_v31  ;;  %2797 = vst.msk [vmem:[%s7575_s7 + $0x7] sm:$0x1] %vm2600_vm7, %v2778_v31  ;;  %2798 = vst.msk [vmem:[%s7575_s7 + $0xb] sm:$0x1] %vm2600_vm7, %v2786_v32  ;;  %v7139_v24 = vld [vmem:[%s7572_s4 + $0x108] sm:$0xff]   ;;  %v7153_v31 = vld [vmem:[%s7572_s4 + $0x118] sm:$0xff]  }
 0x3d2   :  { %2800 = vst.msk [vmem:[%s7575_s7 + $0x13] sm:$0x1] %vm2600_vm7, %v2771_v25  ;;  %v7146_v25 = vld [vmem:[%s7572_s4 + $0x110] sm:$0xff]   ;;  %v7160_v32 = vld [vmem:[%s7572_s4 + $0x120] sm:$0xff]  }
 0x3d3   :  { %2799 = vst.msk [vmem:[%s7575_s7 + $0xf] sm:$0x1] %vm2600_vm7, %v2788_v19  ;;  %2801 = vst.msk [vmem:[%s7575_s7 + $0x17] sm:$0x1] %vm2600_vm7, %v2785_v6  ;;  %v7167_v6 = vld [vmem:[%s7572_s4 + $0x128] sm:$0xff]   ;;  %v7174_v19 = vld [vmem:[%s7572_s4 + $0x130] sm:$0xff]  }
 0x3d4   :  { %2802 = vst.msk [vmem:[%s7575_s7 + $0x1b] sm:$0x1] %vm2600_vm7, %v2787_v9 }
 0x3f1   :  { %v3690_v36 = vpop.f32.mrb[44].mxu0 }
 0x3f2   :  { %v3692_v39 = vpop.f32.mrb[45].mxu0 }
 0x3f3   :  { %v3051_v34 = vpop.f32.mrb[36].mxu1  ;;  %v3694_v43 = vpop.f32.mrb[46].mxu0 }
 0x3f4   :  { %v3251_v44 = vadd.f32 %v3250_v52, %v3051_v34  ;;  %v3053_v12 = vpop.f32.mrb[37].mxu1  ;;  %v3695_v15 = vpop.f32.mrb[47].mxu0 }
 0x3f5   :  { %v3253_v16 = vadd.f32 %v3252_v13, %v3053_v12  ;;  %v3055_v17 = vpop.f32.mrb[38].mxu1  ;;  %v7111_v13 = vld [vmem:[%s7572_s4 + $0xe8] sm:$0xff]  }
 0x3f6   :  { %v3269_v18 = vadd.f32 %v3262_v37, %v3251_v44  ;;  %v3056_v56 = vpop.f32.mrb[39].mxu1  ;;  %v7181_v17 = vld [vmem:[%s7572_s4 + $0x138] sm:$0xff]  }
 0x3f7   :  { %v3270_v60 = vadd.f32 %v3266_v42, %v3253_v16 }
 0x3f8   :  { %v3699_v62 = vmax.f32 %v3269_v18, 0.0 }
 0x3f9   :  { %v3700_v63 = vmax.f32 %v3270_v60, 0.0 }
 0x3fa   :  { %3702 = vst [vmem:[#allocation3 + $0x10] sm:$0x7f] %v3699_v62 }
 0x3fb   :  { %3703 = vst.msk [vmem:[#allocation3 + $0x18] sm:$0x7f] %vm1698_vm5, %v3700_v63 }
 0x401   :  { %v3715_v1 = vld [vmem:[#allocation3 + $0x10] sm:$0x7f] }
 0x402   :  { %v3716_v23 = vld [vmem:[#allocation3 + $0x18] sm:$0x7f]  ;;  %v7100_v52 = vpack.c.bf16 %v3715_v1, %v3715_v1 }
 0x403   :  { %v7093_v2 = vpack.c.bf16 %v3716_v23, %v3716_v23  ;;  %v7204_v23 = vld [vmem:[%s7572_s4] sm:$0xff]  }
 0x405   :  { %5320 = vmatprep.mubr.msk.bf16.mxu0 %vm43_vm2, %v7093_v2 }
 0x406   :  { %4035 = vmatmul.mubr.bf16.vlgmr.msra.gmra.mrb[48].mxu0 %v7100_v52 }
 0x407   :  { %4325 = vmatpush1.bf16.msra.mxu0 %v7098_v26  ;;  %5378 = vmatprep.mubr.msk.bf16.mxu0 %vm43_vm2, %v7093_v2 }
 0x408   :  { %4326 = vmatprep.subr.bf16.mxu0 %v5929_v0 }
 0x40b   :  { %4327 = vmatpush1.bf16.msra.mxu0 %v7111_v13 }
 0x40c   :  { %4328 = vmatprep.subr.bf16.mxu0 %v5929_v0 }
 0x40f   :  { %4329 = vmatpush1.bf16.msra.mxu0 %v7118_v4 }
 0x410   :  { %4330 = vmatprep.subr.bf16.mxu0 %v5929_v0 }
 0x413   :  { %4331 = vmatpush1.bf16.msra.mxu0 %v7125_v22 }
 0x414   :  { %4332 = vmatprep.subr.bf16.mxu0 %v5929_v0 }
 0x417   :  { %4333 = vmatpush1.bf16.msra.mxu0 %v7132_v57 }
 0x418   :  { %4334 = vmatprep.subr.bf16.mxu0 %v5929_v0 }
 0x41b   :  { %4335 = vmatpush1.bf16.msra.mxu0 %v7139_v24 }
 0x41c   :  { %4336 = vmatprep.subr.bf16.mxu0 %v5929_v0 }
 0x41f   :  { %4337 = vmatpush1.bf16.msra.mxu0 %v7146_v25 }
 0x420   :  { %4338 = vmatprep.subr.bf16.mxu0 %v5929_v0 }
 0x423   :  { %4339 = vmatpush1.bf16.msra.mxu0 %v7153_v31 }
 0x424   :  { %4340 = vmatprep.subr.bf16.mxu0 %v5929_v0 }
 0x427   :  { %4341 = vmatpush1.bf16.msra.mxu0 %v7160_v32 }
 0x428   :  { %4342 = vmatprep.subr.bf16.mxu0 %v5929_v0 }
 0x42b   :  { %4343 = vmatpush1.bf16.msra.mxu0 %v7167_v6  ;;  %v3509_v9 = vpop.f32.mrb[40].mxu1 }
 0x42c   :  { %v3691_v33 = vadd.f32 %v3690_v36, %v3509_v9  ;;  %v3511_v34 = vpop.f32.mrb[41].mxu1  ;;  %4344 = vmatprep.subr.bf16.mxu0 %v5929_v0 }
 0x42d   :  { %v3693_v43 = vadd.f32 %v3692_v39, %v3511_v34  ;;  %v3513_v44 = vpop.f32.mrb[42].mxu1  ;;  %v7196_v39 = vld [vmem:[%s7572_s4 + $0x148] sm:$0xff]  }
 0x42e   :  { %v3697_v12 = vadd.f32 %v3691_v33, %v3262_v37  ;;  %v3514_v15 = vpop.f32.mrb[43].mxu1  ;;  %v7188_v37 = vld [vmem:[%s7572_s4 + $0x140] sm:$0xff]  }
 0x42f   :  { %v3698_v16 = vadd.f32 %v3693_v43, %v3266_v42  ;;  %4345 = vmatpush1.bf16.msra.mxu0 %v7174_v19  ;;  %v7214_v43 = vld [vmem:[%s7572_s4 + $0x8] sm:$0xff]   ;;  %v7227_v15 = vld [vmem:[%s7572_s4 + $0x10] sm:$0xff]  }
 0x430   :  { %v3704_v18 = vmax.f32 %v3697_v12, 0.0  ;;  %4346 = vmatprep.subr.bf16.mxu0 %v5929_v0 }
 0x431   :  { %v3705_v56 = vmax.f32 %v3698_v16, 0.0 }
 0x432   :  { %v3708_v36 = vrot.slane %v3704_v18, 7 }
 0x433   :  { %v3709_v60 = vrot.slane %v3705_v56, 7  ;;  %4347 = vmatpush1.bf16.msra.mxu0 %v7181_v17 }
 0x434   :  { %3713 = vst [vmem:[#allocation4 + $0x10] sm:$0xfe] %v3708_v36  ;;  %4348 = vmatprep.subr.bf16.mxu0 %v5929_v0 }
 0x435   :  { %3714 = vst.msk [vmem:[#allocation4 + $0x18] sm:$0xfe] %vm1709_vm6, %v3709_v60 }
 0x437   :  { %4349 = vmatpush1.bf16.msra.mxu0 %v7188_v37 }
 0x438   :  { %4350 = vmatprep.subr.bf16.mxu0 %v5929_v0 }
 0x43b   :  { %4351 = vmatpush1.bf16.msra.mxu0 %v7196_v39  ;;  %v3727_v42 = vld [vmem:[#allocation4 + $0x10] sm:$0x7f] }
 0x43c   :  { %4404 = vmatprep.subr.bf16.mxu0 %v5929_v0  ;;  %v3728_v62 = vld [vmem:[#allocation4 + $0x18] sm:$0x7f]  ;;  %v3729_v33 = vpack.c.bf16 %v3727_v42, %v3727_v42  ;;  %v3723_v16 = vld [vmem:[#allocation4 + $0x10] sm:$0xfe] }
 0x43d   :  { %v3724_v63 = vld [vmem:[#allocation4 + $0x18] sm:$0xfe]  ;;  %v3730_v1 = vpack.c.bf16 %v3728_v62, %v3728_v62  ;;  %v3725_v18 = vpack.c.bf16 %v3723_v16, %v3723_v16 }
 0x43e   :  { %v3726_v9 = vpack.c.bf16 %v3724_v63, %v3724_v63  ;;  %4357 = vmatmul.mubr.bf16.vlgmr.msra.gmra.mrb[52].mxu0 %v7100_v52 }
 0x43f   :  { %4405 = vmatpush1.bf16.msra.mxu0 %v6784_v38  ;;  %5305 = vmatprep.mubr.msk.bf16.mxu1 %vm43_vm2, %v3730_v1  ;;  %v4101_v56 = vshll.u32 %v3725_v18, 16  ;;  %v4099_v60 = vshrl.u32 %v3725_v18, 16 }
 0x440   :  { %v4108_v34 = vshll.u32 %v3726_v9, 16  ;;  %3908 = vmatmul.mubr.bf16.vlgmr.msra.gmra.mrb[44].mxu1 %v3729_v33  ;;  %4406 = vmatprep.subr.bf16.mxu0 %v5929_v0  ;;  %v4106_v44 = vshrl.u32 %v3726_v9, 16 }
 0x441   :  { %4201 = vmatpush1.bf16.msra.mxu1 %v7204_v23  ;;  %v4103_v36 = vrot.slane %v4101_v56, 1 }
 0x442   :  { %v4110_v12 = vrot.slane %v4108_v34, 1  ;;  %4202 = vmatprep.subr.bf16.mxu1 %v5929_v0 }
 0x443   :  { %4407 = vmatpush1.bf16.msra.mxu0 %v6792_v29  ;;  %v7238_v29 = vld [vmem:[%s7572_s4 + $0x18] sm:$0xff]   ;;  %v7332_v42 = vor.u32 %v4103_v36, %v4099_v60 }
 0x444   :  { %v7218_v38 = vor.u32 %v4110_v12, %v4106_v44  ;;  %4408 = vmatprep.subr.bf16.mxu0 %v5929_v0 }
 0x445   :  { %4203 = vmatpush1.bf16.msra.mxu1 %v7214_v43 }
 0x446   :  { %5363 = vmatprep.mubr.msk.bf16.mxu1 %vm43_vm2, %v7218_v38  ;;  %5380 = vmatprep.mubr.msk.bf16.mxu0 %vm43_vm2, %v7218_v38 }
 0x447   :  { %4204 = vmatprep.subr.bf16.mxu1 %v5929_v0  ;;  %4409 = vmatpush1.bf16.msra.mxu0 %v6799_v46  ;;  %v7247_v46 = vld [vmem:[%s7572_s4 + $0x20] sm:$0xff]  }
 0x448   :  { %4410 = vmatprep.subr.bf16.mxu0 %v5929_v0 }
 0x449   :  { %4205 = vmatpush1.bf16.msra.mxu1 %v7227_v15 }
 0x44a   :  { %4206 = vmatprep.subr.bf16.mxu1 %v5929_v0 }
 0x44b   :  { %4411 = vmatpush1.bf16.msra.mxu0 %v6805_v48  ;;  %v7256_v48 = vld [vmem:[%s7572_s4 + $0x28] sm:$0xff]  }
 0x44c   :  { %4412 = vmatprep.subr.bf16.mxu0 %v5929_v0 }
 0x44d   :  { %4207 = vmatpush1.bf16.msra.mxu1 %v7238_v29 }
 0x44e   :  { %4208 = vmatprep.subr.bf16.mxu1 %v5929_v0 }
 0x44f   :  { %4413 = vmatpush1.bf16.msra.mxu0 %v6813_v50  ;;  %v7265_v50 = vld [vmem:[%s7572_s4 + $0x30] sm:$0xff]  }
 0x450   :  { %4414 = vmatprep.subr.bf16.mxu0 %v5929_v0 }
 0x451   :  { %4209 = vmatpush1.bf16.msra.mxu1 %v7247_v46 }
 0x452   :  { %4210 = vmatprep.subr.bf16.mxu1 %v5929_v0 }
 0x453   :  { %4415 = vmatpush1.bf16.msra.mxu0 %v6823_v14  ;;  %v7274_v14 = vld [vmem:[%s7572_s4 + $0x38] sm:$0xff]  }
 0x454   :  { %4416 = vmatprep.subr.bf16.mxu0 %v5929_v0 }
 0x455   :  { %4211 = vmatpush1.bf16.msra.mxu1 %v7256_v48 }
 0x456   :  { %4212 = vmatprep.subr.bf16.mxu1 %v5929_v0 }
 0x457   :  { %4417 = vmatpush1.bf16.msra.mxu0 %v6849_v54  ;;  %v7283_v54 = vld [vmem:[%s7572_s4 + $0x40] sm:$0xff]  }
 0x458   :  { %4418 = vmatprep.subr.bf16.mxu0 %v5929_v0 }
 0x459   :  { %4213 = vmatpush1.bf16.msra.mxu1 %v7265_v50 }
 0x45a   :  { %4214 = vmatprep.subr.bf16.mxu1 %v5929_v0 }
 0x45b   :  { %4419 = vmatpush1.bf16.msra.mxu0 %v6868_v55  ;;  %v7292_v55 = vld [vmem:[%s7572_s4 + $0x48] sm:$0xff]  }
 0x45c   :  { %4420 = vmatprep.subr.bf16.mxu0 %v5929_v0 }
 0x45d   :  { %4215 = vmatpush1.bf16.msra.mxu1 %v7274_v14 }
 0x45e   :  { %4216 = vmatprep.subr.bf16.mxu1 %v5929_v0 }
 0x45f   :  { %4421 = vmatpush1.bf16.msra.mxu0 %v6875_v58  ;;  %v7301_v58 = vld [vmem:[%s7572_s4 + $0x50] sm:$0xff]  }
 0x460   :  { %4422 = vmatprep.subr.bf16.mxu0 %v5929_v0 }
 0x461   :  { %4217 = vmatpush1.bf16.msra.mxu1 %v7283_v54 }
 0x462   :  { %4218 = vmatprep.subr.bf16.mxu1 %v5929_v0 }
 0x463   :  { %4423 = vmatpush1.bf16.msra.mxu0 %v6883_v5  ;;  %v7310_v5 = vld [vmem:[%s7572_s4 + $0x58] sm:$0xff]  }
 0x464   :  { %4424 = vmatprep.subr.bf16.mxu0 %v5929_v0 }
 0x465   :  { %4219 = vmatpush1.bf16.msra.mxu1 %v7292_v55 }
 0x466   :  { %4220 = vmatprep.subr.bf16.mxu1 %v5929_v0 }
 0x467   :  { %4425 = vmatpush1.bf16.msra.mxu0 %v6890_v59  ;;  %v7319_v59 = vld [vmem:[%s7572_s4 + $0x60] sm:$0xff]  }
 0x468   :  { %4426 = vmatprep.subr.bf16.mxu0 %v5929_v0 }
 0x469   :  { %4221 = vmatpush1.bf16.msra.mxu1 %v7301_v58 }
 0x46a   :  { %4222 = vmatprep.subr.bf16.mxu1 %v5929_v0 }
 0x46b   :  { %4427 = vmatpush1.bf16.msra.mxu0 %v6897_v61  ;;  %v7328_v61 = vld [vmem:[%s7572_s4 + $0x68] sm:$0xff]  }
 0x46c   :  { %4428 = vmatprep.subr.bf16.mxu0 %v5929_v0 }
 0x46d   :  { %4223 = vmatpush1.bf16.msra.mxu1 %v7310_v5 }
 0x46e   :  { %4224 = vmatprep.subr.bf16.mxu1 %v5929_v0 }
 0x46f   :  { %4429 = vmatpush1.bf16.msra.mxu0 %v6904_v21  ;;  %v3720_v21 = vld [vmem:[#allocation3 + $0x18] sm:$0xfe] }
 0x470   :  { %4430 = vmatprep.subr.bf16.mxu0 %v5929_v0 }
 0x471   :  { %4225 = vmatpush1.bf16.msra.mxu1 %v7319_v59 }
 0x472   :  { %4226 = vmatprep.subr.bf16.mxu1 %v5929_v0 }
 0x473   :  { %4431 = vmatpush1.bf16.msra.mxu0 %v6910_v53  ;;  %v3722_v53 = vpack.c.bf16 %v3720_v21, %v3720_v21 }
 0x474   :  { %4502 = vmatprep.subr.bf16.mxu0 %v5929_v0 }
 0x475   :  { %4227 = vmatpush1.bf16.msra.mxu1 %v7328_v61 }
 0x476   :  { %4437 = vmatmul.mubr.bf16.vlgmr.msra.gmra.mrb[56].mxu0 %v7332_v42  ;;  %4364 = vmatprep.subr.bf16.mxu1 %v5929_v0 }
 0x477   :  { %4503 = vmatpush1.bf16.msra.mxu0 %v7098_v26  ;;  %5382 = vmatprep.mubr.msk.bf16.mxu0 %vm43_vm2, %v7218_v38 }
 0x478   :  { %4233 = vmatmul.mubr.bf16.vlgmr.msra.gmra.mrb[48].mxu1 %v7332_v42  ;;  %4504 = vmatprep.subr.bf16.mxu0 %v5929_v0 }
 0x479   :  { %4365 = vmatpush1.bf16.msra.mxu1 %v6922_v27  ;;  %5379 = vmatprep.mubr.msk.bf16.mxu1 %vm43_vm2, %v7093_v2  ;;  %v4454_v27 = vshll.u32 %v3722_v53, 16 }
 0x47a   :  { %4366 = vmatprep.subr.bf16.mxu1 %v5929_v0 }
 0x47b   :  { %4505 = vmatpush1.bf16.msra.mxu0 %v7111_v13 }
 0x47c   :  { %4506 = vmatprep.subr.bf16.mxu0 %v5929_v0 }
 0x47d   :  { %4367 = vmatpush1.bf16.msra.mxu1 %v6929_v28  ;;  %v4456_v28 = vrot.slane %v4454_v27, 1 }
 0x47e   :  { %4368 = vmatprep.subr.bf16.mxu1 %v5929_v0 }
 0x47f   :  { %4507 = vmatpush1.bf16.msra.mxu0 %v7118_v4 }
 0x480   :  { %4508 = vmatprep.subr.bf16.mxu0 %v5929_v0 }
 0x481   :  { %4369 = vmatpush1.bf16.msra.mxu1 %v6936_v30  ;;  %v4452_v30 = vshrl.u32 %v3722_v53, 16 }
 0x482   :  { %4370 = vmatprep.subr.bf16.mxu1 %v5929_v0 }
 0x483   :  { %4509 = vmatpush1.bf16.msra.mxu0 %v7125_v22 }
 0x484   :  { %4510 = vmatprep.subr.bf16.mxu0 %v5929_v0 }
 0x485   :  { %4371 = vmatpush1.bf16.msra.mxu1 %v6944_v8  ;;  %v4457_v8 = vor.u32 %v4456_v28, %v4452_v30 }
 0x486   :  { %4372 = vmatprep.subr.bf16.mxu1 %v5929_v0 }
 0x487   :  { %4511 = vmatpush1.bf16.msra.mxu0 %v7132_v57 }
 0x488   :  { %4512 = vmatprep.subr.bf16.mxu0 %v5929_v0 }
 0x489   :  { %4373 = vmatpush1.bf16.msra.mxu1 %v6959_v41  ;;  %v3719_v41 = vld [vmem:[#allocation3 + $0x10] sm:$0xfe] }
 0x48a   :  { %4374 = vmatprep.subr.bf16.mxu1 %v5929_v0 }
 0x48b   :  { %4513 = vmatpush1.bf16.msra.mxu0 %v7139_v24 }
 0x48c   :  { %4514 = vmatprep.subr.bf16.mxu0 %v5929_v0 }
 0x48d   :  { %4375 = vmatpush1.bf16.msra.mxu1 %v6991_v35 }
 0x48e   :  { %4376 = vmatprep.subr.bf16.mxu1 %v5929_v0 }
 0x48f   :  { %4515 = vmatpush1.bf16.msra.mxu0 %v7146_v25 }
 0x490   :  { %4516 = vmatprep.subr.bf16.mxu0 %v5929_v0 }
 0x491   :  { %4377 = vmatpush1.bf16.msra.mxu1 %v6998_v3 }
 0x492   :  { %4378 = vmatprep.subr.bf16.mxu1 %v5929_v0 }
 0x493   :  { %4517 = vmatpush1.bf16.msra.mxu0 %v7153_v31 }
 0x494   :  { %4518 = vmatprep.subr.bf16.mxu0 %v5929_v0 }
 0x495   :  { %4379 = vmatpush1.bf16.msra.mxu1 %v7005_v45  ;;  %v3721_v45 = vpack.c.bf16 %v3719_v41, %v3719_v41 }
 0x496   :  { %4380 = vmatprep.subr.bf16.mxu1 %v5929_v0 }
 0x497   :  { %4519 = vmatpush1.bf16.msra.mxu0 %v7160_v32 }
 0x498   :  { %4520 = vmatprep.subr.bf16.mxu0 %v5929_v0 }
 0x499   :  { %4381 = vmatpush1.bf16.msra.mxu1 %v7012_v47 }
 0x49a   :  { %4382 = vmatprep.subr.bf16.mxu1 %v5929_v0 }
 0x49b   :  { %4521 = vmatpush1.bf16.msra.mxu0 %v7167_v6 }
 0x49c   :  { %4522 = vmatprep.subr.bf16.mxu0 %v5929_v0 }
 0x49d   :  { %4383 = vmatpush1.bf16.msra.mxu1 %v7019_v49 }
 0x49e   :  { %4384 = vmatprep.subr.bf16.mxu1 %v5929_v0 }
 0x49f   :  { %4523 = vmatpush1.bf16.msra.mxu0 %v7174_v19 }
 0x4a0   :  { %4524 = vmatprep.subr.bf16.mxu0 %v5929_v0 }
 0x4a1   :  { %4385 = vmatpush1.bf16.msra.mxu1 %v7026_v51  ;;  %v4447_v51 = vshll.u32 %v3721_v45, 16 }
 0x4a2   :  { %4386 = vmatprep.subr.bf16.mxu1 %v5929_v0 }
 0x4a3   :  { %4525 = vmatpush1.bf16.msra.mxu0 %v7181_v17 }
 0x4a4   :  { %4526 = vmatprep.subr.bf16.mxu0 %v5929_v0 }
 0x4a5   :  { %4387 = vmatpush1.bf16.msra.mxu1 %v7033_v10  ;;  %v4449_v10 = vrot.slane %v4447_v51, 1 }
 0x4a6   :  { %4388 = vmatprep.subr.bf16.mxu1 %v5929_v0 }
 0x4a7   :  { %4527 = vmatpush1.bf16.msra.mxu0 %v7188_v37 }
 0x4a8   :  { %4528 = vmatprep.subr.bf16.mxu0 %v5929_v0 }
 0x4a9   :  { %4389 = vmatpush1.bf16.msra.mxu1 %v7040_v11  ;;  %v4445_v11 = vshrl.u32 %v3721_v45, 16 }
 0x4aa   :  { %4390 = vmatprep.subr.bf16.mxu1 %v5929_v0 }
 0x4ab   :  { %4529 = vmatpush1.bf16.msra.mxu0 %v7196_v39 }
 0x4ad   :  { %4391 = vmatpush1.bf16.msra.mxu1 %v7047_v20  ;;  %v4450_v20 = vor.u32 %v4449_v10, %v4445_v11 }
 0x4ae   :  { %4535 = vmatmul.mubr.bf16.vlgmr.msra.gmra.mrb[60].mxu0 %v7332_v42  ;;  %4462 = vmatprep.subr.bf16.mxu1 %v5929_v0 }
 0x4b0   :  { %4397 = vmatmul.mubr.bf16.vlgmr.msra.gmra.mrb[52].mxu1 %v7100_v52 }
 0x4b1   :  { %4463 = vmatpush1.bf16.msra.mxu1 %v7204_v23  ;;  %5381 = vmatprep.mubr.msk.bf16.mxu1 %vm43_vm2, %v4457_v8 }
 0x4b2   :  { %4464 = vmatprep.subr.bf16.mxu1 %v5929_v0 }
 0x4b5   :  { %4465 = vmatpush1.bf16.msra.mxu1 %v7214_v43 }
 0x4b6   :  { %4466 = vmatprep.subr.bf16.mxu1 %v5929_v0 }
 0x4b9   :  { %4467 = vmatpush1.bf16.msra.mxu1 %v7227_v15 }
 0x4ba   :  { %4468 = vmatprep.subr.bf16.mxu1 %v5929_v0 }
 0x4bd   :  { %4469 = vmatpush1.bf16.msra.mxu1 %v7238_v29 }
 0x4be   :  { %4470 = vmatprep.subr.bf16.mxu1 %v5929_v0 }
 0x4c1   :  { %4471 = vmatpush1.bf16.msra.mxu1 %v7247_v46 }
 0x4c2   :  { %4472 = vmatprep.subr.bf16.mxu1 %v5929_v0 }
 0x4c5   :  { %4473 = vmatpush1.bf16.msra.mxu1 %v7256_v48 }
 0x4c6   :  { %4474 = vmatprep.subr.bf16.mxu1 %v5929_v0 }
 0x4c9   :  { %4475 = vmatpush1.bf16.msra.mxu1 %v7265_v50 }
 0x4ca   :  { %4476 = vmatprep.subr.bf16.mxu1 %v5929_v0 }
 0x4cd   :  { %4477 = vmatpush1.bf16.msra.mxu1 %v7274_v14 }
 0x4ce   :  { %4478 = vmatprep.subr.bf16.mxu1 %v5929_v0 }
 0x4d1   :  { %4479 = vmatpush1.bf16.msra.mxu1 %v7283_v54 }
 0x4d2   :  { %4480 = vmatprep.subr.bf16.mxu1 %v5929_v0 }
 0x4d5   :  { %4481 = vmatpush1.bf16.msra.mxu1 %v7292_v55 }
 0x4d6   :  { %4482 = vmatprep.subr.bf16.mxu1 %v5929_v0 }
 0x4d9   :  { %4483 = vmatpush1.bf16.msra.mxu1 %v7301_v58  ;;  %v4036_v35 = vpop.f32.mrb[48].mxu0 }
 0x4da   :  { %v4038_v3 = vpop.f32.mrb[49].mxu0  ;;  %4484 = vmatprep.subr.bf16.mxu1 %v5929_v0 }
 0x4db   :  { %v4039_v47 = vpop.f32.mrb[50].mxu0 }
 0x4dc   :  { %v4040_v49 = vpop.f32.mrb[51].mxu0 }
 0x4dd   :  { %4485 = vmatpush1.bf16.msra.mxu1 %v7310_v5 }
 0x4de   :  { %4486 = vmatprep.subr.bf16.mxu1 %v5929_v0 }
 0x4e1   :  { %4487 = vmatpush1.bf16.msra.mxu1 %v7319_v59 }
 0x4e2   :  { %4488 = vmatprep.subr.bf16.mxu1 %v5929_v0 }
 0x4e5   :  { %4489 = vmatpush1.bf16.msra.mxu1 %v7328_v61 }
 0x4e8   :  { %4495 = vmatmul.mubr.bf16.vlgmr.msra.gmra.mrb[56].mxu1 %v4450_v20 }
 0x511   :  { %v4358_v2 = vpop.f32.mrb[52].mxu0 }
 0x512   :  { %v4360_v26 = vpop.f32.mrb[53].mxu0 }
 0x513   :  { %v4361_v52 = vpop.f32.mrb[54].mxu0  ;;  %v3909_v13 = vpop.f32.mrb[44].mxu1 }
 0x514   :  { %v4037_v4 = vadd.f32 %v4036_v35, %v3909_v13  ;;  %v4362_v22 = vpop.f32.mrb[55].mxu0  ;;  %v3911_v57 = vpop.f32.mrb[45].mxu1 }
 0x515   :  { %v3912_v24 = vpop.f32.mrb[46].mxu1 }
 0x516   :  { %v4543_v25 = vadd.f32 %v4037_v4, %v6737_v7  ;;  %v3913_v31 = vpop.f32.mrb[47].mxu1 }
 0x518   :  { %5894 = vtanh.f32 %v4543_v25 }
 0x522   :  { %v5895_v32 = vpop.eup %5894 }
 0x523   :  { %v4546_v0 = vcombine.high %v5895_v32, %v5895_v32  ;;  %v4553_v6 = vrot.slane %v5895_v32, %v6096_v40 }
 0x525   :  { %v4560_v19 = vrot.slane %v4546_v0, %v6096_v40  ;;  %v4561_v17 = vcombine.high %v4553_v6, %v4553_v6  ;;  %v4569_v37 = vrot.slane %v4553_v6, %v6096_v40 }
 0x527   :  { %v4562_v39 = vcombine.high %v4560_v19, %v4560_v19  ;;  %v4576_v62 = vrot.slane %v4560_v19, %v6096_v40  ;;  %v4583_v63 = vrot.slane %v4561_v17, %v6096_v40  ;;  %v4591_v1 = vcombine.high %v4569_v37, %v4569_v37  ;;  %5383 = vst.msk [vmem:[%s7575_s7 + $0x1c] sm:$0x1] %vm2600_vm7, %v4569_v37 }
 0x529   :  { %v4590_v23 = vrot.slane %v4562_v39, %v6096_v40  ;;  %v4592_v9 = vcombine.high %v4576_v62, %v4576_v62  ;;  %v4593_v33 = vcombine.high %v4583_v63, %v4583_v63  ;;  %5384 = vst.msk [vmem:[%s7575_s7 + $0x20] sm:$0x1] %vm2600_vm7, %v4583_v63  ;;  %5385 = vst.msk [vmem:[%s7575_s7 + $0x24] sm:$0x1] %vm2600_vm7, %v4591_v1 }
 0x52a   :  { %5387 = vst.msk [vmem:[%s7575_s7 + $0x2c] sm:$0x1] %vm2600_vm7, %v4576_v62 }
 0x52b   :  { %5386 = vst.msk [vmem:[%s7575_s7 + $0x28] sm:$0x1] %vm2600_vm7, %v4593_v33  ;;  %5388 = vst.msk [vmem:[%s7575_s7 + $0x30] sm:$0x1] %vm2600_vm7, %v4590_v23 }
 0x52c   :  { %5389 = vst.msk [vmem:[%s7575_s7 + $0x34] sm:$0x1] %vm2600_vm7, %v4592_v9 }
 0x549   :  { %v4438_v34 = vpop.f32.mrb[56].mxu0 }
 0x54a   :  { %v4440_v43 = vpop.f32.mrb[57].mxu0 }
 0x54b   :  { %v4234_v44 = vpop.f32.mrb[48].mxu1  ;;  %v4441_v12 = vpop.f32.mrb[58].mxu0 }
 0x54c   :  { %v4359_v38 = vadd.f32 %v4358_v2, %v4234_v44  ;;  %v4236_v15 = vpop.f32.mrb[49].mxu1  ;;  %v4442_v29 = vpop.f32.mrb[59].mxu0 }
 0x54d   :  { %v4237_v46 = vpop.f32.mrb[50].mxu1 }
 0x54e   :  { %v4609_v48 = vadd.f32 %v4359_v38, %v6737_v7  ;;  %v4238_v50 = vpop.f32.mrb[51].mxu1 }
 0x550   :  { %5896 = vtanh.f32 %v4609_v48 }
 0x55a   :  { %v5897_v14 = vpop.eup %5896 }
 0x55b   :  { %v4612_v54 = vcombine.high %v5897_v14, %v5897_v14  ;;  %v4619_v55 = vrot.slane %v5897_v14, %v6096_v40 }
 0x55d   :  { %v4626_v58 = vrot.slane %v4612_v54, %v6096_v40  ;;  %v4627_v16 = vcombine.high %v4619_v55, %v4619_v55  ;;  %v4635_v18 = vrot.slane %v4619_v55, %v6096_v40 }
 0x55f   :  { %v4628_v5 = vcombine.high %v4626_v58, %v4626_v58  ;;  %v4642_v56 = vrot.slane %v4626_v58, %v6096_v40  ;;  %v4649_v59 = vrot.slane %v4627_v16, %v6096_v40  ;;  %v4657_v36 = vcombine.high %v4635_v18, %v4635_v18  ;;  %5390 = vst.msk [vmem:[%s7575_s7 + $0x1d] sm:$0x1] %vm2600_vm7, %v4635_v18 }
 0x561   :  { %v4656_v61 = vrot.slane %v4628_v5, %v6096_v40  ;;  %v4658_v60 = vcombine.high %v4642_v56, %v4642_v56  ;;  %v4659_v42 = vcombine.high %v4649_v59, %v4649_v59  ;;  %5391 = vst.msk [vmem:[%s7575_s7 + $0x21] sm:$0x1] %vm2600_vm7, %v4649_v59  ;;  %5392 = vst.msk [vmem:[%s7575_s7 + $0x25] sm:$0x1] %vm2600_vm7, %v4657_v36 }
 0x562   :  { %5394 = vst.msk [vmem:[%s7575_s7 + $0x2d] sm:$0x1] %vm2600_vm7, %v4642_v56 }
 0x563   :  { %5393 = vst.msk [vmem:[%s7575_s7 + $0x29] sm:$0x1] %vm2600_vm7, %v4659_v42  ;;  %5395 = vst.msk [vmem:[%s7575_s7 + $0x31] sm:$0x1] %vm2600_vm7, %v4656_v61 }
 0x564   :  { %5396 = vst.msk [vmem:[%s7575_s7 + $0x35] sm:$0x1] %vm2600_vm7, %v4658_v60 }
 0x581   :  { %v4536_v21 = vpop.f32.mrb[60].mxu0 }
 0x582   :  { %v4538_v53 = vpop.f32.mrb[61].mxu0 }
 0x583   :  { %v4398_v27 = vpop.f32.mrb[52].mxu1  ;;  %v4539_v28 = vpop.f32.mrb[62].mxu0 }
 0x584   :  { %v4439_v30 = vadd.f32 %v4438_v34, %v4398_v27  ;;  %v4400_v8 = vpop.f32.mrb[53].mxu1  ;;  %v4540_v41 = vpop.f32.mrb[63].mxu0 }
 0x585   :  { %v4401_v35 = vpop.f32.mrb[54].mxu1 }
 0x586   :  { %v4674_v3 = vadd.f32 %v4439_v30, %v6737_v7  ;;  %v4402_v45 = vpop.f32.mrb[55].mxu1 }
 0x588   :  { %5898 = vtanh.f32 %v4674_v3 }
 0x592   :  { %v5899_v47 = vpop.eup %5898 }
 0x593   :  { %v4677_v49 = vcombine.high %v5899_v47, %v5899_v47  ;;  %v4684_v51 = vrot.slane %v5899_v47, %v6096_v40 }
 0x595   :  { %v4691_v10 = vrot.slane %v4677_v49, %v6096_v40  ;;  %v4692_v11 = vcombine.high %v4684_v51, %v4684_v51  ;;  %v4700_v20 = vrot.slane %v4684_v51, %v6096_v40 }
 0x597   :  { %v4693_v2 = vcombine.high %v4691_v10, %v4691_v10  ;;  %v4707_v26 = vrot.slane %v4691_v10, %v6096_v40  ;;  %v4714_v52 = vrot.slane %v4692_v11, %v6096_v40  ;;  %v4722_v13 = vcombine.high %v4700_v20, %v4700_v20  ;;  %5397 = vst.msk [vmem:[%s7575_s7 + $0x1e] sm:$0x1] %vm2600_vm7, %v4700_v20 }
 0x599   :  { %v4721_v4 = vrot.slane %v4693_v2, %v6096_v40  ;;  %v4723_v22 = vcombine.high %v4707_v26, %v4707_v26  ;;  %v4724_v57 = vcombine.high %v4714_v52, %v4714_v52  ;;  %5398 = vst.msk [vmem:[%s7575_s7 + $0x22] sm:$0x1] %vm2600_vm7, %v4714_v52  ;;  %5399 = vst.msk [vmem:[%s7575_s7 + $0x26] sm:$0x1] %vm2600_vm7, %v4722_v13 }
 0x59a   :  { %5401 = vst.msk [vmem:[%s7575_s7 + $0x2e] sm:$0x1] %vm2600_vm7, %v4707_v26 }
 0x59b   :  { %5400 = vst.msk [vmem:[%s7575_s7 + $0x2a] sm:$0x1] %vm2600_vm7, %v4724_v57  ;;  %5402 = vst.msk [vmem:[%s7575_s7 + $0x32] sm:$0x1] %vm2600_vm7, %v4721_v4 }
 0x59c   :  { %5403 = vst.msk [vmem:[%s7575_s7 + $0x36] sm:$0x1] %vm2600_vm7, %v4723_v22 }
 0x5bb   :  { %v4496_v24 = vpop.f32.mrb[56].mxu1 }
 0x5bc   :  { %v4537_v25 = vadd.f32 %v4536_v21, %v4496_v24  ;;  %v4498_v31 = vpop.f32.mrb[57].mxu1 }
 0x5bd   :  { %v4499_v32 = vpop.f32.mrb[58].mxu1 }
 0x5be   :  { %v4739_v0 = vadd.f32 %v4537_v25, %v6737_v7  ;;  %v4500_v6 = vpop.f32.mrb[59].mxu1 }
 0x5c0   :  { %5900 = vtanh.f32 %v4739_v0 }
 0x5ca   :  { %v5901_v19 = vpop.eup %5900 }
 0x5cb   :  { %v4742_v17 = vcombine.high %v5901_v19, %v5901_v19  ;;  %v4749_v37 = vrot.slane %v5901_v19, %v6096_v40 }
 0x5cd   :  { %v4756_v39 = vrot.slane %v4742_v17, %v6096_v40  ;;  %v4757_v62 = vcombine.high %v4749_v37, %v4749_v37  ;;  %v4765_v63 = vrot.slane %v4749_v37, %v6096_v40 }
 0x5cf   :  { %v4758_v1 = vcombine.high %v4756_v39, %v4756_v39  ;;  %v4772_v23 = vrot.slane %v4756_v39, %v6096_v40  ;;  %v4779_v9 = vrot.slane %v4757_v62, %v6096_v40  ;;  %v4787_v33 = vcombine.high %v4765_v63, %v4765_v63  ;;  %5404 = vst.msk [vmem:[%s7575_s7 + $0x1f] sm:$0x1] %vm2600_vm7, %v4765_v63 }
 0x5d1   :  { %v4786_v7 = vrot.slane %v4758_v1, %v6096_v40  ;;  %v4788_v34 = vcombine.high %v4772_v23, %v4772_v23  ;;  %v4789_v43 = vcombine.high %v4779_v9, %v4779_v9  ;;  %5405 = vst.msk [vmem:[%s7575_s7 + $0x23] sm:$0x1] %vm2600_vm7, %v4779_v9  ;;  %5406 = vst.msk [vmem:[%s7575_s7 + $0x27] sm:$0x1] %vm2600_vm7, %v4787_v33 }
 0x5d2   :  { %5408 = vst.msk [vmem:[%s7575_s7 + $0x2f] sm:$0x1] %vm2600_vm7, %v4772_v23 }
 0x5d3   :  { %5407 = vst.msk [vmem:[%s7575_s7 + $0x2b] sm:$0x1] %vm2600_vm7, %v4789_v43  ;;  %5409 = vst.msk [vmem:[%s7575_s7 + $0x33] sm:$0x1] %vm2600_vm7, %v4786_v7 }
 0x5d4   :  { %5410 = vst.msk [vmem:[%s7575_s7 + $0x37] sm:$0x1] %vm2600_vm7, %v4788_v34 }
 0x5d5   :  { %4808 = vsyncpa [#allocation7], 1 }

</bundles_post_ra>
